<compile_context>
chip_gen: v7x
topology: tpu7x:2x2x1
jax: 0.10.0
libtpu: 0.0.40
codegen_flags: <defaults>
</compile_context>

<pallas_src>
import functools

import numpy as np
import jax
import jax.numpy as jnp
from jax import lax
from jax.experimental import pallas as pl
from jax.experimental.pallas import tpu as pltpu


def _round_up(a, m):
    return -(-a // m) * m


def ternary_kernel(xc_ref, xn_ref, yc_ref, yn_ref, o_ref, xs_ref, ys_ref, *,
                   patch_size, pad, tile_h, H, W, compute_dtype):
    """One (batch, row-tile) grid cell.

    xc_ref/yc_ref: (TH, Wp)  current TH-row block of the padded channel-mean.
    xn_ref/yn_ref: (HB, Wp)  first HB rows of the NEXT row block (halo source).
    xs_ref/ys_ref: (TH+HB, Wp) VMEM scratch where the halo'd tile is assembled.
    """
    TH = tile_h
    Wp = xc_ref.shape[-1]
    hb = xn_ref.shape[0]
    halo = 2 * pad
    used = TH + halo          # rows of the halo'd tile actually read

    # ---- assemble the halo'd tile in VMEM (replaces the wrapper-side stack) ----
    xs_ref[0:TH, :] = xc_ref[...]
    ys_ref[0:TH, :] = yc_ref[...]
    xs_ref[TH:TH + hb, :] = xn_ref[...]
    ys_ref[TH:TH + hb, :] = yn_ref[...]

    cdt = compute_dtype
    xfull = xs_ref[0:used, :].astype(cdt)
    yfull = ys_ref[0:used, :].astype(cdt)
    xcen = xfull[pad:pad + TH, :]          # center pixels (hoisted out of loops)
    ycen = yfull[pad:pad + TH, :]

    acc = jnp.zeros((TH, Wp), jnp.float32)  # f32 accumulator even if cdt is bf16
    for dj in range(patch_size):
        # One lane (XLU) roll of the FULL halo tile per dj (item 1); the wrap
        # only lands in pad columns, and pad values never feed un-masked centers.
        sc = (pad - dj) % Wp
        xrj = pltpu.roll(xfull, sc, 1) if sc else xfull
        yrj = pltpu.roll(yfull, sc, 1) if sc else yfull
        for di in range(patch_size):
            if di == pad and dj == pad:
                continue  # center patch element: loc_diff == 0 -> contributes 0
            xsd = xrj[di:di + TH, :]       # row (sublane) shift: static slice
            ysd = yrj[di:di + TH, :]
            # Per-shift elementwise chain (VALU-bound; EUP carries rsqrt/recip).
            # If a bundle dump shows these temporaries materializing to VMEM
            # (vst-bound on v5e), strip-mine Wp in 256-512 lane chunks here.
            ldx = xsd - xcen
            ldy = ysd - ycen
            nx = ldx * lax.rsqrt(0.81 + ldx * ldx)   # == ldx / sqrt(0.81 + ldx^2)
            ny = ldy * lax.rsqrt(0.81 + ldy * ldy)
            d = nx - ny
            d2 = d * d
            # d^2 / (0.1 + d^2) via EUP approximate reciprocal (off the VALU).
            acc = acc + (d2 * pl.reciprocal(0.1 + d2, approx=True)).astype(jnp.float32)

    # Validity mask applied ONCE per tile; fold the 1/49 patch-mean into the sum.
    t = pl.program_id(1)
    row = lax.broadcasted_iota(jnp.int32, (TH, Wp), 0)
    col = lax.broadcasted_iota(jnp.int32, (TH, Wp), 1)
    grow = row + t * TH                               # global output row
    valid = ((grow >= pad) & (grow < H - pad) &
             (col >= 2 * pad) & (col < W))            # padded col coords
    partial = jnp.sum(jnp.where(valid, acc, 0.0)) * (1.0 / float(patch_size * patch_size))
    o_ref[...] = jnp.reshape(partial, (1, 1))


def ternary_loss(x, y, patch_size=7, tile_h=256, compute_dtype=jnp.float32):
    """Forward of the Ternary census loss.

    compute_dtype=jnp.bfloat16 (v6e/v7x only) runs the per-shift chain in packed
    bf16 with an f32 accumulator (~2x on the binding VALU slot, ~1e-2 relative
    error on the loss).  Default f32 preserves parity with the PyTorch module.
    """
    assert x.shape == y.shape and x.ndim == 4
    B, C, H, W = x.shape
    pad = patch_size // 2
    HB = _round_up(max(2 * pad, 1), 8)                 # halo ("next block") row height

    Wp = max(_round_up(W + 2 * pad, 128), 128)         # lane-dense padded width
    # Invariant: Wp - pad - W >= pad, so roll wrap-around stays in masked columns.

    # Row tile: big (item 7), VMEM-budgeted against Wp, a multiple of HB.
    TH = min(_round_up(tile_h, HB), _round_up(H, HB))
    budget_rows = max(HB, (256 * 1152 // Wp) // HB * HB)
    TH = min(TH, budget_rows)
    # v7x megacore: make sure there are >= 2 grid cells to shard (item 4).
    if B * (-(-H // TH)) < 2 and H > HB:
        TH = max(HB, _round_up(-(-H // 2), HB))
    nT = -(-H // TH)                                   # number of row tiles

    # Padded rows cover every row that can feed a *valid* (unmasked) center.
    HP = _round_up(H + 2 * pad, TH)
    n_hb = HP // HB
    hb_per_tile = TH // HB

    def prep(t):
        # Channel mean + zero pad in the wrapper; NO halo-tile materialization.
        tm = jnp.mean(t.astype(jnp.float32), axis=1)                        # (B,H,W)
        return jnp.pad(tm, ((0, 0), (pad, HP - pad - H), (pad, Wp - pad - W)))

    xp = prep(x)
    yp = prep(y)

    kernel = functools.partial(ternary_kernel, patch_size=patch_size, pad=pad,
                               tile_h=TH, H=H, W=W, compute_dtype=compute_dtype)

    cur_spec = pl.BlockSpec((None, TH, Wp), lambda b, t: (b, t, 0))
    # Tiny HB-row block at the start of the next row tile; clamped index is only
    # ever garbage for rows that feed masked-out centers.
    nxt_spec = pl.BlockSpec(
        (None, HB, Wp),
        lambda b, t: (b, jnp.minimum((t + 1) * hb_per_tile, n_hb - 1), 0))

    partials = pl.pallas_call(
        kernel,
        out_shape=jax.ShapeDtypeStruct((B, nT, 1, 1), jnp.float32),
        grid_spec=pltpu.PrefetchScalarGridSpec(
            num_scalar_prefetch=0,
            grid=(B, nT),
            in_specs=[cur_spec, nxt_spec, cur_spec, nxt_spec],
            out_specs=pl.BlockSpec((None, None, 1, 1), lambda b, t: (b, t, 0, 0)),
            scratch_shapes=[pltpu.VMEM((TH + HB, Wp), jnp.float32),
                            pltpu.VMEM((TH + HB, Wp), jnp.float32)],
        ),
        compiler_params=pltpu.CompilerParams(
            dimension_semantics=("parallel", "parallel"),   # megacore-shardable
            vmem_limit_bytes=40 * 1024 * 1024,
        ),
    )(xp, xp, yp, yp)

    # (dist * mask).mean() over B*1*H*W elements.
    return jnp.sum(partials) / (B * H * W)


def ternary_ref(x, y, patch_size=7):
    """Pure-JAX reference matching the PyTorch module's forward."""
    pad = patch_size // 2
    B, C, H, W = x.shape

    def transform(t):
        tm = jnp.mean(t, axis=1, keepdims=True)                       # (B,1,H,W)
        tp = jnp.pad(tm, ((0, 0), (0, 0), (pad, pad), (pad, pad)))
        patches = jnp.stack(
            [tp[:, 0, di:di + H, dj:dj + W]
             for di in range(patch_size) for dj in range(patch_size)],
            axis=1)                                                    # (B,49,H,W)
        loc = patches - tm
        return loc / jnp.sqrt(0.81 + loc ** 2)

    lx = transform(x)
    ly = transform(y)  # .detach() is a no-op for the forward value
    d = lx - ly
    dist = jnp.mean(d ** 2 / (0.1 + d ** 2), axis=1, keepdims=True)    # (B,1,H,W)
    mask = jnp.zeros((B, 1, H, W), x.dtype).at[:, :, pad:H - pad, pad:W - pad].set(1.0)
    return jnp.mean(dist * mask)


if __name__ == "__main__":
    key = jax.random.PRNGKey(0)
    kx, ky = jax.random.split(key)
    B, C, H, W = 2, 4, 16, 16
    x = jax.random.uniform(kx, (B, C, H, W), jnp.float32)
    y = jax.random.uniform(ky, (B, C, H, W), jnp.float32)

    loss = jax.jit(ternary_loss)(x, y)
    jax.block_until_ready(loss)

    ref = ternary_ref(x, y)
    # Slightly looser rtol because d^2/(0.1+d^2) uses the EUP approximate
    # reciprocal (relative error ~1e-4 per term; sums of positives don't amplify it).
    assert np.allclose(np.asarray(loss), np.asarray(ref), rtol=2e-3, atol=1e-5), (
        float(loss), float(ref))
    print("KERNEL_OK")
</pallas_src>

<mosaic_0001>
module attributes {stable_mosaic.version = 11 : i64} {
  func.func @ternary_kernel(%arg0: i32, %arg1: i32, %arg2: memref<1x16x128xf32, #tpu.memory_space<vmem>>, %arg3: memref<1x8x128xf32, #tpu.memory_space<vmem>>, %arg4: memref<1x16x128xf32, #tpu.memory_space<vmem>>, %arg5: memref<1x8x128xf32, #tpu.memory_space<vmem>>, %arg6: memref<1x1x1x1xf32, #tpu.memory_space<vmem>>, %arg7: memref<24x128xf32, #tpu.memory_space<vmem>>, %arg8: memref<24x128xf32, #tpu.memory_space<vmem>>) attributes {dimension_semantics = [#tpu.dimension_semantics<parallel>, #tpu.dimension_semantics<parallel>], iteration_bounds = array<i64: 2, 1>, scalar_prefetch = 0 : i64, scratch_operands = 2 : i64, tpu.core_type = #tpu.core_type<tc>, window_params = [{transform_indices = @transform_0, window_bounds = array<i64: 1, 16, 128>}, {transform_indices = @transform_1, window_bounds = array<i64: 1, 8, 128>}, {transform_indices = @transform_2, window_bounds = array<i64: 1, 16, 128>}, {transform_indices = @transform_3, window_bounds = array<i64: 1, 8, 128>}, {transform_indices = @transform_4, window_bounds = array<i64: 1, 1, 1, 1>}]} {
    %c0 = arith.constant 0 : index
    %c0_0 = arith.constant 0 : index
    %c0_1 = arith.constant 0 : index
    %0 = vector.load %arg2[%c0, %c0_0, %c0_1] : memref<1x16x128xf32, #tpu.memory_space<vmem>>, vector<1x16x128xf32>
    %1 = vector.shape_cast %0 : vector<1x16x128xf32> to vector<16x128xf32>
    %c0_2 = arith.constant 0 : index
    %c0_3 = arith.constant 0 : index
    %2 = vector.load %arg7[%c0_2, %c0_3] : memref<24x128xf32, #tpu.memory_space<vmem>>, vector<16x128xf32>
    tpu.vector_store %arg7[%c0_2, %c0_3], %1 {strides = array<i32>} : memref<24x128xf32, #tpu.memory_space<vmem>>, vector<16x128xf32>,
    %c0_4 = arith.constant 0 : index
    %c0_5 = arith.constant 0 : index
    %c0_6 = arith.constant 0 : index
    %3 = vector.load %arg4[%c0_4, %c0_5, %c0_6] : memref<1x16x128xf32, #tpu.memory_space<vmem>>, vector<1x16x128xf32>
    %4 = vector.shape_cast %3 : vector<1x16x128xf32> to vector<16x128xf32>
    %c0_7 = arith.constant 0 : index
    %c0_8 = arith.constant 0 : index
    %5 = vector.load %arg8[%c0_7, %c0_8] : memref<24x128xf32, #tpu.memory_space<vmem>>, vector<16x128xf32>
    tpu.vector_store %arg8[%c0_7, %c0_8], %4 {strides = array<i32>} : memref<24x128xf32, #tpu.memory_space<vmem>>, vector<16x128xf32>,
    %c0_9 = arith.constant 0 : index
    %c0_10 = arith.constant 0 : index
    %c0_11 = arith.constant 0 : index
    %6 = vector.load %arg3[%c0_9, %c0_10, %c0_11] : memref<1x8x128xf32, #tpu.memory_space<vmem>>, vector<1x8x128xf32>
    %7 = vector.shape_cast %6 : vector<1x8x128xf32> to vector<8x128xf32>
    %c16 = arith.constant 16 : index
    %c0_12 = arith.constant 0 : index
    %8 = vector.load %arg7[%c16, %c0_12] : memref<24x128xf32, #tpu.memory_space<vmem>>, vector<8x128xf32>
    tpu.vector_store %arg7[%c16, %c0_12], %7 {strides = array<i32>} : memref<24x128xf32, #tpu.memory_space<vmem>>, vector<8x128xf32>,
    %c0_13 = arith.constant 0 : index
    %c0_14 = arith.constant 0 : index
    %c0_15 = arith.constant 0 : index
    %9 = vector.load %arg5[%c0_13, %c0_14, %c0_15] : memref<1x8x128xf32, #tpu.memory_space<vmem>>, vector<1x8x128xf32>
    %10 = vector.shape_cast %9 : vector<1x8x128xf32> to vector<8x128xf32>
    %c16_16 = arith.constant 16 : index
    %c0_17 = arith.constant 0 : index
    %11 = vector.load %arg8[%c16_16, %c0_17] : memref<24x128xf32, #tpu.memory_space<vmem>>, vector<8x128xf32>
    tpu.vector_store %arg8[%c16_16, %c0_17], %10 {strides = array<i32>} : memref<24x128xf32, #tpu.memory_space<vmem>>, vector<8x128xf32>,
    %c0_18 = arith.constant 0 : index
    %c0_19 = arith.constant 0 : index
    %12 = vector.load %arg7[%c0_18, %c0_19] : memref<24x128xf32, #tpu.memory_space<vmem>>, vector<22x128xf32>
    %c0_20 = arith.constant 0 : index
    %c0_21 = arith.constant 0 : index
    %13 = vector.load %arg8[%c0_20, %c0_21] : memref<24x128xf32, #tpu.memory_space<vmem>>, vector<22x128xf32>
    %14 = vector.extract_strided_slice %12 {offsets = [3, 0], sizes = [16, 128], strides = [1, 1]} : vector<22x128xf32> to vector<16x128xf32>
    %15 = vector.extract_strided_slice %13 {offsets = [3, 0], sizes = [16, 128], strides = [1, 1]} : vector<22x128xf32> to vector<16x128xf32>
    %cst = arith.constant 0.000000e+00 : f32
    %16 = vector.broadcast %cst : f32 to vector<16x128xf32>
    %c3_i32 = arith.constant 3 : i32
    %17 = tpu.dynamic_rotate %12 by %c3_i32 dim 1 : vector<22x128xf32>, i32 -> vector<22x128xf32>
    %c3_i32_22 = arith.constant 3 : i32
    %18 = tpu.dynamic_rotate %13 by %c3_i32_22 dim 1 : vector<22x128xf32>, i32 -> vector<22x128xf32>
    %19 = vector.extract_strided_slice %17 {offsets = [0, 0], sizes = [16, 128], strides = [1, 1]} : vector<22x128xf32> to vector<16x128xf32>
    %20 = vector.extract_strided_slice %18 {offsets = [0, 0], sizes = [16, 128], strides = [1, 1]} : vector<22x128xf32> to vector<16x128xf32>
    %21 = arith.subf %19, %14 : vector<16x128xf32>
    %22 = arith.subf %20, %15 : vector<16x128xf32>
    %23 = arith.mulf %21, %21 : vector<16x128xf32>
    %cst_23 = arith.constant 8.100000e-01 : f32
    %24 = vector.broadcast %cst_23 : f32 to vector<16x128xf32>
    %25 = arith.addf %24, %23 : vector<16x128xf32>
    %26 = math.rsqrt %25 : vector<16x128xf32>
    %27 = arith.mulf %21, %26 : vector<16x128xf32>
    %28 = arith.mulf %22, %22 : vector<16x128xf32>
    %cst_24 = arith.constant 8.100000e-01 : f32
    %29 = vector.broadcast %cst_24 : f32 to vector<16x128xf32>
    %30 = arith.addf %29, %28 : vector<16x128xf32>
    %31 = math.rsqrt %30 : vector<16x128xf32>
    %32 = arith.mulf %22, %31 : vector<16x128xf32>
    %33 = arith.subf %27, %32 : vector<16x128xf32>
    %34 = arith.mulf %33, %33 : vector<16x128xf32>
    %cst_25 = arith.constant 1.000000e-01 : f32
    %35 = vector.broadcast %cst_25 : f32 to vector<16x128xf32>
    %36 = arith.addf %35, %34 : vector<16x128xf32>
    %37 = tpu.reciprocal %36 {approx = true} : vector<16x128xf32> -> vector<16x128xf32>
    %38 = arith.mulf %34, %37 : vector<16x128xf32>
    %39 = arith.addf %16, %38 : vector<16x128xf32>
    %40 = vector.extract_strided_slice %17 {offsets = [1, 0], sizes = [16, 128], strides = [1, 1]} : vector<22x128xf32> to vector<16x128xf32>
    %41 = vector.extract_strided_slice %18 {offsets = [1, 0], sizes = [16, 128], strides = [1, 1]} : vector<22x128xf32> to vector<16x128xf32>
    %42 = arith.subf %40, %14 : vector<16x128xf32>
    %43 = arith.subf %41, %15 : vector<16x128xf32>
    %44 = arith.mulf %42, %42 : vector<16x128xf32>
    %cst_26 = arith.constant 8.100000e-01 : f32
    %45 = vector.broadcast %cst_26 : f32 to vector<16x128xf32>
    %46 = arith.addf %45, %44 : vector<16x128xf32>
    %47 = math.rsqrt %46 : vector<16x128xf32>
    %48 = arith.mulf %42, %47 : vector<16x128xf32>
    %49 = arith.mulf %43, %43 : vector<16x128xf32>
    %cst_27 = arith.constant 8.100000e-01 : f32
    %50 = vector.broadcast %cst_27 : f32 to vector<16x128xf32>
    %51 = arith.addf %50, %49 : vector<16x128xf32>
    %52 = math.rsqrt %51 : vector<16x128xf32>
    %53 = arith.mulf %43, %52 : vector<16x128xf32>
    %54 = arith.subf %48, %53 : vector<16x128xf32>
    %55 = arith.mulf %54, %54 : vector<16x128xf32>
    %cst_28 = arith.constant 1.000000e-01 : f32
    %56 = vector.broadcast %cst_28 : f32 to vector<16x128xf32>
    %57 = arith.addf %56, %55 : vector<16x128xf32>
    %58 = tpu.reciprocal %57 {approx = true} : vector<16x128xf32> -> vector<16x128xf32>
    %59 = arith.mulf %55, %58 : vector<16x128xf32>
    %60 = arith.addf %39, %59 : vector<16x128xf32>
    %61 = vector.extract_strided_slice %17 {offsets = [2, 0], sizes = [16, 128], strides = [1, 1]} : vector<22x128xf32> to vector<16x128xf32>
    %62 = vector.extract_strided_slice %18 {offsets = [2, 0], sizes = [16, 128], strides = [1, 1]} : vector<22x128xf32> to vector<16x128xf32>
    %63 = arith.subf %61, %14 : vector<16x128xf32>
    %64 = arith.subf %62, %15 : vector<16x128xf32>
    %65 = arith.mulf %63, %63 : vector<16x128xf32>
    %cst_29 = arith.constant 8.100000e-01 : f32
    %66 = vector.broadcast %cst_29 : f32 to vector<16x128xf32>
    %67 = arith.addf %66, %65 : vector<16x128xf32>
    %68 = math.rsqrt %67 : vector<16x128xf32>
    %69 = arith.mulf %63, %68 : vector<16x128xf32>
    %70 = arith.mulf %64, %64 : vector<16x128xf32>
    %cst_30 = arith.constant 8.100000e-01 : f32
    %71 = vector.broadcast %cst_30 : f32 to vector<16x128xf32>
    %72 = arith.addf %71, %70 : vector<16x128xf32>
    %73 = math.rsqrt %72 : vector<16x128xf32>
    %74 = arith.mulf %64, %73 : vector<16x128xf32>
    %75 = arith.subf %69, %74 : vector<16x128xf32>
    %76 = arith.mulf %75, %75 : vector<16x128xf32>
    %cst_31 = arith.constant 1.000000e-01 : f32
    %77 = vector.broadcast %cst_31 : f32 to vector<16x128xf32>
    %78 = arith.addf %77, %76 : vector<16x128xf32>
    %79 = tpu.reciprocal %78 {approx = true} : vector<16x128xf32> -> vector<16x128xf32>
    %80 = arith.mulf %76, %79 : vector<16x128xf32>
    %81 = arith.addf %60, %80 : vector<16x128xf32>
    %82 = vector.extract_strided_slice %17 {offsets = [3, 0], sizes = [16, 128], strides = [1, 1]} : vector<22x128xf32> to vector<16x128xf32>
    %83 = vector.extract_strided_slice %18 {offsets = [3, 0], sizes = [16, 128], strides = [1, 1]} : vector<22x128xf32> to vector<16x128xf32>
    %84 = arith.subf %82, %14 : vector<16x128xf32>
    %85 = arith.subf %83, %15 : vector<16x128xf32>
    %86 = arith.mulf %84, %84 : vector<16x128xf32>
    %cst_32 = arith.constant 8.100000e-01 : f32
    %87 = vector.broadcast %cst_32 : f32 to vector<16x128xf32>
    %88 = arith.addf %87, %86 : vector<16x128xf32>
    %89 = math.rsqrt %88 : vector<16x128xf32>
    %90 = arith.mulf %84, %89 : vector<16x128xf32>
    %91 = arith.mulf %85, %85 : vector<16x128xf32>
    %cst_33 = arith.constant 8.100000e-01 : f32
    %92 = vector.broadcast %cst_33 : f32 to vector<16x128xf32>
    %93 = arith.addf %92, %91 : vector<16x128xf32>
    %94 = math.rsqrt %93 : vector<16x128xf32>
    %95 = arith.mulf %85, %94 : vector<16x128xf32>
    %96 = arith.subf %90, %95 : vector<16x128xf32>
    %97 = arith.mulf %96, %96 : vector<16x128xf32>
    %cst_34 = arith.constant 1.000000e-01 : f32
    %98 = vector.broadcast %cst_34 : f32 to vector<16x128xf32>
    %99 = arith.addf %98, %97 : vector<16x128xf32>
    %100 = tpu.reciprocal %99 {approx = true} : vector<16x128xf32> -> vector<16x128xf32>
    %101 = arith.mulf %97, %100 : vector<16x128xf32>
    %102 = arith.addf %81, %101 : vector<16x128xf32>
    %103 = vector.extract_strided_slice %17 {offsets = [4, 0], sizes = [16, 128], strides = [1, 1]} : vector<22x128xf32> to vector<16x128xf32>
    %104 = vector.extract_strided_slice %18 {offsets = [4, 0], sizes = [16, 128], strides = [1, 1]} : vector<22x128xf32> to vector<16x128xf32>
    %105 = arith.subf %103, %14 : vector<16x128xf32>
    %106 = arith.subf %104, %15 : vector<16x128xf32>
    %107 = arith.mulf %105, %105 : vector<16x128xf32>
    %cst_35 = arith.constant 8.100000e-01 : f32
    %108 = vector.broadcast %cst_35 : f32 to vector<16x128xf32>
    %109 = arith.addf %108, %107 : vector<16x128xf32>
    %110 = math.rsqrt %109 : vector<16x128xf32>
    %111 = arith.mulf %105, %110 : vector<16x128xf32>
    %112 = arith.mulf %106, %106 : vector<16x128xf32>
    %cst_36 = arith.constant 8.100000e-01 : f32
    %113 = vector.broadcast %cst_36 : f32 to vector<16x128xf32>
    %114 = arith.addf %113, %112 : vector<16x128xf32>
    %115 = math.rsqrt %114 : vector<16x128xf32>
    %116 = arith.mulf %106, %115 : vector<16x128xf32>
    %117 = arith.subf %111, %116 : vector<16x128xf32>
    %118 = arith.mulf %117, %117 : vector<16x128xf32>
    %cst_37 = arith.constant 1.000000e-01 : f32
    %119 = vector.broadcast %cst_37 : f32 to vector<16x128xf32>
    %120 = arith.addf %119, %118 : vector<16x128xf32>
    %121 = tpu.reciprocal %120 {approx = true} : vector<16x128xf32> -> vector<16x128xf32>
    %122 = arith.mulf %118, %121 : vector<16x128xf32>
    %123 = arith.addf %102, %122 : vector<16x128xf32>
    %124 = vector.extract_strided_slice %17 {offsets = [5, 0], sizes = [16, 128], strides = [1, 1]} : vector<22x128xf32> to vector<16x128xf32>
    %125 = vector.extract_strided_slice %18 {offsets = [5, 0], sizes = [16, 128], strides = [1, 1]} : vector<22x128xf32> to vector<16x128xf32>
    %126 = arith.subf %124, %14 : vector<16x128xf32>
    %127 = arith.subf %125, %15 : vector<16x128xf32>
    %128 = arith.mulf %126, %126 : vector<16x128xf32>
    %cst_38 = arith.constant 8.100000e-01 : f32
    %129 = vector.broadcast %cst_38 : f32 to vector<16x128xf32>
    %130 = arith.addf %129, %128 : vector<16x128xf32>
    %131 = math.rsqrt %130 : vector<16x128xf32>
    %132 = arith.mulf %126, %131 : vector<16x128xf32>
    %133 = arith.mulf %127, %127 : vector<16x128xf32>
    %cst_39 = arith.constant 8.100000e-01 : f32
    %134 = vector.broadcast %cst_39 : f32 to vector<16x128xf32>
    %135 = arith.addf %134, %133 : vector<16x128xf32>
    %136 = math.rsqrt %135 : vector<16x128xf32>
    %137 = arith.mulf %127, %136 : vector<16x128xf32>
    %138 = arith.subf %132, %137 : vector<16x128xf32>
    %139 = arith.mulf %138, %138 : vector<16x128xf32>
    %cst_40 = arith.constant 1.000000e-01 : f32
    %140 = vector.broadcast %cst_40 : f32 to vector<16x128xf32>
    %141 = arith.addf %140, %139 : vector<16x128xf32>
    %142 = tpu.reciprocal %141 {approx = true} : vector<16x128xf32> -> vector<16x128xf32>
    %143 = arith.mulf %139, %142 : vector<16x128xf32>
    %144 = arith.addf %123, %143 : vector<16x128xf32>
    %145 = vector.extract_strided_slice %17 {offsets = [6, 0], sizes = [16, 128], strides = [1, 1]} : vector<22x128xf32> to vector<16x128xf32>
    %146 = vector.extract_strided_slice %18 {offsets = [6, 0], sizes = [16, 128], strides = [1, 1]} : vector<22x128xf32> to vector<16x128xf32>
    %147 = arith.subf %145, %14 : vector<16x128xf32>
    %148 = arith.subf %146, %15 : vector<16x128xf32>
    %149 = arith.mulf %147, %147 : vector<16x128xf32>
    %cst_41 = arith.constant 8.100000e-01 : f32
    %150 = vector.broadcast %cst_41 : f32 to vector<16x128xf32>
    %151 = arith.addf %150, %149 : vector<16x128xf32>
    %152 = math.rsqrt %151 : vector<16x128xf32>
    %153 = arith.mulf %147, %152 : vector<16x128xf32>
    %154 = arith.mulf %148, %148 : vector<16x128xf32>
    %cst_42 = arith.constant 8.100000e-01 : f32
    %155 = vector.broadcast %cst_42 : f32 to vector<16x128xf32>
    %156 = arith.addf %155, %154 : vector<16x128xf32>
    %157 = math.rsqrt %156 : vector<16x128xf32>
    %158 = arith.mulf %148, %157 : vector<16x128xf32>
    %159 = arith.subf %153, %158 : vector<16x128xf32>
    %160 = arith.mulf %159, %159 : vector<16x128xf32>
    %cst_43 = arith.constant 1.000000e-01 : f32
    %161 = vector.broadcast %cst_43 : f32 to vector<16x128xf32>
    %162 = arith.addf %161, %160 : vector<16x128xf32>
    %163 = tpu.reciprocal %162 {approx = true} : vector<16x128xf32> -> vector<16x128xf32>
    %164 = arith.mulf %160, %163 : vector<16x128xf32>
    %165 = arith.addf %144, %164 : vector<16x128xf32>
    %c2_i32 = arith.constant 2 : i32
    %166 = tpu.dynamic_rotate %12 by %c2_i32 dim 1 : vector<22x128xf32>, i32 -> vector<22x128xf32>
    %c2_i32_44 = arith.constant 2 : i32
    %167 = tpu.dynamic_rotate %13 by %c2_i32_44 dim 1 : vector<22x128xf32>, i32 -> vector<22x128xf32>
    %168 = vector.extract_strided_slice %166 {offsets = [0, 0], sizes = [16, 128], strides = [1, 1]} : vector<22x128xf32> to vector<16x128xf32>
    %169 = vector.extract_strided_slice %167 {offsets = [0, 0], sizes = [16, 128], strides = [1, 1]} : vector<22x128xf32> to vector<16x128xf32>
    %170 = arith.subf %168, %14 : vector<16x128xf32>
    %171 = arith.subf %169, %15 : vector<16x128xf32>
    %172 = arith.mulf %170, %170 : vector<16x128xf32>
    %cst_45 = arith.constant 8.100000e-01 : f32
    %173 = vector.broadcast %cst_45 : f32 to vector<16x128xf32>
    %174 = arith.addf %173, %172 : vector<16x128xf32>
    %175 = math.rsqrt %174 : vector<16x128xf32>
    %176 = arith.mulf %170, %175 : vector<16x128xf32>
    %177 = arith.mulf %171, %171 : vector<16x128xf32>
    %cst_46 = arith.constant 8.100000e-01 : f32
    %178 = vector.broadcast %cst_46 : f32 to vector<16x128xf32>
    %179 = arith.addf %178, %177 : vector<16x128xf32>
    %180 = math.rsqrt %179 : vector<16x128xf32>
    %181 = arith.mulf %171, %180 : vector<16x128xf32>
    %182 = arith.subf %176, %181 : vector<16x128xf32>
    %183 = arith.mulf %182, %182 : vector<16x128xf32>
    %cst_47 = arith.constant 1.000000e-01 : f32
    %184 = vector.broadcast %cst_47 : f32 to vector<16x128xf32>
    %185 = arith.addf %184, %183 : vector<16x128xf32>
    %186 = tpu.reciprocal %185 {approx = true} : vector<16x128xf32> -> vector<16x128xf32>
    %187 = arith.mulf %183, %186 : vector<16x128xf32>
    %188 = arith.addf %165, %187 : vector<16x128xf32>
    %189 = vector.extract_strided_slice %166 {offsets = [1, 0], sizes = [16, 128], strides = [1, 1]} : vector<22x128xf32> to vector<16x128xf32>
    %190 = vector.extract_strided_slice %167 {offsets = [1, 0], sizes = [16, 128], strides = [1, 1]} : vector<22x128xf32> to vector<16x128xf32>
    %191 = arith.subf %189, %14 : vector<16x128xf32>
    %192 = arith.subf %190, %15 : vector<16x128xf32>
    %193 = arith.mulf %191, %191 : vector<16x128xf32>
    %cst_48 = arith.constant 8.100000e-01 : f32
    %194 = vector.broadcast %cst_48 : f32 to vector<16x128xf32>
    %195 = arith.addf %194, %193 : vector<16x128xf32>
    %196 = math.rsqrt %195 : vector<16x128xf32>
    %197 = arith.mulf %191, %196 : vector<16x128xf32>
    %198 = arith.mulf %192, %192 : vector<16x128xf32>
    %cst_49 = arith.constant 8.100000e-01 : f32
    %199 = vector.broadcast %cst_49 : f32 to vector<16x128xf32>
    %200 = arith.addf %199, %198 : vector<16x128xf32>
    %201 = math.rsqrt %200 : vector<16x128xf32>
    %202 = arith.mulf %192, %201 : vector<16x128xf32>
    %203 = arith.subf %197, %202 : vector<16x128xf32>
    %204 = arith.mulf %203, %203 : vector<16x128xf32>
    %cst_50 = arith.constant 1.000000e-01 : f32
    %205 = vector.broadcast %cst_50 : f32 to vector<16x128xf32>
    %206 = arith.addf %205, %204 : vector<16x128xf32>
    %207 = tpu.reciprocal %206 {approx = true} : vector<16x128xf32> -> vector<16x128xf32>
    %208 = arith.mulf %204, %207 : vector<16x128xf32>
    %209 = arith.addf %188, %208 : vector<16x128xf32>
    %210 = vector.extract_strided_slice %166 {offsets = [2, 0], sizes = [16, 128], strides = [1, 1]} : vector<22x128xf32> to vector<16x128xf32>
    %211 = vector.extract_strided_slice %167 {offsets = [2, 0], sizes = [16, 128], strides = [1, 1]} : vector<22x128xf32> to vector<16x128xf32>
    %212 = arith.subf %210, %14 : vector<16x128xf32>
    %213 = arith.subf %211, %15 : vector<16x128xf32>
    %214 = arith.mulf %212, %212 : vector<16x128xf32>
    %cst_51 = arith.constant 8.100000e-01 : f32
    %215 = vector.broadcast %cst_51 : f32 to vector<16x128xf32>
    %216 = arith.addf %215, %214 : vector<16x128xf32>
    %217 = math.rsqrt %216 : vector<16x128xf32>
    %218 = arith.mulf %212, %217 : vector<16x128xf32>
    %219 = arith.mulf %213, %213 : vector<16x128xf32>
    %cst_52 = arith.constant 8.100000e-01 : f32
    %220 = vector.broadcast %cst_52 : f32 to vector<16x128xf32>
    %221 = arith.addf %220, %219 : vector<16x128xf32>
    %222 = math.rsqrt %221 : vector<16x128xf32>
    %223 = arith.mulf %213, %222 : vector<16x128xf32>
    %224 = arith.subf %218, %223 : vector<16x128xf32>
    %225 = arith.mulf %224, %224 : vector<16x128xf32>
    %cst_53 = arith.constant 1.000000e-01 : f32
    %226 = vector.broadcast %cst_53 : f32 to vector<16x128xf32>
    %227 = arith.addf %226, %225 : vector<16x128xf32>
    %228 = tpu.reciprocal %227 {approx = true} : vector<16x128xf32> -> vector<16x128xf32>
    %229 = arith.mulf %225, %228 : vector<16x128xf32>
    %230 = arith.addf %209, %229 : vector<16x128xf32>
    %231 = vector.extract_strided_slice %166 {offsets = [3, 0], sizes = [16, 128], strides = [1, 1]} : vector<22x128xf32> to vector<16x128xf32>
    %232 = vector.extract_strided_slice %167 {offsets = [3, 0], sizes = [16, 128], strides = [1, 1]} : vector<22x128xf32> to vector<16x128xf32>
    %233 = arith.subf %231, %14 : vector<16x128xf32>
    %234 = arith.subf %232, %15 : vector<16x128xf32>
    %235 = arith.mulf %233, %233 : vector<16x128xf32>
    %cst_54 = arith.constant 8.100000e-01 : f32
    %236 = vector.broadcast %cst_54 : f32 to vector<16x128xf32>
    %237 = arith.addf %236, %235 : vector<16x128xf32>
    %238 = math.rsqrt %237 : vector<16x128xf32>
    %239 = arith.mulf %233, %238 : vector<16x128xf32>
    %240 = arith.mulf %234, %234 : vector<16x128xf32>
    %cst_55 = arith.constant 8.100000e-01 : f32
    %241 = vector.broadcast %cst_55 : f32 to vector<16x128xf32>
    %242 = arith.addf %241, %240 : vector<16x128xf32>
    %243 = math.rsqrt %242 : vector<16x128xf32>
    %244 = arith.mulf %234, %243 : vector<16x128xf32>
    %245 = arith.subf %239, %244 : vector<16x128xf32>
    %246 = arith.mulf %245, %245 : vector<16x128xf32>
    %cst_56 = arith.constant 1.000000e-01 : f32
    %247 = vector.broadcast %cst_56 : f32 to vector<16x128xf32>
    %248 = arith.addf %247, %246 : vector<16x128xf32>
    %249 = tpu.reciprocal %248 {approx = true} : vector<16x128xf32> -> vector<16x128xf32>
    %250 = arith.mulf %246, %249 : vector<16x128xf32>
    %251 = arith.addf %230, %250 : vector<16x128xf32>
    %252 = vector.extract_strided_slice %166 {offsets = [4, 0], sizes = [16, 128], strides = [1, 1]} : vector<22x128xf32> to vector<16x128xf32>
    %253 = vector.extract_strided_slice %167 {offsets = [4, 0], sizes = [16, 128], strides = [1, 1]} : vector<22x128xf32> to vector<16x128xf32>
    %254 = arith.subf %252, %14 : vector<16x128xf32>
    %255 = arith.subf %253, %15 : vector<16x128xf32>
    %256 = arith.mulf %254, %254 : vector<16x128xf32>
    %cst_57 = arith.constant 8.100000e-01 : f32
    %257 = vector.broadcast %cst_57 : f32 to vector<16x128xf32>
    %258 = arith.addf %257, %256 : vector<16x128xf32>
    %259 = math.rsqrt %258 : vector<16x128xf32>
    %260 = arith.mulf %254, %259 : vector<16x128xf32>
    %261 = arith.mulf %255, %255 : vector<16x128xf32>
    %cst_58 = arith.constant 8.100000e-01 : f32
    %262 = vector.broadcast %cst_58 : f32 to vector<16x128xf32>
    %263 = arith.addf %262, %261 : vector<16x128xf32>
    %264 = math.rsqrt %263 : vector<16x128xf32>
    %265 = arith.mulf %255, %264 : vector<16x128xf32>
    %266 = arith.subf %260, %265 : vector<16x128xf32>
    %267 = arith.mulf %266, %266 : vector<16x128xf32>
    %cst_59 = arith.constant 1.000000e-01 : f32
    %268 = vector.broadcast %cst_59 : f32 to vector<16x128xf32>
    %269 = arith.addf %268, %267 : vector<16x128xf32>
    %270 = tpu.reciprocal %269 {approx = true} : vector<16x128xf32> -> vector<16x128xf32>
    %271 = arith.mulf %267, %270 : vector<16x128xf32>
    %272 = arith.addf %251, %271 : vector<16x128xf32>
    %273 = vector.extract_strided_slice %166 {offsets = [5, 0], sizes = [16, 128], strides = [1, 1]} : vector<22x128xf32> to vector<16x128xf32>
    %274 = vector.extract_strided_slice %167 {offsets = [5, 0], sizes = [16, 128], strides = [1, 1]} : vector<22x128xf32> to vector<16x128xf32>
    %275 = arith.subf %273, %14 : vector<16x128xf32>
    %276 = arith.subf %274, %15 : vector<16x128xf32>
    %277 = arith.mulf %275, %275 : vector<16x128xf32>
    %cst_60 = arith.constant 8.100000e-01 : f32
    %278 = vector.broadcast %cst_60 : f32 to vector<16x128xf32>
    %279 = arith.addf %278, %277 : vector<16x128xf32>
    %280 = math.rsqrt %279 : vector<16x128xf32>
    %281 = arith.mulf %275, %280 : vector<16x128xf32>
    %282 = arith.mulf %276, %276 : vector<16x128xf32>
    %cst_61 = arith.constant 8.100000e-01 : f32
    %283 = vector.broadcast %cst_61 : f32 to vector<16x128xf32>
    %284 = arith.addf %283, %282 : vector<16x128xf32>
    %285 = math.rsqrt %284 : vector<16x128xf32>
    %286 = arith.mulf %276, %285 : vector<16x128xf32>
    %287 = arith.subf %281, %286 : vector<16x128xf32>
    %288 = arith.mulf %287, %287 : vector<16x128xf32>
    %cst_62 = arith.constant 1.000000e-01 : f32
    %289 = vector.broadcast %cst_62 : f32 to vector<16x128xf32>
    %290 = arith.addf %289, %288 : vector<16x128xf32>
    %291 = tpu.reciprocal %290 {approx = true} : vector<16x128xf32> -> vector<16x128xf32>
    %292 = arith.mulf %288, %291 : vector<16x128xf32>
    %293 = arith.addf %272, %292 : vector<16x128xf32>
    %294 = vector.extract_strided_slice %166 {offsets = [6, 0], sizes = [16, 128], strides = [1, 1]} : vector<22x128xf32> to vector<16x128xf32>
    %295 = vector.extract_strided_slice %167 {offsets = [6, 0], sizes = [16, 128], strides = [1, 1]} : vector<22x128xf32> to vector<16x128xf32>
    %296 = arith.subf %294, %14 : vector<16x128xf32>
    %297 = arith.subf %295, %15 : vector<16x128xf32>
    %298 = arith.mulf %296, %296 : vector<16x128xf32>
    %cst_63 = arith.constant 8.100000e-01 : f32
    %299 = vector.broadcast %cst_63 : f32 to vector<16x128xf32>
    %300 = arith.addf %299, %298 : vector<16x128xf32>
    %301 = math.rsqrt %300 : vector<16x128xf32>
    %302 = arith.mulf %296, %301 : vector<16x128xf32>
    %303 = arith.mulf %297, %297 : vector<16x128xf32>
    %cst_64 = arith.constant 8.100000e-01 : f32
    %304 = vector.broadcast %cst_64 : f32 to vector<16x128xf32>
    %305 = arith.addf %304, %303 : vector<16x128xf32>
    %306 = math.rsqrt %305 : vector<16x128xf32>
    %307 = arith.mulf %297, %306 : vector<16x128xf32>
    %308 = arith.subf %302, %307 : vector<16x128xf32>
    %309 = arith.mulf %308, %308 : vector<16x128xf32>
    %cst_65 = arith.constant 1.000000e-01 : f32
    %310 = vector.broadcast %cst_65 : f32 to vector<16x128xf32>
    %311 = arith.addf %310, %309 : vector<16x128xf32>
    %312 = tpu.reciprocal %311 {approx = true} : vector<16x128xf32> -> vector<16x128xf32>
    %313 = arith.mulf %309, %312 : vector<16x128xf32>
    %314 = arith.addf %293, %313 : vector<16x128xf32>
    %c1_i32 = arith.constant 1 : i32
    %315 = tpu.dynamic_rotate %12 by %c1_i32 dim 1 : vector<22x128xf32>, i32 -> vector<22x128xf32>
    %c1_i32_66 = arith.constant 1 : i32
    %316 = tpu.dynamic_rotate %13 by %c1_i32_66 dim 1 : vector<22x128xf32>, i32 -> vector<22x128xf32>
    %317 = vector.extract_strided_slice %315 {offsets = [0, 0], sizes = [16, 128], strides = [1, 1]} : vector<22x128xf32> to vector<16x128xf32>
    %318 = vector.extract_strided_slice %316 {offsets = [0, 0], sizes = [16, 128], strides = [1, 1]} : vector<22x128xf32> to vector<16x128xf32>
    %319 = arith.subf %317, %14 : vector<16x128xf32>
    %320 = arith.subf %318, %15 : vector<16x128xf32>
    %321 = arith.mulf %319, %319 : vector<16x128xf32>
    %cst_67 = arith.constant 8.100000e-01 : f32
    %322 = vector.broadcast %cst_67 : f32 to vector<16x128xf32>
    %323 = arith.addf %322, %321 : vector<16x128xf32>
    %324 = math.rsqrt %323 : vector<16x128xf32>
    %325 = arith.mulf %319, %324 : vector<16x128xf32>
    %326 = arith.mulf %320, %320 : vector<16x128xf32>
    %cst_68 = arith.constant 8.100000e-01 : f32
    %327 = vector.broadcast %cst_68 : f32 to vector<16x128xf32>
    %328 = arith.addf %327, %326 : vector<16x128xf32>
    %329 = math.rsqrt %328 : vector<16x128xf32>
    %330 = arith.mulf %320, %329 : vector<16x128xf32>
    %331 = arith.subf %325, %330 : vector<16x128xf32>
    %332 = arith.mulf %331, %331 : vector<16x128xf32>
    %cst_69 = arith.constant 1.000000e-01 : f32
    %333 = vector.broadcast %cst_69 : f32 to vector<16x128xf32>
    %334 = arith.addf %333, %332 : vector<16x128xf32>
    %335 = tpu.reciprocal %334 {approx = true} : vector<16x128xf32> -> vector<16x128xf32>
    %336 = arith.mulf %332, %335 : vector<16x128xf32>
    %337 = arith.addf %314, %336 : vector<16x128xf32>
    %338 = vector.extract_strided_slice %315 {offsets = [1, 0], sizes = [16, 128], strides = [1, 1]} : vector<22x128xf32> to vector<16x128xf32>
    %339 = vector.extract_strided_slice %316 {offsets = [1, 0], sizes = [16, 128], strides = [1, 1]} : vector<22x128xf32> to vector<16x128xf32>
    %340 = arith.subf %338, %14 : vector<16x128xf32>
    %341 = arith.subf %339, %15 : vector<16x128xf32>
    %342 = arith.mulf %340, %340 : vector<16x128xf32>
    %cst_70 = arith.constant 8.100000e-01 : f32
    %343 = vector.broadcast %cst_70 : f32 to vector<16x128xf32>
    %344 = arith.addf %343, %342 : vector<16x128xf32>
    %345 = math.rsqrt %344 : vector<16x128xf32>
    %346 = arith.mulf %340, %345 : vector<16x128xf32>
    %347 = arith.mulf %341, %341 : vector<16x128xf32>
    %cst_71 = arith.constant 8.100000e-01 : f32
    %348 = vector.broadcast %cst_71 : f32 to vector<16x128xf32>
    %349 = arith.addf %348, %347 : vector<16x128xf32>
    %350 = math.rsqrt %349 : vector<16x128xf32>
    %351 = arith.mulf %341, %350 : vector<16x128xf32>
    %352 = arith.subf %346, %351 : vector<16x128xf32>
    %353 = arith.mulf %352, %352 : vector<16x128xf32>
    %cst_72 = arith.constant 1.000000e-01 : f32
    %354 = vector.broadcast %cst_72 : f32 to vector<16x128xf32>
    %355 = arith.addf %354, %353 : vector<16x128xf32>
    %356 = tpu.reciprocal %355 {approx = true} : vector<16x128xf32> -> vector<16x128xf32>
    %357 = arith.mulf %353, %356 : vector<16x128xf32>
    %358 = arith.addf %337, %357 : vector<16x128xf32>
    %359 = vector.extract_strided_slice %315 {offsets = [2, 0], sizes = [16, 128], strides = [1, 1]} : vector<22x128xf32> to vector<16x128xf32>
    %360 = vector.extract_strided_slice %316 {offsets = [2, 0], sizes = [16, 128], strides = [1, 1]} : vector<22x128xf32> to vector<16x128xf32>
    %361 = arith.subf %359, %14 : vector<16x128xf32>
    %362 = arith.subf %360, %15 : vector<16x128xf32>
    %363 = arith.mulf %361, %361 : vector<16x128xf32>
    %cst_73 = arith.constant 8.100000e-01 : f32
    %364 = vector.broadcast %cst_73 : f32 to vector<16x128xf32>
    %365 = arith.addf %364, %363 : vector<16x128xf32>
    %366 = math.rsqrt %365 : vector<16x128xf32>
    %367 = arith.mulf %361, %366 : vector<16x128xf32>
    %368 = arith.mulf %362, %362 : vector<16x128xf32>
    %cst_74 = arith.constant 8.100000e-01 : f32
    %369 = vector.broadcast %cst_74 : f32 to vector<16x128xf32>
    %370 = arith.addf %369, %368 : vector<16x128xf32>
    %371 = math.rsqrt %370 : vector<16x128xf32>
    %372 = arith.mulf %362, %371 : vector<16x128xf32>
    %373 = arith.subf %367, %372 : vector<16x128xf32>
    %374 = arith.mulf %373, %373 : vector<16x128xf32>
    %cst_75 = arith.constant 1.000000e-01 : f32
    %375 = vector.broadcast %cst_75 : f32 to vector<16x128xf32>
    %376 = arith.addf %375, %374 : vector<16x128xf32>
    %377 = tpu.reciprocal %376 {approx = true} : vector<16x128xf32> -> vector<16x128xf32>
    %378 = arith.mulf %374, %377 : vector<16x128xf32>
    %379 = arith.addf %358, %378 : vector<16x128xf32>
    %380 = vector.extract_strided_slice %315 {offsets = [3, 0], sizes = [16, 128], strides = [1, 1]} : vector<22x128xf32> to vector<16x128xf32>
    %381 = vector.extract_strided_slice %316 {offsets = [3, 0], sizes = [16, 128], strides = [1, 1]} : vector<22x128xf32> to vector<16x128xf32>
    %382 = arith.subf %380, %14 : vector<16x128xf32>
    %383 = arith.subf %381, %15 : vector<16x128xf32>
    %384 = arith.mulf %382, %382 : vector<16x128xf32>
    %cst_76 = arith.constant 8.100000e-01 : f32
    %385 = vector.broadcast %cst_76 : f32 to vector<16x128xf32>
    %386 = arith.addf %385, %384 : vector<16x128xf32>
    %387 = math.rsqrt %386 : vector<16x128xf32>
    %388 = arith.mulf %382, %387 : vector<16x128xf32>
    %389 = arith.mulf %383, %383 : vector<16x128xf32>
    %cst_77 = arith.constant 8.100000e-01 : f32
    %390 = vector.broadcast %cst_77 : f32 to vector<16x128xf32>
    %391 = arith.addf %390, %389 : vector<16x128xf32>
    %392 = math.rsqrt %391 : vector<16x128xf32>
    %393 = arith.mulf %383, %392 : vector<16x128xf32>
    %394 = arith.subf %388, %393 : vector<16x128xf32>
    %395 = arith.mulf %394, %394 : vector<16x128xf32>
    %cst_78 = arith.constant 1.000000e-01 : f32
    %396 = vector.broadcast %cst_78 : f32 to vector<16x128xf32>
    %397 = arith.addf %396, %395 : vector<16x128xf32>
    %398 = tpu.reciprocal %397 {approx = true} : vector<16x128xf32> -> vector<16x128xf32>
    %399 = arith.mulf %395, %398 : vector<16x128xf32>
    %400 = arith.addf %379, %399 : vector<16x128xf32>
    %401 = vector.extract_strided_slice %315 {offsets = [4, 0], sizes = [16, 128], strides = [1, 1]} : vector<22x128xf32> to vector<16x128xf32>
    %402 = vector.extract_strided_slice %316 {offsets = [4, 0], sizes = [16, 128], strides = [1, 1]} : vector<22x128xf32> to vector<16x128xf32>
    %403 = arith.subf %401, %14 : vector<16x128xf32>
    %404 = arith.subf %402, %15 : vector<16x128xf32>
    %405 = arith.mulf %403, %403 : vector<16x128xf32>
    %cst_79 = arith.constant 8.100000e-01 : f32
    %406 = vector.broadcast %cst_79 : f32 to vector<16x128xf32>
    %407 = arith.addf %406, %405 : vector<16x128xf32>
    %408 = math.rsqrt %407 : vector<16x128xf32>
    %409 = arith.mulf %403, %408 : vector<16x128xf32>
    %410 = arith.mulf %404, %404 : vector<16x128xf32>
    %cst_80 = arith.constant 8.100000e-01 : f32
    %411 = vector.broadcast %cst_80 : f32 to vector<16x128xf32>
    %412 = arith.addf %411, %410 : vector<16x128xf32>
    %413 = math.rsqrt %412 : vector<16x128xf32>
    %414 = arith.mulf %404, %413 : vector<16x128xf32>
    %415 = arith.subf %409, %414 : vector<16x128xf32>
    %416 = arith.mulf %415, %415 : vector<16x128xf32>
    %cst_81 = arith.constant 1.000000e-01 : f32
    %417 = vector.broadcast %cst_81 : f32 to vector<16x128xf32>
    %418 = arith.addf %417, %416 : vector<16x128xf32>
    %419 = tpu.reciprocal %418 {approx = true} : vector<16x128xf32> -> vector<16x128xf32>
    %420 = arith.mulf %416, %419 : vector<16x128xf32>
    %421 = arith.addf %400, %420 : vector<16x128xf32>
    %422 = vector.extract_strided_slice %315 {offsets = [5, 0], sizes = [16, 128], strides = [1, 1]} : vector<22x128xf32> to vector<16x128xf32>
    %423 = vector.extract_strided_slice %316 {offsets = [5, 0], sizes = [16, 128], strides = [1, 1]} : vector<22x128xf32> to vector<16x128xf32>
    %424 = arith.subf %422, %14 : vector<16x128xf32>
    %425 = arith.subf %423, %15 : vector<16x128xf32>
    %426 = arith.mulf %424, %424 : vector<16x128xf32>
    %cst_82 = arith.constant 8.100000e-01 : f32
    %427 = vector.broadcast %cst_82 : f32 to vector<16x128xf32>
    %428 = arith.addf %427, %426 : vector<16x128xf32>
    %429 = math.rsqrt %428 : vector<16x128xf32>
    %430 = arith.mulf %424, %429 : vector<16x128xf32>
    %431 = arith.mulf %425, %425 : vector<16x128xf32>
    %cst_83 = arith.constant 8.100000e-01 : f32
    %432 = vector.broadcast %cst_83 : f32 to vector<16x128xf32>
    %433 = arith.addf %432, %431 : vector<16x128xf32>
    %434 = math.rsqrt %433 : vector<16x128xf32>
    %435 = arith.mulf %425, %434 : vector<16x128xf32>
    %436 = arith.subf %430, %435 : vector<16x128xf32>
    %437 = arith.mulf %436, %436 : vector<16x128xf32>
    %cst_84 = arith.constant 1.000000e-01 : f32
    %438 = vector.broadcast %cst_84 : f32 to vector<16x128xf32>
    %439 = arith.addf %438, %437 : vector<16x128xf32>
    %440 = tpu.reciprocal %439 {approx = true} : vector<16x128xf32> -> vector<16x128xf32>
    %441 = arith.mulf %437, %440 : vector<16x128xf32>
    %442 = arith.addf %421, %441 : vector<16x128xf32>
    %443 = vector.extract_strided_slice %315 {offsets = [6, 0], sizes = [16, 128], strides = [1, 1]} : vector<22x128xf32> to vector<16x128xf32>
    %444 = vector.extract_strided_slice %316 {offsets = [6, 0], sizes = [16, 128], strides = [1, 1]} : vector<22x128xf32> to vector<16x128xf32>
    %445 = arith.subf %443, %14 : vector<16x128xf32>
    %446 = arith.subf %444, %15 : vector<16x128xf32>
    %447 = arith.mulf %445, %445 : vector<16x128xf32>
    %cst_85 = arith.constant 8.100000e-01 : f32
    %448 = vector.broadcast %cst_85 : f32 to vector<16x128xf32>
    %449 = arith.addf %448, %447 : vector<16x128xf32>
    %450 = math.rsqrt %449 : vector<16x128xf32>
    %451 = arith.mulf %445, %450 : vector<16x128xf32>
    %452 = arith.mulf %446, %446 : vector<16x128xf32>
    %cst_86 = arith.constant 8.100000e-01 : f32
    %453 = vector.broadcast %cst_86 : f32 to vector<16x128xf32>
    %454 = arith.addf %453, %452 : vector<16x128xf32>
    %455 = math.rsqrt %454 : vector<16x128xf32>
    %456 = arith.mulf %446, %455 : vector<16x128xf32>
    %457 = arith.subf %451, %456 : vector<16x128xf32>
    %458 = arith.mulf %457, %457 : vector<16x128xf32>
    %cst_87 = arith.constant 1.000000e-01 : f32
    %459 = vector.broadcast %cst_87 : f32 to vector<16x128xf32>
    %460 = arith.addf %459, %458 : vector<16x128xf32>
    %461 = tpu.reciprocal %460 {approx = true} : vector<16x128xf32> -> vector<16x128xf32>
    %462 = arith.mulf %458, %461 : vector<16x128xf32>
    %463 = arith.addf %442, %462 : vector<16x128xf32>
    %464 = vector.extract_strided_slice %12 {offsets = [0, 0], sizes = [16, 128], strides = [1, 1]} : vector<22x128xf32> to vector<16x128xf32>
    %465 = vector.extract_strided_slice %13 {offsets = [0, 0], sizes = [16, 128], strides = [1, 1]} : vector<22x128xf32> to vector<16x128xf32>
    %466 = arith.subf %464, %14 : vector<16x128xf32>
    %467 = arith.subf %465, %15 : vector<16x128xf32>
    %468 = arith.mulf %466, %466 : vector<16x128xf32>
    %cst_88 = arith.constant 8.100000e-01 : f32
    %469 = vector.broadcast %cst_88 : f32 to vector<16x128xf32>
    %470 = arith.addf %469, %468 : vector<16x128xf32>
    %471 = math.rsqrt %470 : vector<16x128xf32>
    %472 = arith.mulf %466, %471 : vector<16x128xf32>
    %473 = arith.mulf %467, %467 : vector<16x128xf32>
    %cst_89 = arith.constant 8.100000e-01 : f32
    %474 = vector.broadcast %cst_89 : f32 to vector<16x128xf32>
    %475 = arith.addf %474, %473 : vector<16x128xf32>
    %476 = math.rsqrt %475 : vector<16x128xf32>
    %477 = arith.mulf %467, %476 : vector<16x128xf32>
    %478 = arith.subf %472, %477 : vector<16x128xf32>
    %479 = arith.mulf %478, %478 : vector<16x128xf32>
    %cst_90 = arith.constant 1.000000e-01 : f32
    %480 = vector.broadcast %cst_90 : f32 to vector<16x128xf32>
    %481 = arith.addf %480, %479 : vector<16x128xf32>
    %482 = tpu.reciprocal %481 {approx = true} : vector<16x128xf32> -> vector<16x128xf32>
    %483 = arith.mulf %479, %482 : vector<16x128xf32>
    %484 = arith.addf %463, %483 : vector<16x128xf32>
    %485 = vector.extract_strided_slice %12 {offsets = [1, 0], sizes = [16, 128], strides = [1, 1]} : vector<22x128xf32> to vector<16x128xf32>
    %486 = vector.extract_strided_slice %13 {offsets = [1, 0], sizes = [16, 128], strides = [1, 1]} : vector<22x128xf32> to vector<16x128xf32>
    %487 = arith.subf %485, %14 : vector<16x128xf32>
    %488 = arith.subf %486, %15 : vector<16x128xf32>
    %489 = arith.mulf %487, %487 : vector<16x128xf32>
    %cst_91 = arith.constant 8.100000e-01 : f32
    %490 = vector.broadcast %cst_91 : f32 to vector<16x128xf32>
    %491 = arith.addf %490, %489 : vector<16x128xf32>
    %492 = math.rsqrt %491 : vector<16x128xf32>
    %493 = arith.mulf %487, %492 : vector<16x128xf32>
    %494 = arith.mulf %488, %488 : vector<16x128xf32>
    %cst_92 = arith.constant 8.100000e-01 : f32
    %495 = vector.broadcast %cst_92 : f32 to vector<16x128xf32>
    %496 = arith.addf %495, %494 : vector<16x128xf32>
    %497 = math.rsqrt %496 : vector<16x128xf32>
    %498 = arith.mulf %488, %497 : vector<16x128xf32>
    %499 = arith.subf %493, %498 : vector<16x128xf32>
    %500 = arith.mulf %499, %499 : vector<16x128xf32>
    %cst_93 = arith.constant 1.000000e-01 : f32
    %501 = vector.broadcast %cst_93 : f32 to vector<16x128xf32>
    %502 = arith.addf %501, %500 : vector<16x128xf32>
    %503 = tpu.reciprocal %502 {approx = true} : vector<16x128xf32> -> vector<16x128xf32>
    %504 = arith.mulf %500, %503 : vector<16x128xf32>
    %505 = arith.addf %484, %504 : vector<16x128xf32>
    %506 = vector.extract_strided_slice %12 {offsets = [2, 0], sizes = [16, 128], strides = [1, 1]} : vector<22x128xf32> to vector<16x128xf32>
    %507 = vector.extract_strided_slice %13 {offsets = [2, 0], sizes = [16, 128], strides = [1, 1]} : vector<22x128xf32> to vector<16x128xf32>
    %508 = arith.subf %506, %14 : vector<16x128xf32>
    %509 = arith.subf %507, %15 : vector<16x128xf32>
    %510 = arith.mulf %508, %508 : vector<16x128xf32>
    %cst_94 = arith.constant 8.100000e-01 : f32
    %511 = vector.broadcast %cst_94 : f32 to vector<16x128xf32>
    %512 = arith.addf %511, %510 : vector<16x128xf32>
    %513 = math.rsqrt %512 : vector<16x128xf32>
    %514 = arith.mulf %508, %513 : vector<16x128xf32>
    %515 = arith.mulf %509, %509 : vector<16x128xf32>
    %cst_95 = arith.constant 8.100000e-01 : f32
    %516 = vector.broadcast %cst_95 : f32 to vector<16x128xf32>
    %517 = arith.addf %516, %515 : vector<16x128xf32>
    %518 = math.rsqrt %517 : vector<16x128xf32>
    %519 = arith.mulf %509, %518 : vector<16x128xf32>
    %520 = arith.subf %514, %519 : vector<16x128xf32>
    %521 = arith.mulf %520, %520 : vector<16x128xf32>
    %cst_96 = arith.constant 1.000000e-01 : f32
    %522 = vector.broadcast %cst_96 : f32 to vector<16x128xf32>
    %523 = arith.addf %522, %521 : vector<16x128xf32>
    %524 = tpu.reciprocal %523 {approx = true} : vector<16x128xf32> -> vector<16x128xf32>
    %525 = arith.mulf %521, %524 : vector<16x128xf32>
    %526 = arith.addf %505, %525 : vector<16x128xf32>
    %527 = vector.extract_strided_slice %12 {offsets = [4, 0], sizes = [16, 128], strides = [1, 1]} : vector<22x128xf32> to vector<16x128xf32>
    %528 = vector.extract_strided_slice %13 {offsets = [4, 0], sizes = [16, 128], strides = [1, 1]} : vector<22x128xf32> to vector<16x128xf32>
    %529 = arith.subf %527, %14 : vector<16x128xf32>
    %530 = arith.subf %528, %15 : vector<16x128xf32>
    %531 = arith.mulf %529, %529 : vector<16x128xf32>
    %cst_97 = arith.constant 8.100000e-01 : f32
    %532 = vector.broadcast %cst_97 : f32 to vector<16x128xf32>
    %533 = arith.addf %532, %531 : vector<16x128xf32>
    %534 = math.rsqrt %533 : vector<16x128xf32>
    %535 = arith.mulf %529, %534 : vector<16x128xf32>
    %536 = arith.mulf %530, %530 : vector<16x128xf32>
    %cst_98 = arith.constant 8.100000e-01 : f32
    %537 = vector.broadcast %cst_98 : f32 to vector<16x128xf32>
    %538 = arith.addf %537, %536 : vector<16x128xf32>
    %539 = math.rsqrt %538 : vector<16x128xf32>
    %540 = arith.mulf %530, %539 : vector<16x128xf32>
    %541 = arith.subf %535, %540 : vector<16x128xf32>
    %542 = arith.mulf %541, %541 : vector<16x128xf32>
    %cst_99 = arith.constant 1.000000e-01 : f32
    %543 = vector.broadcast %cst_99 : f32 to vector<16x128xf32>
    %544 = arith.addf %543, %542 : vector<16x128xf32>
    %545 = tpu.reciprocal %544 {approx = true} : vector<16x128xf32> -> vector<16x128xf32>
    %546 = arith.mulf %542, %545 : vector<16x128xf32>
    %547 = arith.addf %526, %546 : vector<16x128xf32>
    %548 = vector.extract_strided_slice %12 {offsets = [5, 0], sizes = [16, 128], strides = [1, 1]} : vector<22x128xf32> to vector<16x128xf32>
    %549 = vector.extract_strided_slice %13 {offsets = [5, 0], sizes = [16, 128], strides = [1, 1]} : vector<22x128xf32> to vector<16x128xf32>
    %550 = arith.subf %548, %14 : vector<16x128xf32>
    %551 = arith.subf %549, %15 : vector<16x128xf32>
    %552 = arith.mulf %550, %550 : vector<16x128xf32>
    %cst_100 = arith.constant 8.100000e-01 : f32
    %553 = vector.broadcast %cst_100 : f32 to vector<16x128xf32>
    %554 = arith.addf %553, %552 : vector<16x128xf32>
    %555 = math.rsqrt %554 : vector<16x128xf32>
    %556 = arith.mulf %550, %555 : vector<16x128xf32>
    %557 = arith.mulf %551, %551 : vector<16x128xf32>
    %cst_101 = arith.constant 8.100000e-01 : f32
    %558 = vector.broadcast %cst_101 : f32 to vector<16x128xf32>
    %559 = arith.addf %558, %557 : vector<16x128xf32>
    %560 = math.rsqrt %559 : vector<16x128xf32>
    %561 = arith.mulf %551, %560 : vector<16x128xf32>
    %562 = arith.subf %556, %561 : vector<16x128xf32>
    %563 = arith.mulf %562, %562 : vector<16x128xf32>
    %cst_102 = arith.constant 1.000000e-01 : f32
    %564 = vector.broadcast %cst_102 : f32 to vector<16x128xf32>
    %565 = arith.addf %564, %563 : vector<16x128xf32>
    %566 = tpu.reciprocal %565 {approx = true} : vector<16x128xf32> -> vector<16x128xf32>
    %567 = arith.mulf %563, %566 : vector<16x128xf32>
    %568 = arith.addf %547, %567 : vector<16x128xf32>
    %569 = vector.extract_strided_slice %12 {offsets = [6, 0], sizes = [16, 128], strides = [1, 1]} : vector<22x128xf32> to vector<16x128xf32>
    %570 = vector.extract_strided_slice %13 {offsets = [6, 0], sizes = [16, 128], strides = [1, 1]} : vector<22x128xf32> to vector<16x128xf32>
    %571 = arith.subf %569, %14 : vector<16x128xf32>
    %572 = arith.subf %570, %15 : vector<16x128xf32>
    %573 = arith.mulf %571, %571 : vector<16x128xf32>
    %cst_103 = arith.constant 8.100000e-01 : f32
    %574 = vector.broadcast %cst_103 : f32 to vector<16x128xf32>
    %575 = arith.addf %574, %573 : vector<16x128xf32>
    %576 = math.rsqrt %575 : vector<16x128xf32>
    %577 = arith.mulf %571, %576 : vector<16x128xf32>
    %578 = arith.mulf %572, %572 : vector<16x128xf32>
    %cst_104 = arith.constant 8.100000e-01 : f32
    %579 = vector.broadcast %cst_104 : f32 to vector<16x128xf32>
    %580 = arith.addf %579, %578 : vector<16x128xf32>
    %581 = math.rsqrt %580 : vector<16x128xf32>
    %582 = arith.mulf %572, %581 : vector<16x128xf32>
    %583 = arith.subf %577, %582 : vector<16x128xf32>
    %584 = arith.mulf %583, %583 : vector<16x128xf32>
    %cst_105 = arith.constant 1.000000e-01 : f32
    %585 = vector.broadcast %cst_105 : f32 to vector<16x128xf32>
    %586 = arith.addf %585, %584 : vector<16x128xf32>
    %587 = tpu.reciprocal %586 {approx = true} : vector<16x128xf32> -> vector<16x128xf32>
    %588 = arith.mulf %584, %587 : vector<16x128xf32>
    %589 = arith.addf %568, %588 : vector<16x128xf32>
    %c127_i32 = arith.constant 127 : i32
    %590 = tpu.dynamic_rotate %12 by %c127_i32 dim 1 : vector<22x128xf32>, i32 -> vector<22x128xf32>
    %c127_i32_106 = arith.constant 127 : i32
    %591 = tpu.dynamic_rotate %13 by %c127_i32_106 dim 1 : vector<22x128xf32>, i32 -> vector<22x128xf32>
    %592 = vector.extract_strided_slice %590 {offsets = [0, 0], sizes = [16, 128], strides = [1, 1]} : vector<22x128xf32> to vector<16x128xf32>
    %593 = vector.extract_strided_slice %591 {offsets = [0, 0], sizes = [16, 128], strides = [1, 1]} : vector<22x128xf32> to vector<16x128xf32>
    %594 = arith.subf %592, %14 : vector<16x128xf32>
    %595 = arith.subf %593, %15 : vector<16x128xf32>
    %596 = arith.mulf %594, %594 : vector<16x128xf32>
    %cst_107 = arith.constant 8.100000e-01 : f32
    %597 = vector.broadcast %cst_107 : f32 to vector<16x128xf32>
    %598 = arith.addf %597, %596 : vector<16x128xf32>
    %599 = math.rsqrt %598 : vector<16x128xf32>
    %600 = arith.mulf %594, %599 : vector<16x128xf32>
    %601 = arith.mulf %595, %595 : vector<16x128xf32>
    %cst_108 = arith.constant 8.100000e-01 : f32
    %602 = vector.broadcast %cst_108 : f32 to vector<16x128xf32>
    %603 = arith.addf %602, %601 : vector<16x128xf32>
    %604 = math.rsqrt %603 : vector<16x128xf32>
    %605 = arith.mulf %595, %604 : vector<16x128xf32>
    %606 = arith.subf %600, %605 : vector<16x128xf32>
    %607 = arith.mulf %606, %606 : vector<16x128xf32>
    %cst_109 = arith.constant 1.000000e-01 : f32
    %608 = vector.broadcast %cst_109 : f32 to vector<16x128xf32>
    %609 = arith.addf %608, %607 : vector<16x128xf32>
    %610 = tpu.reciprocal %609 {approx = true} : vector<16x128xf32> -> vector<16x128xf32>
    %611 = arith.mulf %607, %610 : vector<16x128xf32>
    %612 = arith.addf %589, %611 : vector<16x128xf32>
    %613 = vector.extract_strided_slice %590 {offsets = [1, 0], sizes = [16, 128], strides = [1, 1]} : vector<22x128xf32> to vector<16x128xf32>
    %614 = vector.extract_strided_slice %591 {offsets = [1, 0], sizes = [16, 128], strides = [1, 1]} : vector<22x128xf32> to vector<16x128xf32>
    %615 = arith.subf %613, %14 : vector<16x128xf32>
    %616 = arith.subf %614, %15 : vector<16x128xf32>
    %617 = arith.mulf %615, %615 : vector<16x128xf32>
    %cst_110 = arith.constant 8.100000e-01 : f32
    %618 = vector.broadcast %cst_110 : f32 to vector<16x128xf32>
    %619 = arith.addf %618, %617 : vector<16x128xf32>
    %620 = math.rsqrt %619 : vector<16x128xf32>
    %621 = arith.mulf %615, %620 : vector<16x128xf32>
    %622 = arith.mulf %616, %616 : vector<16x128xf32>
    %cst_111 = arith.constant 8.100000e-01 : f32
    %623 = vector.broadcast %cst_111 : f32 to vector<16x128xf32>
    %624 = arith.addf %623, %622 : vector<16x128xf32>
    %625 = math.rsqrt %624 : vector<16x128xf32>
    %626 = arith.mulf %616, %625 : vector<16x128xf32>
    %627 = arith.subf %621, %626 : vector<16x128xf32>
    %628 = arith.mulf %627, %627 : vector<16x128xf32>
    %cst_112 = arith.constant 1.000000e-01 : f32
    %629 = vector.broadcast %cst_112 : f32 to vector<16x128xf32>
    %630 = arith.addf %629, %628 : vector<16x128xf32>
    %631 = tpu.reciprocal %630 {approx = true} : vector<16x128xf32> -> vector<16x128xf32>
    %632 = arith.mulf %628, %631 : vector<16x128xf32>
    %633 = arith.addf %612, %632 : vector<16x128xf32>
    %634 = vector.extract_strided_slice %590 {offsets = [2, 0], sizes = [16, 128], strides = [1, 1]} : vector<22x128xf32> to vector<16x128xf32>
    %635 = vector.extract_strided_slice %591 {offsets = [2, 0], sizes = [16, 128], strides = [1, 1]} : vector<22x128xf32> to vector<16x128xf32>
    %636 = arith.subf %634, %14 : vector<16x128xf32>
    %637 = arith.subf %635, %15 : vector<16x128xf32>
    %638 = arith.mulf %636, %636 : vector<16x128xf32>
    %cst_113 = arith.constant 8.100000e-01 : f32
    %639 = vector.broadcast %cst_113 : f32 to vector<16x128xf32>
    %640 = arith.addf %639, %638 : vector<16x128xf32>
    %641 = math.rsqrt %640 : vector<16x128xf32>
    %642 = arith.mulf %636, %641 : vector<16x128xf32>
    %643 = arith.mulf %637, %637 : vector<16x128xf32>
    %cst_114 = arith.constant 8.100000e-01 : f32
    %644 = vector.broadcast %cst_114 : f32 to vector<16x128xf32>
    %645 = arith.addf %644, %643 : vector<16x128xf32>
    %646 = math.rsqrt %645 : vector<16x128xf32>
    %647 = arith.mulf %637, %646 : vector<16x128xf32>
    %648 = arith.subf %642, %647 : vector<16x128xf32>
    %649 = arith.mulf %648, %648 : vector<16x128xf32>
    %cst_115 = arith.constant 1.000000e-01 : f32
    %650 = vector.broadcast %cst_115 : f32 to vector<16x128xf32>
    %651 = arith.addf %650, %649 : vector<16x128xf32>
    %652 = tpu.reciprocal %651 {approx = true} : vector<16x128xf32> -> vector<16x128xf32>
    %653 = arith.mulf %649, %652 : vector<16x128xf32>
    %654 = arith.addf %633, %653 : vector<16x128xf32>
    %655 = vector.extract_strided_slice %590 {offsets = [3, 0], sizes = [16, 128], strides = [1, 1]} : vector<22x128xf32> to vector<16x128xf32>
    %656 = vector.extract_strided_slice %591 {offsets = [3, 0], sizes = [16, 128], strides = [1, 1]} : vector<22x128xf32> to vector<16x128xf32>
    %657 = arith.subf %655, %14 : vector<16x128xf32>
    %658 = arith.subf %656, %15 : vector<16x128xf32>
    %659 = arith.mulf %657, %657 : vector<16x128xf32>
    %cst_116 = arith.constant 8.100000e-01 : f32
    %660 = vector.broadcast %cst_116 : f32 to vector<16x128xf32>
    %661 = arith.addf %660, %659 : vector<16x128xf32>
    %662 = math.rsqrt %661 : vector<16x128xf32>
    %663 = arith.mulf %657, %662 : vector<16x128xf32>
    %664 = arith.mulf %658, %658 : vector<16x128xf32>
    %cst_117 = arith.constant 8.100000e-01 : f32
    %665 = vector.broadcast %cst_117 : f32 to vector<16x128xf32>
    %666 = arith.addf %665, %664 : vector<16x128xf32>
    %667 = math.rsqrt %666 : vector<16x128xf32>
    %668 = arith.mulf %658, %667 : vector<16x128xf32>
    %669 = arith.subf %663, %668 : vector<16x128xf32>
    %670 = arith.mulf %669, %669 : vector<16x128xf32>
    %cst_118 = arith.constant 1.000000e-01 : f32
    %671 = vector.broadcast %cst_118 : f32 to vector<16x128xf32>
    %672 = arith.addf %671, %670 : vector<16x128xf32>
    %673 = tpu.reciprocal %672 {approx = true} : vector<16x128xf32> -> vector<16x128xf32>
    %674 = arith.mulf %670, %673 : vector<16x128xf32>
    %675 = arith.addf %654, %674 : vector<16x128xf32>
    %676 = vector.extract_strided_slice %590 {offsets = [4, 0], sizes = [16, 128], strides = [1, 1]} : vector<22x128xf32> to vector<16x128xf32>
    %677 = vector.extract_strided_slice %591 {offsets = [4, 0], sizes = [16, 128], strides = [1, 1]} : vector<22x128xf32> to vector<16x128xf32>
    %678 = arith.subf %676, %14 : vector<16x128xf32>
    %679 = arith.subf %677, %15 : vector<16x128xf32>
    %680 = arith.mulf %678, %678 : vector<16x128xf32>
    %cst_119 = arith.constant 8.100000e-01 : f32
    %681 = vector.broadcast %cst_119 : f32 to vector<16x128xf32>
    %682 = arith.addf %681, %680 : vector<16x128xf32>
    %683 = math.rsqrt %682 : vector<16x128xf32>
    %684 = arith.mulf %678, %683 : vector<16x128xf32>
    %685 = arith.mulf %679, %679 : vector<16x128xf32>
    %cst_120 = arith.constant 8.100000e-01 : f32
    %686 = vector.broadcast %cst_120 : f32 to vector<16x128xf32>
    %687 = arith.addf %686, %685 : vector<16x128xf32>
    %688 = math.rsqrt %687 : vector<16x128xf32>
    %689 = arith.mulf %679, %688 : vector<16x128xf32>
    %690 = arith.subf %684, %689 : vector<16x128xf32>
    %691 = arith.mulf %690, %690 : vector<16x128xf32>
    %cst_121 = arith.constant 1.000000e-01 : f32
    %692 = vector.broadcast %cst_121 : f32 to vector<16x128xf32>
    %693 = arith.addf %692, %691 : vector<16x128xf32>
    %694 = tpu.reciprocal %693 {approx = true} : vector<16x128xf32> -> vector<16x128xf32>
    %695 = arith.mulf %691, %694 : vector<16x128xf32>
    %696 = arith.addf %675, %695 : vector<16x128xf32>
    %697 = vector.extract_strided_slice %590 {offsets = [5, 0], sizes = [16, 128], strides = [1, 1]} : vector<22x128xf32> to vector<16x128xf32>
    %698 = vector.extract_strided_slice %591 {offsets = [5, 0], sizes = [16, 128], strides = [1, 1]} : vector<22x128xf32> to vector<16x128xf32>
    %699 = arith.subf %697, %14 : vector<16x128xf32>
    %700 = arith.subf %698, %15 : vector<16x128xf32>
    %701 = arith.mulf %699, %699 : vector<16x128xf32>
    %cst_122 = arith.constant 8.100000e-01 : f32
    %702 = vector.broadcast %cst_122 : f32 to vector<16x128xf32>
    %703 = arith.addf %702, %701 : vector<16x128xf32>
    %704 = math.rsqrt %703 : vector<16x128xf32>
    %705 = arith.mulf %699, %704 : vector<16x128xf32>
    %706 = arith.mulf %700, %700 : vector<16x128xf32>
    %cst_123 = arith.constant 8.100000e-01 : f32
    %707 = vector.broadcast %cst_123 : f32 to vector<16x128xf32>
    %708 = arith.addf %707, %706 : vector<16x128xf32>
    %709 = math.rsqrt %708 : vector<16x128xf32>
    %710 = arith.mulf %700, %709 : vector<16x128xf32>
    %711 = arith.subf %705, %710 : vector<16x128xf32>
    %712 = arith.mulf %711, %711 : vector<16x128xf32>
    %cst_124 = arith.constant 1.000000e-01 : f32
    %713 = vector.broadcast %cst_124 : f32 to vector<16x128xf32>
    %714 = arith.addf %713, %712 : vector<16x128xf32>
    %715 = tpu.reciprocal %714 {approx = true} : vector<16x128xf32> -> vector<16x128xf32>
    %716 = arith.mulf %712, %715 : vector<16x128xf32>
    %717 = arith.addf %696, %716 : vector<16x128xf32>
    %718 = vector.extract_strided_slice %590 {offsets = [6, 0], sizes = [16, 128], strides = [1, 1]} : vector<22x128xf32> to vector<16x128xf32>
    %719 = vector.extract_strided_slice %591 {offsets = [6, 0], sizes = [16, 128], strides = [1, 1]} : vector<22x128xf32> to vector<16x128xf32>
    %720 = arith.subf %718, %14 : vector<16x128xf32>
    %721 = arith.subf %719, %15 : vector<16x128xf32>
    %722 = arith.mulf %720, %720 : vector<16x128xf32>
    %cst_125 = arith.constant 8.100000e-01 : f32
    %723 = vector.broadcast %cst_125 : f32 to vector<16x128xf32>
    %724 = arith.addf %723, %722 : vector<16x128xf32>
    %725 = math.rsqrt %724 : vector<16x128xf32>
    %726 = arith.mulf %720, %725 : vector<16x128xf32>
    %727 = arith.mulf %721, %721 : vector<16x128xf32>
    %cst_126 = arith.constant 8.100000e-01 : f32
    %728 = vector.broadcast %cst_126 : f32 to vector<16x128xf32>
    %729 = arith.addf %728, %727 : vector<16x128xf32>
    %730 = math.rsqrt %729 : vector<16x128xf32>
    %731 = arith.mulf %721, %730 : vector<16x128xf32>
    %732 = arith.subf %726, %731 : vector<16x128xf32>
    %733 = arith.mulf %732, %732 : vector<16x128xf32>
    %cst_127 = arith.constant 1.000000e-01 : f32
    %734 = vector.broadcast %cst_127 : f32 to vector<16x128xf32>
    %735 = arith.addf %734, %733 : vector<16x128xf32>
    %736 = tpu.reciprocal %735 {approx = true} : vector<16x128xf32> -> vector<16x128xf32>
    %737 = arith.mulf %733, %736 : vector<16x128xf32>
    %738 = arith.addf %717, %737 : vector<16x128xf32>
    %c126_i32 = arith.constant 126 : i32
    %739 = tpu.dynamic_rotate %12 by %c126_i32 dim 1 : vector<22x128xf32>, i32 -> vector<22x128xf32>
    %c126_i32_128 = arith.constant 126 : i32
    %740 = tpu.dynamic_rotate %13 by %c126_i32_128 dim 1 : vector<22x128xf32>, i32 -> vector<22x128xf32>
    %741 = vector.extract_strided_slice %739 {offsets = [0, 0], sizes = [16, 128], strides = [1, 1]} : vector<22x128xf32> to vector<16x128xf32>
    %742 = vector.extract_strided_slice %740 {offsets = [0, 0], sizes = [16, 128], strides = [1, 1]} : vector<22x128xf32> to vector<16x128xf32>
    %743 = arith.subf %741, %14 : vector<16x128xf32>
    %744 = arith.subf %742, %15 : vector<16x128xf32>
    %745 = arith.mulf %743, %743 : vector<16x128xf32>
    %cst_129 = arith.constant 8.100000e-01 : f32
    %746 = vector.broadcast %cst_129 : f32 to vector<16x128xf32>
    %747 = arith.addf %746, %745 : vector<16x128xf32>
    %748 = math.rsqrt %747 : vector<16x128xf32>
    %749 = arith.mulf %743, %748 : vector<16x128xf32>
    %750 = arith.mulf %744, %744 : vector<16x128xf32>
    %cst_130 = arith.constant 8.100000e-01 : f32
    %751 = vector.broadcast %cst_130 : f32 to vector<16x128xf32>
    %752 = arith.addf %751, %750 : vector<16x128xf32>
    %753 = math.rsqrt %752 : vector<16x128xf32>
    %754 = arith.mulf %744, %753 : vector<16x128xf32>
    %755 = arith.subf %749, %754 : vector<16x128xf32>
    %756 = arith.mulf %755, %755 : vector<16x128xf32>
    %cst_131 = arith.constant 1.000000e-01 : f32
    %757 = vector.broadcast %cst_131 : f32 to vector<16x128xf32>
    %758 = arith.addf %757, %756 : vector<16x128xf32>
    %759 = tpu.reciprocal %758 {approx = true} : vector<16x128xf32> -> vector<16x128xf32>
    %760 = arith.mulf %756, %759 : vector<16x128xf32>
    %761 = arith.addf %738, %760 : vector<16x128xf32>
    %762 = vector.extract_strided_slice %739 {offsets = [1, 0], sizes = [16, 128], strides = [1, 1]} : vector<22x128xf32> to vector<16x128xf32>
    %763 = vector.extract_strided_slice %740 {offsets = [1, 0], sizes = [16, 128], strides = [1, 1]} : vector<22x128xf32> to vector<16x128xf32>
    %764 = arith.subf %762, %14 : vector<16x128xf32>
    %765 = arith.subf %763, %15 : vector<16x128xf32>
    %766 = arith.mulf %764, %764 : vector<16x128xf32>
    %cst_132 = arith.constant 8.100000e-01 : f32
    %767 = vector.broadcast %cst_132 : f32 to vector<16x128xf32>
    %768 = arith.addf %767, %766 : vector<16x128xf32>
    %769 = math.rsqrt %768 : vector<16x128xf32>
    %770 = arith.mulf %764, %769 : vector<16x128xf32>
    %771 = arith.mulf %765, %765 : vector<16x128xf32>
    %cst_133 = arith.constant 8.100000e-01 : f32
    %772 = vector.broadcast %cst_133 : f32 to vector<16x128xf32>
    %773 = arith.addf %772, %771 : vector<16x128xf32>
    %774 = math.rsqrt %773 : vector<16x128xf32>
    %775 = arith.mulf %765, %774 : vector<16x128xf32>
    %776 = arith.subf %770, %775 : vector<16x128xf32>
    %777 = arith.mulf %776, %776 : vector<16x128xf32>
    %cst_134 = arith.constant 1.000000e-01 : f32
    %778 = vector.broadcast %cst_134 : f32 to vector<16x128xf32>
    %779 = arith.addf %778, %777 : vector<16x128xf32>
    %780 = tpu.reciprocal %779 {approx = true} : vector<16x128xf32> -> vector<16x128xf32>
    %781 = arith.mulf %777, %780 : vector<16x128xf32>
    %782 = arith.addf %761, %781 : vector<16x128xf32>
    %783 = vector.extract_strided_slice %739 {offsets = [2, 0], sizes = [16, 128], strides = [1, 1]} : vector<22x128xf32> to vector<16x128xf32>
    %784 = vector.extract_strided_slice %740 {offsets = [2, 0], sizes = [16, 128], strides = [1, 1]} : vector<22x128xf32> to vector<16x128xf32>
    %785 = arith.subf %783, %14 : vector<16x128xf32>
    %786 = arith.subf %784, %15 : vector<16x128xf32>
    %787 = arith.mulf %785, %785 : vector<16x128xf32>
    %cst_135 = arith.constant 8.100000e-01 : f32
    %788 = vector.broadcast %cst_135 : f32 to vector<16x128xf32>
    %789 = arith.addf %788, %787 : vector<16x128xf32>
    %790 = math.rsqrt %789 : vector<16x128xf32>
    %791 = arith.mulf %785, %790 : vector<16x128xf32>
    %792 = arith.mulf %786, %786 : vector<16x128xf32>
    %cst_136 = arith.constant 8.100000e-01 : f32
    %793 = vector.broadcast %cst_136 : f32 to vector<16x128xf32>
    %794 = arith.addf %793, %792 : vector<16x128xf32>
    %795 = math.rsqrt %794 : vector<16x128xf32>
    %796 = arith.mulf %786, %795 : vector<16x128xf32>
    %797 = arith.subf %791, %796 : vector<16x128xf32>
    %798 = arith.mulf %797, %797 : vector<16x128xf32>
    %cst_137 = arith.constant 1.000000e-01 : f32
    %799 = vector.broadcast %cst_137 : f32 to vector<16x128xf32>
    %800 = arith.addf %799, %798 : vector<16x128xf32>
    %801 = tpu.reciprocal %800 {approx = true} : vector<16x128xf32> -> vector<16x128xf32>
    %802 = arith.mulf %798, %801 : vector<16x128xf32>
    %803 = arith.addf %782, %802 : vector<16x128xf32>
    %804 = vector.extract_strided_slice %739 {offsets = [3, 0], sizes = [16, 128], strides = [1, 1]} : vector<22x128xf32> to vector<16x128xf32>
    %805 = vector.extract_strided_slice %740 {offsets = [3, 0], sizes = [16, 128], strides = [1, 1]} : vector<22x128xf32> to vector<16x128xf32>
    %806 = arith.subf %804, %14 : vector<16x128xf32>
    %807 = arith.subf %805, %15 : vector<16x128xf32>
    %808 = arith.mulf %806, %806 : vector<16x128xf32>
    %cst_138 = arith.constant 8.100000e-01 : f32
    %809 = vector.broadcast %cst_138 : f32 to vector<16x128xf32>
    %810 = arith.addf %809, %808 : vector<16x128xf32>
    %811 = math.rsqrt %810 : vector<16x128xf32>
    %812 = arith.mulf %806, %811 : vector<16x128xf32>
    %813 = arith.mulf %807, %807 : vector<16x128xf32>
    %cst_139 = arith.constant 8.100000e-01 : f32
    %814 = vector.broadcast %cst_139 : f32 to vector<16x128xf32>
    %815 = arith.addf %814, %813 : vector<16x128xf32>
    %816 = math.rsqrt %815 : vector<16x128xf32>
    %817 = arith.mulf %807, %816 : vector<16x128xf32>
    %818 = arith.subf %812, %817 : vector<16x128xf32>
    %819 = arith.mulf %818, %818 : vector<16x128xf32>
    %cst_140 = arith.constant 1.000000e-01 : f32
    %820 = vector.broadcast %cst_140 : f32 to vector<16x128xf32>
    %821 = arith.addf %820, %819 : vector<16x128xf32>
    %822 = tpu.reciprocal %821 {approx = true} : vector<16x128xf32> -> vector<16x128xf32>
    %823 = arith.mulf %819, %822 : vector<16x128xf32>
    %824 = arith.addf %803, %823 : vector<16x128xf32>
    %825 = vector.extract_strided_slice %739 {offsets = [4, 0], sizes = [16, 128], strides = [1, 1]} : vector<22x128xf32> to vector<16x128xf32>
    %826 = vector.extract_strided_slice %740 {offsets = [4, 0], sizes = [16, 128], strides = [1, 1]} : vector<22x128xf32> to vector<16x128xf32>
    %827 = arith.subf %825, %14 : vector<16x128xf32>
    %828 = arith.subf %826, %15 : vector<16x128xf32>
    %829 = arith.mulf %827, %827 : vector<16x128xf32>
    %cst_141 = arith.constant 8.100000e-01 : f32
    %830 = vector.broadcast %cst_141 : f32 to vector<16x128xf32>
    %831 = arith.addf %830, %829 : vector<16x128xf32>
    %832 = math.rsqrt %831 : vector<16x128xf32>
    %833 = arith.mulf %827, %832 : vector<16x128xf32>
    %834 = arith.mulf %828, %828 : vector<16x128xf32>
    %cst_142 = arith.constant 8.100000e-01 : f32
    %835 = vector.broadcast %cst_142 : f32 to vector<16x128xf32>
    %836 = arith.addf %835, %834 : vector<16x128xf32>
    %837 = math.rsqrt %836 : vector<16x128xf32>
    %838 = arith.mulf %828, %837 : vector<16x128xf32>
    %839 = arith.subf %833, %838 : vector<16x128xf32>
    %840 = arith.mulf %839, %839 : vector<16x128xf32>
    %cst_143 = arith.constant 1.000000e-01 : f32
    %841 = vector.broadcast %cst_143 : f32 to vector<16x128xf32>
    %842 = arith.addf %841, %840 : vector<16x128xf32>
    %843 = tpu.reciprocal %842 {approx = true} : vector<16x128xf32> -> vector<16x128xf32>
    %844 = arith.mulf %840, %843 : vector<16x128xf32>
    %845 = arith.addf %824, %844 : vector<16x128xf32>
    %846 = vector.extract_strided_slice %739 {offsets = [5, 0], sizes = [16, 128], strides = [1, 1]} : vector<22x128xf32> to vector<16x128xf32>
    %847 = vector.extract_strided_slice %740 {offsets = [5, 0], sizes = [16, 128], strides = [1, 1]} : vector<22x128xf32> to vector<16x128xf32>
    %848 = arith.subf %846, %14 : vector<16x128xf32>
    %849 = arith.subf %847, %15 : vector<16x128xf32>
    %850 = arith.mulf %848, %848 : vector<16x128xf32>
    %cst_144 = arith.constant 8.100000e-01 : f32
    %851 = vector.broadcast %cst_144 : f32 to vector<16x128xf32>
    %852 = arith.addf %851, %850 : vector<16x128xf32>
    %853 = math.rsqrt %852 : vector<16x128xf32>
    %854 = arith.mulf %848, %853 : vector<16x128xf32>
    %855 = arith.mulf %849, %849 : vector<16x128xf32>
    %cst_145 = arith.constant 8.100000e-01 : f32
    %856 = vector.broadcast %cst_145 : f32 to vector<16x128xf32>
    %857 = arith.addf %856, %855 : vector<16x128xf32>
    %858 = math.rsqrt %857 : vector<16x128xf32>
    %859 = arith.mulf %849, %858 : vector<16x128xf32>
    %860 = arith.subf %854, %859 : vector<16x128xf32>
    %861 = arith.mulf %860, %860 : vector<16x128xf32>
    %cst_146 = arith.constant 1.000000e-01 : f32
    %862 = vector.broadcast %cst_146 : f32 to vector<16x128xf32>
    %863 = arith.addf %862, %861 : vector<16x128xf32>
    %864 = tpu.reciprocal %863 {approx = true} : vector<16x128xf32> -> vector<16x128xf32>
    %865 = arith.mulf %861, %864 : vector<16x128xf32>
    %866 = arith.addf %845, %865 : vector<16x128xf32>
    %867 = vector.extract_strided_slice %739 {offsets = [6, 0], sizes = [16, 128], strides = [1, 1]} : vector<22x128xf32> to vector<16x128xf32>
    %868 = vector.extract_strided_slice %740 {offsets = [6, 0], sizes = [16, 128], strides = [1, 1]} : vector<22x128xf32> to vector<16x128xf32>
    %869 = arith.subf %867, %14 : vector<16x128xf32>
    %870 = arith.subf %868, %15 : vector<16x128xf32>
    %871 = arith.mulf %869, %869 : vector<16x128xf32>
    %cst_147 = arith.constant 8.100000e-01 : f32
    %872 = vector.broadcast %cst_147 : f32 to vector<16x128xf32>
    %873 = arith.addf %872, %871 : vector<16x128xf32>
    %874 = math.rsqrt %873 : vector<16x128xf32>
    %875 = arith.mulf %869, %874 : vector<16x128xf32>
    %876 = arith.mulf %870, %870 : vector<16x128xf32>
    %cst_148 = arith.constant 8.100000e-01 : f32
    %877 = vector.broadcast %cst_148 : f32 to vector<16x128xf32>
    %878 = arith.addf %877, %876 : vector<16x128xf32>
    %879 = math.rsqrt %878 : vector<16x128xf32>
    %880 = arith.mulf %870, %879 : vector<16x128xf32>
    %881 = arith.subf %875, %880 : vector<16x128xf32>
    %882 = arith.mulf %881, %881 : vector<16x128xf32>
    %cst_149 = arith.constant 1.000000e-01 : f32
    %883 = vector.broadcast %cst_149 : f32 to vector<16x128xf32>
    %884 = arith.addf %883, %882 : vector<16x128xf32>
    %885 = tpu.reciprocal %884 {approx = true} : vector<16x128xf32> -> vector<16x128xf32>
    %886 = arith.mulf %882, %885 : vector<16x128xf32>
    %887 = arith.addf %866, %886 : vector<16x128xf32>
    %c125_i32 = arith.constant 125 : i32
    %888 = tpu.dynamic_rotate %12 by %c125_i32 dim 1 : vector<22x128xf32>, i32 -> vector<22x128xf32>
    %c125_i32_150 = arith.constant 125 : i32
    %889 = tpu.dynamic_rotate %13 by %c125_i32_150 dim 1 : vector<22x128xf32>, i32 -> vector<22x128xf32>
    %890 = vector.extract_strided_slice %888 {offsets = [0, 0], sizes = [16, 128], strides = [1, 1]} : vector<22x128xf32> to vector<16x128xf32>
    %891 = vector.extract_strided_slice %889 {offsets = [0, 0], sizes = [16, 128], strides = [1, 1]} : vector<22x128xf32> to vector<16x128xf32>
    %892 = arith.subf %890, %14 : vector<16x128xf32>
    %893 = arith.subf %891, %15 : vector<16x128xf32>
    %894 = arith.mulf %892, %892 : vector<16x128xf32>
    %cst_151 = arith.constant 8.100000e-01 : f32
    %895 = vector.broadcast %cst_151 : f32 to vector<16x128xf32>
    %896 = arith.addf %895, %894 : vector<16x128xf32>
    %897 = math.rsqrt %896 : vector<16x128xf32>
    %898 = arith.mulf %892, %897 : vector<16x128xf32>
    %899 = arith.mulf %893, %893 : vector<16x128xf32>
    %cst_152 = arith.constant 8.100000e-01 : f32
    %900 = vector.broadcast %cst_152 : f32 to vector<16x128xf32>
    %901 = arith.addf %900, %899 : vector<16x128xf32>
    %902 = math.rsqrt %901 : vector<16x128xf32>
    %903 = arith.mulf %893, %902 : vector<16x128xf32>
    %904 = arith.subf %898, %903 : vector<16x128xf32>
    %905 = arith.mulf %904, %904 : vector<16x128xf32>
    %cst_153 = arith.constant 1.000000e-01 : f32
    %906 = vector.broadcast %cst_153 : f32 to vector<16x128xf32>
    %907 = arith.addf %906, %905 : vector<16x128xf32>
    %908 = tpu.reciprocal %907 {approx = true} : vector<16x128xf32> -> vector<16x128xf32>
    %909 = arith.mulf %905, %908 : vector<16x128xf32>
    %910 = arith.addf %887, %909 : vector<16x128xf32>
    %911 = vector.extract_strided_slice %888 {offsets = [1, 0], sizes = [16, 128], strides = [1, 1]} : vector<22x128xf32> to vector<16x128xf32>
    %912 = vector.extract_strided_slice %889 {offsets = [1, 0], sizes = [16, 128], strides = [1, 1]} : vector<22x128xf32> to vector<16x128xf32>
    %913 = arith.subf %911, %14 : vector<16x128xf32>
    %914 = arith.subf %912, %15 : vector<16x128xf32>
    %915 = arith.mulf %913, %913 : vector<16x128xf32>
    %cst_154 = arith.constant 8.100000e-01 : f32
    %916 = vector.broadcast %cst_154 : f32 to vector<16x128xf32>
    %917 = arith.addf %916, %915 : vector<16x128xf32>
    %918 = math.rsqrt %917 : vector<16x128xf32>
    %919 = arith.mulf %913, %918 : vector<16x128xf32>
    %920 = arith.mulf %914, %914 : vector<16x128xf32>
    %cst_155 = arith.constant 8.100000e-01 : f32
    %921 = vector.broadcast %cst_155 : f32 to vector<16x128xf32>
    %922 = arith.addf %921, %920 : vector<16x128xf32>
    %923 = math.rsqrt %922 : vector<16x128xf32>
    %924 = arith.mulf %914, %923 : vector<16x128xf32>
    %925 = arith.subf %919, %924 : vector<16x128xf32>
    %926 = arith.mulf %925, %925 : vector<16x128xf32>
    %cst_156 = arith.constant 1.000000e-01 : f32
    %927 = vector.broadcast %cst_156 : f32 to vector<16x128xf32>
    %928 = arith.addf %927, %926 : vector<16x128xf32>
    %929 = tpu.reciprocal %928 {approx = true} : vector<16x128xf32> -> vector<16x128xf32>
    %930 = arith.mulf %926, %929 : vector<16x128xf32>
    %931 = arith.addf %910, %930 : vector<16x128xf32>
    %932 = vector.extract_strided_slice %888 {offsets = [2, 0], sizes = [16, 128], strides = [1, 1]} : vector<22x128xf32> to vector<16x128xf32>
    %933 = vector.extract_strided_slice %889 {offsets = [2, 0], sizes = [16, 128], strides = [1, 1]} : vector<22x128xf32> to vector<16x128xf32>
    %934 = arith.subf %932, %14 : vector<16x128xf32>
    %935 = arith.subf %933, %15 : vector<16x128xf32>
    %936 = arith.mulf %934, %934 : vector<16x128xf32>
    %cst_157 = arith.constant 8.100000e-01 : f32
    %937 = vector.broadcast %cst_157 : f32 to vector<16x128xf32>
    %938 = arith.addf %937, %936 : vector<16x128xf32>
    %939 = math.rsqrt %938 : vector<16x128xf32>
    %940 = arith.mulf %934, %939 : vector<16x128xf32>
    %941 = arith.mulf %935, %935 : vector<16x128xf32>
    %cst_158 = arith.constant 8.100000e-01 : f32
    %942 = vector.broadcast %cst_158 : f32 to vector<16x128xf32>
    %943 = arith.addf %942, %941 : vector<16x128xf32>
    %944 = math.rsqrt %943 : vector<16x128xf32>
    %945 = arith.mulf %935, %944 : vector<16x128xf32>
    %946 = arith.subf %940, %945 : vector<16x128xf32>
    %947 = arith.mulf %946, %946 : vector<16x128xf32>
    %cst_159 = arith.constant 1.000000e-01 : f32
    %948 = vector.broadcast %cst_159 : f32 to vector<16x128xf32>
    %949 = arith.addf %948, %947 : vector<16x128xf32>
    %950 = tpu.reciprocal %949 {approx = true} : vector<16x128xf32> -> vector<16x128xf32>
    %951 = arith.mulf %947, %950 : vector<16x128xf32>
    %952 = arith.addf %931, %951 : vector<16x128xf32>
    %953 = vector.extract_strided_slice %888 {offsets = [3, 0], sizes = [16, 128], strides = [1, 1]} : vector<22x128xf32> to vector<16x128xf32>
    %954 = vector.extract_strided_slice %889 {offsets = [3, 0], sizes = [16, 128], strides = [1, 1]} : vector<22x128xf32> to vector<16x128xf32>
    %955 = arith.subf %953, %14 : vector<16x128xf32>
    %956 = arith.subf %954, %15 : vector<16x128xf32>
    %957 = arith.mulf %955, %955 : vector<16x128xf32>
    %cst_160 = arith.constant 8.100000e-01 : f32
    %958 = vector.broadcast %cst_160 : f32 to vector<16x128xf32>
    %959 = arith.addf %958, %957 : vector<16x128xf32>
    %960 = math.rsqrt %959 : vector<16x128xf32>
    %961 = arith.mulf %955, %960 : vector<16x128xf32>
    %962 = arith.mulf %956, %956 : vector<16x128xf32>
    %cst_161 = arith.constant 8.100000e-01 : f32
    %963 = vector.broadcast %cst_161 : f32 to vector<16x128xf32>
    %964 = arith.addf %963, %962 : vector<16x128xf32>
    %965 = math.rsqrt %964 : vector<16x128xf32>
    %966 = arith.mulf %956, %965 : vector<16x128xf32>
    %967 = arith.subf %961, %966 : vector<16x128xf32>
    %968 = arith.mulf %967, %967 : vector<16x128xf32>
    %cst_162 = arith.constant 1.000000e-01 : f32
    %969 = vector.broadcast %cst_162 : f32 to vector<16x128xf32>
    %970 = arith.addf %969, %968 : vector<16x128xf32>
    %971 = tpu.reciprocal %970 {approx = true} : vector<16x128xf32> -> vector<16x128xf32>
    %972 = arith.mulf %968, %971 : vector<16x128xf32>
    %973 = arith.addf %952, %972 : vector<16x128xf32>
    %974 = vector.extract_strided_slice %888 {offsets = [4, 0], sizes = [16, 128], strides = [1, 1]} : vector<22x128xf32> to vector<16x128xf32>
    %975 = vector.extract_strided_slice %889 {offsets = [4, 0], sizes = [16, 128], strides = [1, 1]} : vector<22x128xf32> to vector<16x128xf32>
    %976 = arith.subf %974, %14 : vector<16x128xf32>
    %977 = arith.subf %975, %15 : vector<16x128xf32>
    %978 = arith.mulf %976, %976 : vector<16x128xf32>
    %cst_163 = arith.constant 8.100000e-01 : f32
    %979 = vector.broadcast %cst_163 : f32 to vector<16x128xf32>
    %980 = arith.addf %979, %978 : vector<16x128xf32>
    %981 = math.rsqrt %980 : vector<16x128xf32>
    %982 = arith.mulf %976, %981 : vector<16x128xf32>
    %983 = arith.mulf %977, %977 : vector<16x128xf32>
    %cst_164 = arith.constant 8.100000e-01 : f32
    %984 = vector.broadcast %cst_164 : f32 to vector<16x128xf32>
    %985 = arith.addf %984, %983 : vector<16x128xf32>
    %986 = math.rsqrt %985 : vector<16x128xf32>
    %987 = arith.mulf %977, %986 : vector<16x128xf32>
    %988 = arith.subf %982, %987 : vector<16x128xf32>
    %989 = arith.mulf %988, %988 : vector<16x128xf32>
    %cst_165 = arith.constant 1.000000e-01 : f32
    %990 = vector.broadcast %cst_165 : f32 to vector<16x128xf32>
    %991 = arith.addf %990, %989 : vector<16x128xf32>
    %992 = tpu.reciprocal %991 {approx = true} : vector<16x128xf32> -> vector<16x128xf32>
    %993 = arith.mulf %989, %992 : vector<16x128xf32>
    %994 = arith.addf %973, %993 : vector<16x128xf32>
    %995 = vector.extract_strided_slice %888 {offsets = [5, 0], sizes = [16, 128], strides = [1, 1]} : vector<22x128xf32> to vector<16x128xf32>
    %996 = vector.extract_strided_slice %889 {offsets = [5, 0], sizes = [16, 128], strides = [1, 1]} : vector<22x128xf32> to vector<16x128xf32>
    %997 = arith.subf %995, %14 : vector<16x128xf32>
    %998 = arith.subf %996, %15 : vector<16x128xf32>
    %999 = arith.mulf %997, %997 : vector<16x128xf32>
    %cst_166 = arith.constant 8.100000e-01 : f32
    %1000 = vector.broadcast %cst_166 : f32 to vector<16x128xf32>
    %1001 = arith.addf %1000, %999 : vector<16x128xf32>
    %1002 = math.rsqrt %1001 : vector<16x128xf32>
    %1003 = arith.mulf %997, %1002 : vector<16x128xf32>
    %1004 = arith.mulf %998, %998 : vector<16x128xf32>
    %cst_167 = arith.constant 8.100000e-01 : f32
    %1005 = vector.broadcast %cst_167 : f32 to vector<16x128xf32>
    %1006 = arith.addf %1005, %1004 : vector<16x128xf32>
    %1007 = math.rsqrt %1006 : vector<16x128xf32>
    %1008 = arith.mulf %998, %1007 : vector<16x128xf32>
    %1009 = arith.subf %1003, %1008 : vector<16x128xf32>
    %1010 = arith.mulf %1009, %1009 : vector<16x128xf32>
    %cst_168 = arith.constant 1.000000e-01 : f32
    %1011 = vector.broadcast %cst_168 : f32 to vector<16x128xf32>
    %1012 = arith.addf %1011, %1010 : vector<16x128xf32>
    %1013 = tpu.reciprocal %1012 {approx = true} : vector<16x128xf32> -> vector<16x128xf32>
    %1014 = arith.mulf %1010, %1013 : vector<16x128xf32>
    %1015 = arith.addf %994, %1014 : vector<16x128xf32>
    %1016 = vector.extract_strided_slice %888 {offsets = [6, 0], sizes = [16, 128], strides = [1, 1]} : vector<22x128xf32> to vector<16x128xf32>
    %1017 = vector.extract_strided_slice %889 {offsets = [6, 0], sizes = [16, 128], strides = [1, 1]} : vector<22x128xf32> to vector<16x128xf32>
    %1018 = arith.subf %1016, %14 : vector<16x128xf32>
    %1019 = arith.subf %1017, %15 : vector<16x128xf32>
    %1020 = arith.mulf %1018, %1018 : vector<16x128xf32>
    %cst_169 = arith.constant 8.100000e-01 : f32
    %1021 = vector.broadcast %cst_169 : f32 to vector<16x128xf32>
    %1022 = arith.addf %1021, %1020 : vector<16x128xf32>
    %1023 = math.rsqrt %1022 : vector<16x128xf32>
    %1024 = arith.mulf %1018, %1023 : vector<16x128xf32>
    %1025 = arith.mulf %1019, %1019 : vector<16x128xf32>
    %cst_170 = arith.constant 8.100000e-01 : f32
    %1026 = vector.broadcast %cst_170 : f32 to vector<16x128xf32>
    %1027 = arith.addf %1026, %1025 : vector<16x128xf32>
    %1028 = math.rsqrt %1027 : vector<16x128xf32>
    %1029 = arith.mulf %1019, %1028 : vector<16x128xf32>
    %1030 = arith.subf %1024, %1029 : vector<16x128xf32>
    %1031 = arith.mulf %1030, %1030 : vector<16x128xf32>
    %cst_171 = arith.constant 1.000000e-01 : f32
    %1032 = vector.broadcast %cst_171 : f32 to vector<16x128xf32>
    %1033 = arith.addf %1032, %1031 : vector<16x128xf32>
    %1034 = tpu.reciprocal %1033 {approx = true} : vector<16x128xf32> -> vector<16x128xf32>
    %1035 = arith.mulf %1031, %1034 : vector<16x128xf32>
    %1036 = arith.addf %1015, %1035 : vector<16x128xf32>
    %1037 = tpu.iota {dimensions = array<i32: 0>} : vector<16x128xi32>
    %1038 = tpu.iota {dimensions = array<i32: 1>} : vector<16x128xi32>
    %c16_i32 = arith.constant 16 : i32
    %1039 = arith.muli %arg1, %c16_i32 : i32
    %1040 = vector.broadcast %1039 : i32 to vector<16x128xi32>
    %1041 = arith.addi %1037, %1040 : vector<16x128xi32>
    %c3_i32_172 = arith.constant 3 : i32
    %1042 = vector.broadcast %c3_i32_172 : i32 to vector<16x128xi32>
    %1043 = arith.cmpi sge, %1041, %1042 : vector<16x128xi32>
    %c13_i32 = arith.constant 13 : i32
    %1044 = vector.broadcast %c13_i32 : i32 to vector<16x128xi32>
    %1045 = arith.cmpi slt, %1041, %1044 : vector<16x128xi32>
    %1046 = arith.andi %1043, %1045 : vector<16x128xi1>
    %c6_i32 = arith.constant 6 : i32
    %1047 = vector.broadcast %c6_i32 : i32 to vector<16x128xi32>
    %1048 = arith.cmpi sge, %1038, %1047 : vector<16x128xi32>
    %1049 = arith.andi %1046, %1048 : vector<16x128xi1>
    %c16_i32_173 = arith.constant 16 : i32
    %1050 = vector.broadcast %c16_i32_173 : i32 to vector<16x128xi32>
    %1051 = arith.cmpi slt, %1038, %1050 : vector<16x128xi32>
    %1052 = arith.andi %1049, %1051 : vector<16x128xi1>
    %cst_174 = arith.constant 0.000000e+00 : f32
    %1053 = vector.broadcast %cst_174 : f32 to vector<16x128xf32>
    %1054 = arith.select %1052, %1036, %1053 : vector<16x128xi1>, vector<16x128xf32>
    %1055 = vector.shape_cast %1054 : vector<16x128xf32> to vector<1x16x128xf32>
    %cst_175 = arith.constant dense<0.000000e+00> : vector<1xf32>
    %1056 = vector.multi_reduction <add>, %1055, %cst_175 [1, 2] : vector<1x16x128xf32> to vector<1xf32>
    %1057 = vector.shape_cast %1056 : vector<1xf32> to vector<1x1x1xf32>
    %1058 = vector.extract %1057[0, 0, 0] : f32 from vector<1x1x1xf32>
    %cst_176 = arith.constant 0.0204081628 : f32
    %1059 = arith.mulf %1058, %cst_176 : f32
    %1060 = vector.broadcast %1059 : f32 to vector<1x1xf32>
    %c0_177 = arith.constant 0 : index
    %c0_178 = arith.constant 0 : index
    %c0_179 = arith.constant 0 : index
    %c0_180 = arith.constant 0 : index
    %1061 = vector.load %arg6[%c0_177, %c0_178, %c0_179, %c0_180] : memref<1x1x1x1xf32, #tpu.memory_space<vmem>>, vector<1x1x1x1xf32>
    %1062 = vector.shape_cast %1061 : vector<1x1x1x1xf32> to vector<1x1xf32>
    %1063 = vector.shape_cast %1060 : vector<1x1xf32> to vector<1x1x1x1xf32>
    tpu.vector_store %arg6[%c0_177, %c0_178, %c0_179, %c0_180], %1063 {strides = array<i32>} : memref<1x1x1x1xf32, #tpu.memory_space<vmem>>, vector<1x1x1x1xf32>,
    return
  }
  func.func @transform_0(%arg0: i32, %arg1: i32) -> (i32, i32, i32) {
    %c0_i32 = arith.constant 0 : i32
    %c0_i32_0 = arith.constant 0 : i32
    return %arg0, %arg1, %c0_i32 : i32, i32, i32
  }
  func.func @transform_1(%arg0: i32, %arg1: i32) -> (i32, i32, i32) {
    %c1_i32 = arith.constant 1 : i32
    %0 = arith.addi %arg1, %c1_i32 : i32
    %c2_i32 = arith.constant 2 : i32
    %1 = arith.muli %0, %c2_i32 : i32
    %c3_i32 = arith.constant 3 : i32
    %2 = arith.minsi %1, %c3_i32 : i32
    %c0_i32 = arith.constant 0 : i32
    %c0_i32_0 = arith.constant 0 : i32
    return %arg0, %2, %c0_i32 : i32, i32, i32
  }
  func.func @transform_2(%arg0: i32, %arg1: i32) -> (i32, i32, i32) {
    %c0_i32 = arith.constant 0 : i32
    %c0_i32_0 = arith.constant 0 : i32
    return %arg0, %arg1, %c0_i32 : i32, i32, i32
  }
  func.func @transform_3(%arg0: i32, %arg1: i32) -> (i32, i32, i32) {
    %c1_i32 = arith.constant 1 : i32
    %0 = arith.addi %arg1, %c1_i32 : i32
    %c2_i32 = arith.constant 2 : i32
    %1 = arith.muli %0, %c2_i32 : i32
    %c3_i32 = arith.constant 3 : i32
    %2 = arith.minsi %1, %c3_i32 : i32
    %c0_i32 = arith.constant 0 : i32
    %c0_i32_0 = arith.constant 0 : i32
    return %arg0, %2, %c0_i32 : i32, i32, i32
  }
  func.func @transform_4(%arg0: i32, %arg1: i32) -> (i32, i32, i32, i32) {
    %c0_i32 = arith.constant 0 : i32
    %c0_i32_0 = arith.constant 0 : i32
    %c0_i32_1 = arith.constant 0 : i32
    return %arg0, %arg1, %c0_i32, %c0_i32_0 : i32, i32, i32, i32
  }
}

</mosaic_0001>

<bundles_post_ra>
// kernel: ternary_loss.1
= control target key start
LH: loop header
LB: loop body
LE: loop exit
PB: predicated region body
PF: predicated region fallthrough
CT: control target
= control target key end

     0   :  { %s4256_s15 = smov 0   ;;  %s4258_s16 = smov 0   ;;  %s7840_s0 = inlined_call_operand.vmem [shape: f32[2,32,128], index: 0, kind: input, shape index: {}, may-alias: {0,1}]   ;;  %s7841_s1 = inlined_call_operand.vmem [shape: f32[2,32,128], index: 1, kind: input, shape index: {}, may-alias: {0,1}]   ;;  %s7842_s2 = inlined_call_operand.vmem [shape: f32[2,32,128], index: 2, kind: input, shape index: {}, may-alias: {2,3}]   ;;  %s7843_s3 = inlined_call_operand.vmem [shape: f32[2,32,128], index: 3, kind: input, shape index: {}, may-alias: {2,3}]   ;;  %s7844_s4 = inlined_call_operand.vmem [shape: f32[2,1,1,1], index: 4, kind: output, shape index: {}]  }
   0x1   :  { %s4260_s17 = smov 0  }
   0x2 LB: > { %s26_s18 = sadd.s32 1, %s4219_s16  ;;  %p3308_p0 = scmp.ge.s32.totalorder %s4223_s17, 1  ;;  %s4223_s17 = sphi %s4260_s17, %s14_s17   ;;  %s4219_s16 = sphi %s4258_s16, %s8338_s16   ;;  %s4215_s15 = sphi %s4256_s15, %s8337_s15  }
   0x3   : > { %p28_p1 = scmp.ge.s32.totalorder %s26_s18, 2  ;;  %p262_p2 = scmp.lt.s32.totalorder %s4223_s17, 3 }
   0x5   : > { %s8340_s18 = smov (%p28_p1, %s26_s18), 0  ;;  %p263_p3 = pnand %p3308_p0, %p262_p2 }
   0x7   : > { %266 = sbr.rel (%p263_p3) target bundleno = 932 (0x3a4), region = 36 }
   0xe   : > { %p327_p4 = scmp.lt.s32.totalorder %s4215_s15, 1  ;;  %s4225_s27 = smov 3   ;;  %vm467_vm0 = vcmask 1045504   ;;  %vm532_vm1 = vcmask 1046528   ;;  %vm672_vm2 = vcmask 1040384   ;;  %vm747_vm3 = vcmask 1041408  }
   0xf   : > { %s4226_s8 = smov 2   ;;  %s4227_s9 = smov 1   ;;  %vm812_vm4 = vcmask 1042432   ;;  %vm417_vm5 = vcmask 1044480   ;;  %vm737_vm6 = vcmask 1043456   ;;  %vm3177_vm15 = vcmask 0  }
  0x10   : > { %s8342_s15 = smov (!%p327_p4, %s4215_s15), 1  ;;  %s4228_s10 = smov 127  }
  0x11   : > { %s3319_s19 = sshll.u32 %s8342_s15, 5  ;;  %s4229_s11 = smov 126  }
  0x12   : > { %s360_s22 = scalar_lea.vmem %s7842_s2, %s3319_s19  ;;  %s334_s25 = scalar_lea.vmem %s7840_s0, %s3319_s19 }
  0x13   : > { %v4283_v0 = vld [vmem:[%s360_s22] sm:$0xff]  ;;  %s3321_s26 = sadd.s32 16, %s3319_s19  ;;  %v4287_v2 = vld [vmem:[%s334_s25 + $0x8] sm:$0xff]  ;;  %s4230_s12 = smov 125  }
  0x14   : > { %v4285_v1 = vld [vmem:[%s334_s25] sm:$0xff]  ;;  %390 = vst [vmem:[#allocation3] sm:$0xff] %v4283_v0  ;;  %408 = vrot.lane.b32.xlu1 %v4283_v0, %s4225_s27  ;;  %s347_s30 = scalar_lea.vmem %s7841_s1, %s3321_s26  ;;  %387 = vst [vmem:[#allocation2 + $0x8] sm:$0xff] %v4287_v2  ;;  %s373_s7 = scalar_lea.vmem %s7843_s3, %s3321_s26  ;;  %v4300_v3 = vld [vmem:[%s360_s22 + $0x8] sm:$0xff]  ;;  %v479_v9 = vrot.slane %v4283_v0, 2  ;;  %v553_v11 = vrot.slane %v4283_v0, 1 }
  0x15   : > { %386 = vst [vmem:[#allocation2] sm:$0xff] %v4285_v1  ;;  %402 = vrot.lane.b32.xlu0 %v4285_v1, %s4225_s27  ;;  %v392_v4 = vld [vmem:[%s347_s30] sm:$0xff]  ;;  %391 = vst [vmem:[#allocation3 + $0x8] sm:$0xff] %v4300_v3  ;;  %v480_v8 = vrot.slane %v4300_v3, 2  ;;  %v554_v10 = vrot.slane %v4300_v3, 1  ;;  %v469_v13 = vrot.slane %v4287_v2, 2  ;;  %s383_s20 = scalar_lea.vmem %s7844_s4, %s8342_s15 }
  0x16   : > { %v394_v5 = vld [vmem:[%s373_s7] sm:$0xff]  ;;  %393 = vst [vmem:[#allocation2 + $0x10] sm:$0xff] %v392_v4  ;;  %v468_v14 = vrot.slane %v4285_v1, 2  ;;  %v543_v17 = vrot.slane %v4287_v2, 1  ;;  %v542_v18 = vrot.slane %v4285_v1, 1  ;;  %v674_v26 = vrot.slane %v4287_v2, 7 }
  0x17   : > { %395 = vst [vmem:[#allocation3 + $0x10] sm:$0xff] %v394_v5  ;;  %v4348_v12 = vsel %vm467_vm0, %v479_v9, %v480_v8  ;;  %v4355_v15 = vsel %vm532_vm1, %v553_v11, %v554_v10  ;;  %v749_v30 = vrot.slane %v4287_v2, 6  ;;  %v4425_v43 = vrot.slane %v4285_v1, 7 }
  0x18   : > { %7973 = vst [vmem:[#allocation5_spill] sm:$0xff] %v4348_v12  ;;  %7974 = vst [vmem:[#allocation6_spill] sm:$0xff] %v4355_v15  ;;  %v4359_v16 = vsub.f32 %v4283_v0, %v4348_v12  ;;  %v4365_v19 = vsub.f32 %v4283_v0, %v4355_v15  ;;  %v4369_v21 = vsel %vm467_vm0, %v468_v14, %v469_v13  ;;  %v7846_v45 = vrot.slane %v4287_v2, 5 }
  0x19   : > { %404 = vrot.lane.b32.xlu0 %v4287_v2, %s4225_s27  ;;  %7975 = vst [vmem:[#allocation7_spill] sm:$0xff] %v4369_v21  ;;  %v4375_v24 = vsel %vm532_vm1, %v542_v18, %v543_v17  ;;  %v4385_v28 = vsub.f32 %v4285_v1, %v4369_v21  ;;  %7983 = vst [vmem:[#allocation15_spill] sm:$0xff] %v4425_v43  ;;  %v4436_v48 = vrot.slane %v4285_v1, 6  ;;  %v685_v62 = vrot.slane %v4300_v3, 7 }
  0x1a   : > { %v1717_v23 = vmul.f32 %v4359_v16, %v4359_v16  ;;  %7976 = vst [vmem:[#allocation8_spill] sm:$0xff] %v4375_v24  ;;  %v1774_v27 = vmul.f32 %v4365_v19, %v4365_v19  ;;  %v4393_v31 = vsub.f32 %v4285_v1, %v4375_v24  ;;  %v4449_v52 = vsel %vm672_vm2, %v4425_v43, %v674_v26 }
  0x1b   : > { %v1705_v40 = vmul.f32 %v4385_v28, %v4385_v28  ;;  %7984 = vst [vmem:[#allocation16_spill] sm:$0xff] %v4436_v48  ;;  %7986 = vst [vmem:[#allocation18_spill] sm:$0xff] %v4449_v52  ;;  %v4455_v55 = vsel %vm747_vm3, %v4436_v48, %v749_v30  ;;  %v760_v9 = vrot.slane %v4300_v3, 6  ;;  %v4476_v14 = vsub.f32 %v4287_v2, %v4449_v52 }
  0x1c   : > { %v1720_v35 = vadd.f32 0.81, %v1717_v23  ;;  %v1777_v39 = vadd.f32 0.81, %v1774_v27  ;;  %v1762_v44 = vmul.f32 %v4393_v31, %v4393_v31  ;;  %7987 = vst [vmem:[#allocation19_spill] sm:$0xff] %v4455_v55  ;;  %v4487_v23 = vrot.slane %v4283_v0, 7 }
  0x1d   : > { %410 = vrot.lane.b32.xlu0 %v4300_v3, %s4225_s27  ;;  %v4305_v6 = vld [vmem:[#allocation2 + $0x10] sm:$0x3f]  ;;  %v1708_v53 = vadd.f32 0.81, %v1705_v40  ;;  %7991 = vst [vmem:[#allocation23_spill] sm:$0xff] %v4476_v14 }
  0x1e   : > { %406 = vrot.lane.b32.xlu1 %v4305_v6, %s4225_s27  ;;  %v4308_v7 = vld [vmem:[#allocation3 + $0x10] sm:$0x3f]  ;;  %v676_v20 = vrot.slane %v4305_v6, 7  ;;  %v751_v22 = vrot.slane %v4305_v6, 6  ;;  %v4378_v25 = vrot.slane %v4305_v6, 2  ;;  %v4388_v29 = vrot.slane %v4305_v6, 1 }
  0x1f   : > { %7972 = vst [vmem:[#allocation4_spill] sm:$0xff] %v4308_v7  ;;  %v825_v36 = vrot.slane %v4305_v6, 5  ;;  %3359 = vrsqrt.f32 %v1720_v35  ;;  %v1765_v56 = vadd.f32 0.81, %v1762_v44  ;;  %v4460_v58 = vrot.slane %v4308_v7, 2  ;;  %7994 = vst [vmem:[#allocation26_spill] sm:$0xff] %v4487_v23 }
  0x20   : > { %7977 = vst [vmem:[#allocation9_spill] sm:$0xff] %v4378_v25  ;;  %7978 = vst [vmem:[#allocation10_spill] sm:$0xff] %v4388_v29  ;;  %v4396_v32 = vsel %vm672_vm2, %v674_v26, %v676_v20  ;;  %v4399_v33 = vsel %vm747_vm3, %v749_v30, %v751_v22  ;;  %v4412_v38 = vsel %vm467_vm0, %v469_v13, %v4378_v25  ;;  %3361 = vrsqrt.f32 %v1777_v39 }
  0x21   : > { %895 = vrot.lane.b32.xlu0 %v4285_v1, %s4226_s8  ;;  %7979 = vst [vmem:[#allocation11_spill] sm:$0xff] %v4396_v32  ;;  %7980 = vst [vmem:[#allocation12_spill] sm:$0xff] %v4399_v33  ;;  %v4403_v34 = vsub.f32 %v4305_v6, %v4396_v32  ;;  %v4408_v37 = vsub.f32 %v4305_v6, %v4399_v33  ;;  %v4418_v41 = vsel %vm532_vm1, %v543_v17, %v4388_v29 }
  0x22   : > { %412 = vrot.lane.b32.xlu1 %v4308_v7, %s4225_s27  ;;  %7981 = vst [vmem:[#allocation13_spill] sm:$0xff] %v4412_v38  ;;  %7982 = vst [vmem:[#allocation14_spill] sm:$0xff] %v4418_v41  ;;  %v4422_v42 = vsub.f32 %v4287_v2, %v4412_v38  ;;  %v4432_v46 = vsub.f32 %v4287_v2, %v4418_v41  ;;  %v4443_v50 = vsel %vm812_vm4, %v7846_v45, %v825_v36 }
  0x23   : > { %v1821_v49 = vmul.f32 %v4403_v34, %v4403_v34  ;;  %7985 = vst [vmem:[#allocation17_spill] sm:$0xff] %v4443_v50  ;;  %v1878_v51 = vmul.f32 %v4408_v37, %v4408_v37  ;;  %7988 = vst [vmem:[#allocation20_spill] sm:$0xff] %v4460_v58  ;;  %v687_v59 = vrot.slane %v4308_v7, 7  ;;  %v4464_v61 = vrot.slane %v4308_v7, 1 }
  0x24   : > { %v1706_v54 = vmul.f32 %v4422_v42, %v4422_v42  ;;  %v1763_v57 = vmul.f32 %v4432_v46, %v4432_v46  ;;  %v762_v63 = vrot.slane %v4308_v7, 6  ;;  %v4470_v5 = vsub.f32 %v4305_v6, %v4443_v50 }
  0x25   : > { %899 = vrot.lane.b32.xlu0 %v4305_v6, %s4226_s8  ;;  %v1824_v60 = vadd.f32 0.81, %v1821_v49  ;;  %7989 = vst [vmem:[#allocation21_spill] sm:$0xff] %v4464_v61  ;;  %v1881_v4 = vadd.f32 0.81, %v1878_v51  ;;  %v836_v11 = vrot.slane %v4308_v7, 5  ;;  %3363 = vrsqrt.f32 %v1708_v53 }
  0x26   : > { %897 = vrot.lane.b32.xlu1 %v4287_v2, %s4226_s8  ;;  %7990 = vst [vmem:[#allocation22_spill] sm:$0xff] %v4470_v5  ;;  %v1709_v13 = vadd.f32 0.81, %v1706_v54  ;;  %v7845_v17 = vrot.slane %v4300_v3, 5  ;;  %3365 = vrsqrt.f32 %v1765_v56  ;;  %v1766_v18 = vadd.f32 0.81, %v1763_v57 }
  0x27   : > { %v4481_v20 = vsub.f32 %v4287_v2, %v4455_v55  ;;  %v4484_v22 = vsel %vm672_vm2, %v685_v62, %v687_v59  ;;  %3367 = vrsqrt.f32 %v1824_v60  ;;  %v4490_v26 = vsel %vm747_vm3, %v760_v9, %v762_v63 }
  0x28   : > { %7993 = vst [vmem:[#allocation25_spill] sm:$0xff] %v4484_v22  ;;  %7995 = vst [vmem:[#allocation27_spill] sm:$0xff] %v4490_v26  ;;  %v4494_v27 = vsub.f32 %v4308_v7, %v4484_v22  ;;  %3369 = vrsqrt.f32 %v1881_v4  ;;  %v1935_v30 = vmul.f32 %v4470_v5, %v4470_v5  ;;  %v4501_v35 = vsel %vm812_vm4, %v7845_v17, %v836_v11 }
  0x29   : > { %903 = vrot.lane.b32.xlu0 %v4300_v3, %s4226_s8  ;;  %7992 = vst [vmem:[#allocation24_spill] sm:$0xff] %v4481_v20  ;;  %7996 = vst [vmem:[#allocation28_spill] sm:$0xff] %v4501_v35  ;;  %v4505_v36 = vsub.f32 %v4308_v7, %v4490_v26  ;;  %3371 = vrsqrt.f32 %v1709_v13  ;;  %v1820_v39 = vmul.f32 %v4476_v14, %v4476_v14  ;;  %v3360_v49 = vpop.eup %3359  ;;  %v431_v57 = vrot.slane %v4300_v3, 3 }
  0x2a   : > { %901 = vrot.lane.b32.xlu1 %v4283_v0, %s4226_s8  ;;  %v4511_v40 = vsub.f32 %v4308_v7, %v4501_v35  ;;  %v4517_v44 = vsel %vm467_vm0, %v480_v8, %v4460_v58  ;;  %3373 = vrsqrt.f32 %v1766_v18  ;;  %v1877_v51 = vmul.f32 %v4481_v20, %v4481_v20  ;;  %v3362_v56 = vpop.eup %3361 }
  0x2b   : > { %7998 = vst [vmem:[#allocation30_spill] sm:$0xff] %v4517_v44  ;;  %v4525_v53 = vsel %vm532_vm1, %v554_v10, %v4464_v61  ;;  %v4529_v54 = vsub.f32 %v4300_v3, %v4517_v44  ;;  %v4533_v8 = vrot.slane %v4283_v0, 6  ;;  %v1833_v59 = vmul.f32 %v4494_v27, %v4494_v27 }
  0x2c   : > { %7997 = vst [vmem:[#allocation29_spill] sm:$0xff] %v4511_v40  ;;  %7999 = vst [vmem:[#allocation31_spill] sm:$0xff] %v4525_v53  ;;  %v4539_v60 = vsub.f32 %v4300_v3, %v4525_v53  ;;  %v4542_v10 = vrot.slane %v4283_v0, 5  ;;  %v419_v63 = vrot.slane %v4287_v2, 3  ;;  %v1938_v4 = vadd.f32 0.81, %v1935_v30 }
  0x2d   : > { %1281 = vrot.lane.b32.xlu0 %v4285_v1, %s4227_s9  ;;  %8000 = vst [vmem:[#allocation32_spill] sm:$0xff] %v4533_v8  ;;  %v1890_v11 = vmul.f32 %v4505_v36, %v4505_v36  ;;  %v418_v13 = vrot.slane %v4285_v1, 3  ;;  %v421_v18 = vrot.slane %v4305_v6, 3  ;;  %v1823_v17 = vadd.f32 0.81, %v1820_v39 }
  0x2e   : > { %905 = vrot.lane.b32.xlu1 %v4308_v7, %s4226_s8  ;;  %8001 = vst [vmem:[#allocation33_spill] sm:$0xff] %v4539_v60  ;;  %8002 = vst [vmem:[#allocation34_spill] sm:$0xff] %v4542_v10  ;;  %v1947_v45 = vmul.f32 %v4511_v40, %v4511_v40  ;;  %v1880_v47 = vadd.f32 0.81, %v1877_v51  ;;  %v4553_v5 = vsel %vm672_vm2, %v4487_v23, %v685_v62  ;;  %v1836_v53 = vadd.f32 0.81, %v1833_v59 }
  0x2f   : > { %8003 = vst [vmem:[#allocation35_spill] sm:$0xff] %v4553_v5  ;;  %v4557_v20 = vsel %vm747_vm3, %v4533_v8, %v760_v9  ;;  %v1718_v30 = vmul.f32 %v4529_v54, %v4529_v54  ;;  %v3364_v14 = vpop.eup %3363  ;;  %v1775_v39 = vmul.f32 %v4539_v60, %v4539_v60  ;;  %v4565_v40 = vsub.f32 %v4300_v3, %v4553_v5 }
  0x30   : > { %8004 = vst [vmem:[#allocation36_spill] sm:$0xff] %v4557_v20  ;;  %v4569_v62 = vsub.f32 %v4300_v3, %v4557_v20  ;;  %v3366_v51 = vpop.eup %3365  ;;  %v4572_v9 = vrot.slane %v4285_v1, 5  ;;  %3375 = vrsqrt.f32 %v1938_v4  ;;  %v1893_v44 = vadd.f32 0.81, %v1890_v11 }
  0x31   : > { %1285 = vrot.lane.b32.xlu0 %v4305_v6, %s4227_s9  ;;  %8005 = vst [vmem:[#allocation37_spill] sm:$0xff] %v4565_v40  ;;  %v433_v35 = vrot.slane %v4308_v7, 3  ;;  %v3368_v59 = vpop.eup %3367  ;;  %v8008_v26 = vrot.slane %v4283_v0, 3  ;;  %v4581_v5 = vsel %vm417_vm5, %v418_v13, %v419_v63  ;;  %3377 = vrsqrt.f32 %v1823_v17 }
  0x32   : > { %1283 = vrot.lane.b32.xlu1 %v4287_v2, %s4227_s9  ;;  %8006 = vst [vmem:[#allocation38_spill] sm:$0xff] %v4569_v62  ;;  %8007 = vst [vmem:[#allocation39_spill] sm:$0xff] %v4572_v9  ;;  %v1950_v20 = vadd.f32 0.81, %v1947_v45  ;;  %v3370_v61 = vpop.eup %3369  ;;  %v4584_v58 = vsel %vm417_vm5, %v419_v63, %v421_v18  ;;  %v8012_v4 = vrot.slane %v4287_v2, 5  ;;  %3379 = vrsqrt.f32 %v1880_v47 }
  0x33   : > { %v4578_v22 = vsel %vm417_vm5, %v8008_v26, %v431_v57  ;;  %8010 = vst [vmem:[#allocation41_spill] sm:$0xff] %v4581_v5  ;;  %8011 = vst [vmem:[#allocation42_spill] sm:$0xff] %v4584_v58  ;;  %v3372_v60 = vpop.eup %3371  ;;  %3381 = vrsqrt.f32 %v1836_v53  ;;  %v1778_v26 = vadd.f32 0.81, %v1775_v39  ;;  %v1832_v13 = vmul.f32 %v4565_v40, %v4565_v40 }
  0x34   : > { %8009 = vst [vmem:[#allocation40_spill] sm:$0xff] %v4578_v22  ;;  %v4590_v11 = vsel %vm812_vm4, %v4572_v9, %v8012_v4  ;;  %v1889_v45 = vmul.f32 %v4569_v62, %v4569_v62  ;;  %v3374_v17 = vpop.eup %3373  ;;  %v4597_v63 = vmul.f32 %v3360_v49, %v4359_v16  ;;  %3383 = vrsqrt.f32 %v1893_v44 }
  0x35   : > { %1289 = vrot.lane.b32.xlu0 %v4300_v3, %s4227_s9  ;;  %8013 = vst [vmem:[#allocation43_spill] sm:$0xff] %v4590_v11  ;;  %v4600_v18 = vsel %vm417_vm5, %v431_v57, %v433_v35  ;;  %v8016_v47 = vrot.slane %v4300_v3, 5  ;;  %v4612_v39 = vmul.f32 %v3364_v14, %v4385_v28  ;;  %v4615_v4 = vmul.f32 %v3366_v51, %v4393_v31 }
  0x36   : > { %1287 = vrot.lane.b32.xlu1 %v4283_v0, %s4227_s9  ;;  %8014 = vst [vmem:[#allocation44_spill] sm:$0xff] %v4597_v63  ;;  %8015 = vst [vmem:[#allocation45_spill] sm:$0xff] %v4600_v18  ;;  %3385 = vrsqrt.f32 %v1950_v20  ;;  %v4618_v16 = vmul.f32 %v3368_v59, %v4403_v34  ;;  %v4621_v35 = vmul.f32 %v3370_v61, %v4408_v37  ;;  %v1835_v28 = vadd.f32 0.81, %v1832_v13 }
  0x37   : > { %v4606_v53 = vsel %vm812_vm4, %v4542_v10, %v8016_v47  ;;  %8019 = vst [vmem:[#allocation48_spill] sm:$0xff] %v4612_v39  ;;  %8020 = vst [vmem:[#allocation49_spill] sm:$0xff] %v4615_v4  ;;  %v4624_v44 = vmul.f32 %v3372_v60, %v4422_v42  ;;  %v1892_v31 = vadd.f32 0.81, %v1889_v45 }
  0x38   : > { %8017 = vst [vmem:[#allocation46_spill] sm:$0xff] %v4606_v53  ;;  %8021 = vst [vmem:[#allocation50_spill] sm:$0xff] %v4618_v16 }
  0x39   : > { %1984 = vrot.lane.b32.xlu0 %v4285_v1, %s4228_s10  ;;  %8022 = vst [vmem:[#allocation51_spill] sm:$0xff] %v4621_v35  ;;  %8023 = vst [vmem:[#allocation52_spill] sm:$0xff] %v4624_v44 }
  0x3a   : > { %1291 = vrot.lane.b32.xlu1 %v4308_v7, %s4227_s9  ;;  %v4653_v57 = vpop.eup %3375 }
  0x3b   : > { %8025 = vst [vmem:[#allocation54_spill] sm:$0xff] %v4653_v57 }
  0x3d   : > { %1988 = vrot.lane.b32.xlu0 %v4305_v6, %s4228_s10 }
  0x3e   : > { %1986 = vrot.lane.b32.xlu1 %v4287_v2, %s4228_s10 }
  0x41   : > { %1992 = vrot.lane.b32.xlu0 %v4300_v3, %s4228_s10 }
  0x42   : > { %1990 = vrot.lane.b32.xlu1 %v4283_v0, %s4228_s10 }
  0x45   : > { %2370 = vrot.lane.b32.xlu0 %v4285_v1, %s4229_s11 }
  0x46   : > { %1994 = vrot.lane.b32.xlu1 %v4308_v7, %s4228_s10 }
  0x49   : > { %2374 = vrot.lane.b32.xlu0 %v4305_v6, %s4229_s11 }
  0x4a   : > { %2372 = vrot.lane.b32.xlu1 %v4287_v2, %s4229_s11 }
  0x4d   : > { %2378 = vrot.lane.b32.xlu0 %v4300_v3, %s4229_s11 }
  0x4e   : > { %2376 = vrot.lane.b32.xlu1 %v4283_v0, %s4229_s11 }
  0x51   : > { %2756 = vrot.lane.b32.xlu0 %v4285_v1, %s4230_s12 }
  0x52   : > { %2380 = vrot.lane.b32.xlu1 %v4308_v7, %s4229_s11 }
  0x55   : > { %2760 = vrot.lane.b32.xlu0 %v4305_v6, %s4230_s12 }
  0x56   : > { %2758 = vrot.lane.b32.xlu1 %v4287_v2, %s4230_s12 }
  0x59   : > { %2764 = vrot.lane.b32.xlu0 %v4300_v3, %s4230_s12 }
  0x5a   : > { %2762 = vrot.lane.b32.xlu1 %v4283_v0, %s4230_s12 }
  0x5e   : > { %2766 = vrot.lane.b32.xlu1 %v4308_v7, %s4230_s12  ;;  %v1721_v7 = vadd.f32 0.81, %v1718_v30  ;;  %v4609_v30 = vmul.f32 %v3362_v56, %v4365_v19  ;;  %v4627_v56 = vmul.f32 %v3374_v17, %v4432_v46 }
  0x60   : > { %8018 = vst [vmem:[#allocation47_spill] sm:$0xff] %v4609_v30  ;;  %3387 = vrsqrt.f32 %v1721_v7  ;;  %8024 = vst [vmem:[#allocation53_spill] sm:$0xff] %v4627_v56 }
  0x61   : > { %3389 = vrsqrt.f32 %v1778_v26  ;;  %v4663_v26 = vpop.eup %3377 }
  0x62   : > { %8026 = vst [vmem:[#allocation55_spill] sm:$0xff] %v4663_v26  ;;  %3391 = vrsqrt.f32 %v1835_v28  ;;  %v4671_v47 = vpop.eup %3379 }
  0x63   : > { %8027 = vst [vmem:[#allocation56_spill] sm:$0xff] %v4671_v47  ;;  %v3382_v56 = vpop.eup %3381  ;;  %3393 = vrsqrt.f32 %v1892_v31 }
  0x64   : > { %v4681_v62 = vpop.eup %3383 }
  0x86   : > { %v409_v49 = vpop.permute.xlu1 %408 }
  0x87   : > { %v403_v19 = vpop.permute.xlu0 %402  ;;  %v4630_v14 = vsub.f32 %v409_v49, %v4578_v22  ;;  %v4633_v34 = vsub.f32 %v409_v49, %v4348_v12  ;;  %v4636_v37 = vsub.f32 %v409_v49, %v4355_v15  ;;  %v4639_v42 = vsub.f32 %v409_v49, %v4283_v0 }
  0x88   : > { %v4642_v7 = vsub.f32 %v409_v49, %v4487_v23  ;;  %v4645_v46 = vsub.f32 %v409_v49, %v4533_v8  ;;  %v4648_v61 = vsub.f32 %v409_v49, %v4542_v10  ;;  %v4651_v20 = vsub.f32 %v403_v19, %v4581_v5 }
  0x89   : > { %v447_v60 = vmul.f32 %v4630_v14, %v4630_v14  ;;  %v502_v0 = vmul.f32 %v4633_v34, %v4633_v34  ;;  %v576_v51 = vmul.f32 %v4636_v37, %v4636_v37  ;;  %v633_v59 = vmul.f32 %v4639_v42, %v4639_v42 }
  0x8a   : > { %v707_v13 = vmul.f32 %v4642_v7, %v4642_v7  ;;  %v782_v45 = vmul.f32 %v4645_v46, %v4645_v46  ;;  %v856_v17 = vmul.f32 %v4648_v61, %v4648_v61  ;;  %v4674_v16 = vsub.f32 %v403_v19, %v4369_v21 }
  0x8b   : > { %v449_v49 = vadd.f32 0.81, %v447_v60  ;;  %v505_v57 = vadd.f32 0.81, %v502_v0  ;;  %v579_v35 = vadd.f32 0.81, %v576_v51  ;;  %v439_v4 = vmul.f32 %v4651_v20, %v4651_v20  ;;  %v4685_v0 = vpop.eup %3385 }
  0x8c   : > { %v636_v26 = vadd.f32 0.81, %v633_v59  ;;  %v4679_v30 = vsub.f32 %v403_v19, %v4375_v24  ;;  %v710_v28 = vadd.f32 0.81, %v707_v13  ;;  %v785_v47 = vadd.f32 0.81, %v782_v45  ;;  %v4695_v31 = vpop.eup %3387 }
  0x8d   : > { %3395 = vrsqrt.f32 %v449_v49  ;;  %v490_v60 = vmul.f32 %v4674_v16, %v4674_v16  ;;  %8028 = vst [vmem:[#allocation57_spill] sm:$0xff] %v4685_v0  ;;  %v4690_v59 = vsub.f32 %v403_v19, %v4285_v1  ;;  %v4693_v40 = vsub.f32 %v403_v19, %v4425_v43 }
  0x8e   : > { %3397 = vrsqrt.f32 %v505_v57  ;;  %v564_v51 = vmul.f32 %v4679_v30, %v4679_v30  ;;  %v859_v13 = vadd.f32 0.81, %v856_v17  ;;  %v4698_v45 = vsub.f32 %v403_v19, %v4436_v48  ;;  %v4703_v57 = vpop.eup %3389 }
  0x8f   : > { %3399 = vrsqrt.f32 %v579_v35  ;;  %v4701_v49 = vsub.f32 %v403_v19, %v4572_v9  ;;  %v441_v0 = vadd.f32 0.81, %v439_v4  ;;  %v621_v1 = vmul.f32 %v4690_v59, %v4690_v59 }
  0x90   : > { %3401 = vrsqrt.f32 %v636_v26  ;;  %v695_v39 = vmul.f32 %v4693_v40, %v4693_v40  ;;  %v407_v63 = vpop.permute.xlu1 %406  ;;  %v493_v35 = vadd.f32 0.81, %v490_v60  ;;  %v770_v17 = vmul.f32 %v4698_v45, %v4698_v45  ;;  %v4721_v60 = vpop.eup %3391 }
  0x91   : > { %3403 = vrsqrt.f32 %v710_v28  ;;  %v4712_v44 = vsub.f32 %v407_v63, %v4378_v25  ;;  %v567_v19 = vadd.f32 0.81, %v564_v51  ;;  %v844_v4 = vmul.f32 %v4701_v49, %v4701_v49  ;;  %8029 = vst [vmem:[#allocation58_spill] sm:$0xff] %v4721_v60 }
  0x92   : > { %3405 = vrsqrt.f32 %v785_v47  ;;  %v4717_v26 = vsub.f32 %v407_v63, %v4388_v29  ;;  %v624_v10 = vadd.f32 0.81, %v621_v1  ;;  %v698_v8 = vadd.f32 0.81, %v695_v39  ;;  %v4731_v29 = vpop.permute.xlu0 %404 }
  0x93   : > { %3407 = vrsqrt.f32 %v859_v13  ;;  %v492_v28 = vmul.f32 %v4712_v44, %v4712_v44  ;;  %v4726_v47 = vsub.f32 %v407_v63, %v4305_v6  ;;  %v4729_v51 = vsub.f32 %v407_v63, %v4396_v32 }
  0x94   : > { %3409 = vrsqrt.f32 %v441_v0  ;;  %v566_v25 = vmul.f32 %v4717_v26, %v4717_v26  ;;  %v773_v13 = vadd.f32 0.81, %v770_v17  ;;  %v4734_v39 = vsub.f32 %v407_v63, %v4399_v33  ;;  %v4739_v0 = vpop.eup %3393 }
  0x95   : > { %3411 = vrsqrt.f32 %v493_v35  ;;  %v4737_v1 = vsub.f32 %v407_v63, %v4443_v50  ;;  %8030 = vst [vmem:[#allocation59_spill] sm:$0xff] %v4739_v0  ;;  %v847_v60 = vadd.f32 0.81, %v844_v4  ;;  %v623_v6 = vmul.f32 %v4726_v47, %v4726_v47 }
  0x96   : > { %3413 = vrsqrt.f32 %v567_v19  ;;  %v697_v32 = vmul.f32 %v4729_v51, %v4729_v51  ;;  %v772_v35 = vmul.f32 %v4734_v39, %v4734_v39  ;;  %v4751_v63 = vsub.f32 %v4731_v29, %v4584_v58 }
  0x97   : > { %v3396_v23 = vpop.eup %3395  ;;  %3415 = vrsqrt.f32 %v624_v10  ;;  %v846_v17 = vmul.f32 %v4737_v1, %v4737_v1  ;;  %v495_v4 = vadd.f32 0.81, %v492_v28  ;;  %v569_v0 = vadd.f32 0.81, %v566_v25 }
  0x98   : > { %v3398_v19 = vpop.eup %3397  ;;  %3417 = vrsqrt.f32 %v698_v8  ;;  %v4754_v50 = vmul.f32 %v3382_v56, %v4494_v27  ;;  %v453_v10 = vmul.f32 %v3396_v23, %v4630_v14  ;;  %v626_v15 = vadd.f32 0.81, %v623_v6 }
  0x99   : > { %v3400_v33 = vpop.eup %3399  ;;  %3419 = vrsqrt.f32 %v773_v13  ;;  %v700_v12 = vadd.f32 0.81, %v697_v32  ;;  %v511_v9 = vmul.f32 %v3398_v19, %v4633_v34  ;;  %v440_v48 = vmul.f32 %v4751_v63, %v4751_v63 }
  0x9a   : > { %8031 = vst [vmem:[#allocation60_spill] sm:$0xff] %v4754_v50  ;;  %v3402_v22 = vpop.eup %3401  ;;  %3421 = vrsqrt.f32 %v847_v60  ;;  %v4762_v8 = vsub.f32 %v4731_v29, %v4412_v38  ;;  %v775_v27 = vadd.f32 0.81, %v772_v35  ;;  %v849_v56 = vadd.f32 0.81, %v846_v17 }
  0x9b   : > { %v3404_v25 = vpop.eup %3403  ;;  %v4766_v23 = vsub.f32 %v4731_v29, %v4418_v41  ;;  %v4770_v32 = vsub.f32 %v4731_v29, %v4287_v2  ;;  %v585_v34 = vmul.f32 %v3400_v33, %v4636_v37  ;;  %v642_v28 = vmul.f32 %v3402_v22, %v4639_v42 }
  0x9c   : > { %v3406_v14 = vpop.eup %3405  ;;  %3423 = vrsqrt.f32 %v495_v4  ;;  %v491_v60 = vmul.f32 %v4762_v8, %v4762_v8  ;;  %v716_v6 = vmul.f32 %v3404_v25, %v4642_v7  ;;  %v442_v33 = vadd.f32 0.81, %v440_v48 }
  0x9d   : > { %v3408_v13 = vpop.eup %3407  ;;  %3425 = vrsqrt.f32 %v569_v0  ;;  %v565_v35 = vmul.f32 %v4766_v23, %v4766_v23  ;;  %v622_v2 = vmul.f32 %v4770_v32, %v4770_v32  ;;  %v791_v19 = vmul.f32 %v3406_v14, %v4645_v46 }
  0x9e   : > { %v3410_v17 = vpop.eup %3409  ;;  %3427 = vrsqrt.f32 %v626_v15  ;;  %v4784_v22 = vsub.f32 %v4731_v29, %v4449_v52  ;;  %v865_v42 = vmul.f32 %v3408_v13, %v4648_v61  ;;  %v494_v0 = vadd.f32 0.81, %v491_v60 }
  0x9f   : > { %v3412_v37 = vpop.eup %3411  ;;  %v445_v7 = vmul.f32 %v3410_v17, %v4651_v20  ;;  %3429 = vrsqrt.f32 %v700_v12  ;;  %v568_v50 = vadd.f32 0.81, %v565_v35  ;;  %v625_v43 = vadd.f32 0.81, %v622_v2 }
  0xa0   : > { %v3414_v4 = vpop.eup %3413  ;;  %v499_v25 = vmul.f32 %v3412_v37, %v4674_v16  ;;  %3431 = vrsqrt.f32 %v775_v27  ;;  %v696_v14 = vmul.f32 %v4784_v22, %v4784_v22  ;;  %v4795_v12 = vsub.f32 %v4731_v29, %v4455_v55 }
  0xa1   : > { %v3416_v46 = vpop.eup %3415  ;;  %v455_v15 = vsub.f32 %v445_v7, %v453_v10  ;;  %v573_v48 = vmul.f32 %v3414_v4, %v4679_v30  ;;  %3433 = vrsqrt.f32 %v849_v56 }
  0xa2   : > { %v3418_v24 = vpop.eup %3417  ;;  %v514_v61 = vsub.f32 %v499_v25, %v511_v9  ;;  %v630_v20 = vmul.f32 %v3416_v46, %v4690_v59  ;;  %3435 = vrsqrt.f32 %v442_v33  ;;  %v4825_v25 = vmul.f32 %v4681_v62, %v4505_v36 }
  0xa3   : > { %v3420_v16 = vpop.eup %3419  ;;  %v4797_v27 = vmul.f32 %v455_v15, %v455_v15  ;;  %v588_v60 = vsub.f32 %v573_v48, %v585_v34  ;;  %v704_v10 = vmul.f32 %v3418_v24, %v4693_v40  ;;  %3437 = vrsqrt.f32 %v494_v0 }
  0xa4   : > { %v3422_v30 = vpop.eup %3421  ;;  %v4800_v56 = vmul.f32 %v514_v61, %v514_v61  ;;  %v645_v13 = vsub.f32 %v630_v20, %v642_v28  ;;  %v779_v9 = vmul.f32 %v3420_v16, %v4698_v45  ;;  %3439 = vrsqrt.f32 %v568_v50  ;;  %8032 = vst [vmem:[#allocation61_spill] sm:$0xff] %v4825_v25 }
  0xa5   : > { %v459_v59 = vadd.f32 0.1, %v4797_v27  ;;  %v4804_v35 = vmul.f32 %v588_v60, %v588_v60  ;;  %v719_v2 = vsub.f32 %v704_v10, %v716_v6  ;;  %v853_v17 = vmul.f32 %v3422_v30, %v4701_v49 }
  0xa6   : > { %v3424_v33 = vpop.eup %3423  ;;  %v520_v34 = vadd.f32 0.1, %v4800_v56  ;;  %v4808_v37 = vmul.f32 %v645_v13, %v645_v13  ;;  %v794_v24 = vsub.f32 %v779_v9, %v791_v19  ;;  %3441 = vrsqrt.f32 %v625_v43 }
  0xa7   : > { %v3426_v40 = vpop.eup %3425  ;;  %3443 = vrcp.f32 %v459_v59  ;;  %v594_v28 = vadd.f32 0.1, %v4804_v35  ;;  %v4811_v45 = vmul.f32 %v719_v2, %v719_v2  ;;  %v868_v50 = vsub.f32 %v853_v17, %v865_v42  ;;  %v413_v42 = vpop.permute.xlu1 %412  ;;  %v8037_v59 = vld [vmem:[#allocation21_spill] sm:$0xff] }
  0xa8   : > { %v3428_v7 = vpop.eup %3427  ;;  %3445 = vrcp.f32 %v520_v34  ;;  %v651_v6 = vadd.f32 0.1, %v4808_v37  ;;  %v4814_v0 = vmul.f32 %v794_v24, %v794_v24  ;;  %v4818_v49 = vsub.f32 %v4731_v29, %v4590_v11  ;;  %v8034_v29 = vld [vmem:[#allocation33_spill] sm:$0xff]  ;;  %v4864_v34 = vpop.permute.xlu0 %410 }
  0xa9   : > { %v3430_v4 = vpop.eup %3429  ;;  %3447 = vrcp.f32 %v594_v28  ;;  %v725_v43 = vadd.f32 0.1, %v4811_v45  ;;  %v4821_v19 = vmul.f32 %v868_v50, %v868_v50  ;;  %v4830_v48 = vmul.f32 %v4695_v31, %v4529_v54  ;;  %v8036_v31 = vld [vmem:[#allocation20_spill] sm:$0xff] }
  0xaa   : > { %v3432_v46 = vpop.eup %3431  ;;  %3449 = vrcp.f32 %v651_v6  ;;  %v800_v15 = vadd.f32 0.1, %v4814_v0  ;;  %v4834_v61 = vmul.f32 %v4703_v57, %v8034_v29  ;;  %v699_v60 = vadd.f32 0.81, %v696_v14  ;;  %v8041_v29 = vld [vmem:[#allocation28_spill] sm:$0xff] }
  0xab   : > { %8033 = vst [vmem:[#allocation62_spill] sm:$0xff] %v4830_v48  ;;  %v3434_v20 = vpop.eup %3433  ;;  %3451 = vrcp.f32 %v725_v43  ;;  %v874_v16 = vadd.f32 0.1, %v4821_v19  ;;  %v771_v36 = vmul.f32 %v4795_v12, %v4795_v12  ;;  %v4840_v10 = vmul.f32 %v3424_v33, %v4712_v44 }
  0xac   : > { %8035 = vst [vmem:[#allocation33_spill] sm:$0xff] %v4834_v61  ;;  %v3436_v62 = vpop.eup %3435  ;;  %v4843_v30 = vmul.f32 %v3426_v40, %v4717_v26  ;;  %v845_v54 = vmul.f32 %v4818_v49, %v4818_v49  ;;  %v4848_v57 = vsub.f32 %v413_v42, %v8036_v31  ;;  %3453 = vrcp.f32 %v800_v15  ;;  %v8038_v40 = vld [vmem:[#allocation4_spill] sm:$0xff] }
  0xad   : > { %v3438_v13 = vpop.eup %3437  ;;  %v4851_v14 = vmul.f32 %v3428_v7, %v4726_v47  ;;  %v774_v9 = vadd.f32 0.81, %v771_v36  ;;  %v4854_v2 = vsub.f32 %v413_v42, %v8037_v59  ;;  %3455 = vrcp.f32 %v874_v16  ;;  %v8039_v7 = vld [vmem:[#allocation25_spill] sm:$0xff] }
  0xae   : > { %v3440_v44 = vpop.eup %3439  ;;  %v4857_v26 = vmul.f32 %v3430_v4, %v4729_v51  ;;  %v4860_v17 = vmul.f32 %v3432_v46, %v4734_v39  ;;  %v504_v33 = vmul.f32 %v4848_v57, %v4848_v57  ;;  %3457 = vrsqrt.f32 %v699_v60  ;;  %v8040_v39 = vld [vmem:[#allocation27_spill] sm:$0xff] }
  0xaf   : > { %v848_v47 = vadd.f32 0.81, %v845_v54  ;;  %v578_v24 = vmul.f32 %v4854_v2, %v4854_v2  ;;  %v4869_v28 = vsub.f32 %v413_v42, %v8038_v40  ;;  %3459 = vrsqrt.f32 %v774_v9 }
  0xb0   : > { %v3442_v50 = vpop.eup %3441  ;;  %v507_v51 = vadd.f32 0.81, %v504_v33  ;;  %v4872_v6 = vsub.f32 %v413_v42, %v8039_v7  ;;  %v4875_v4 = vsub.f32 %v413_v42, %v8040_v39  ;;  %v4880_v16 = vsub.f32 %v413_v42, %v8041_v29 }
  0xb1   : > { %v3444_v43 = vpop.eup %3443  ;;  %v581_v46 = vadd.f32 0.81, %v578_v24  ;;  %v635_v15 = vmul.f32 %v4869_v28, %v4869_v28  ;;  %v4884_v60 = vsub.f32 %v4864_v34, %v4600_v18  ;;  %v4887_v54 = vmul.f32 %v3434_v20, %v4737_v1 }
  0xb2   : > { %v3446_v36 = vpop.eup %3445  ;;  %3461 = vrsqrt.f32 %v507_v51  ;;  %v709_v9 = vmul.f32 %v4872_v6, %v4872_v6  ;;  %v784_v33 = vmul.f32 %v4875_v4, %v4875_v4  ;;  %v4894_v40 = vmul.f32 %v3436_v62, %v4751_v63 }
  0xb3   : > { %v3448_v24 = vpop.eup %3447  ;;  %3463 = vrsqrt.f32 %v581_v46  ;;  %v638_v42 = vadd.f32 0.81, %v635_v15  ;;  %v858_v25 = vmul.f32 %v4880_v16, %v4880_v16  ;;  %v448_v51 = vmul.f32 %v4884_v60, %v4884_v60 }
  0xb4   : > { %v3450_v61 = vpop.eup %3449  ;;  %3465 = vrsqrt.f32 %v848_v47  ;;  %v712_v1 = vadd.f32 0.81, %v709_v9  ;;  %v787_v20 = vadd.f32 0.81, %v784_v33  ;;  %v4901_v18 = vmul.f32 %v3446_v36, %v4800_v56 }
  0xb5   : > { %v3452_v48 = vpop.eup %3451  ;;  %v4904_v29 = vmul.f32 %v3448_v24, %v4804_v35  ;;  %3467 = vrsqrt.f32 %v638_v42  ;;  %v861_v63 = vadd.f32 0.81, %v858_v25  ;;  %v4907_v62 = vmul.f32 %v3450_v61, %v4808_v37  ;;  %v8042_v35 = vld [vmem:[#allocation30_spill] sm:$0xff]  ;;  %v8043_v61 = vld [vmem:[#allocation31_spill] sm:$0xff] }
  0xb6   : > { %v4910_v46 = vmul.f32 %v3438_v13, %v4762_v8  ;;  %3469 = vrsqrt.f32 %v712_v1  ;;  %v450_v47 = vadd.f32 0.81, %v448_v51  ;;  %v3454_v15 = vpop.eup %3453  ;;  %v4913_v9 = vmul.f32 %v3452_v48, %v4811_v45 }
  0xb7   : > { %v4916_v56 = vmul.f32 %v3440_v44, %v4766_v23  ;;  %3471 = vrsqrt.f32 %v787_v20  ;;  %v4920_v36 = vsub.f32 %v4864_v34, %v8042_v35  ;;  %v4922_v25 = vpop.eup %3455  ;;  %v4925_v37 = vmul.f32 %v3444_v43, %v4797_v27  ;;  %v4940_v27 = vpop.permute.xlu1 %897  ;;  %v8044_v20 = vld [vmem:[#allocation35_spill] sm:$0xff] }
  0xb8   : > { %v4928_v8 = vmul.f32 %v3442_v50, %v4770_v32  ;;  %3473 = vrsqrt.f32 %v861_v63  ;;  %v4932_v45 = vsub.f32 %v4864_v34, %v8043_v61  ;;  %v4934_v23 = vpop.eup %3457  ;;  %v4946_v50 = vmul.f32 %v3454_v15, %v4814_v0  ;;  %v8045_v63 = vld [vmem:[#allocation36_spill] sm:$0xff] }
  0xb9   : > { %3475 = vrsqrt.f32 %v450_v47  ;;  %v503_v44 = vmul.f32 %v4920_v36, %v4920_v36  ;;  %v4942_v43 = vpop.eup %3459  ;;  %v4952_v24 = vsub.f32 %v4864_v34, %v4300_v3  ;;  %v4957_v51 = vsub.f32 %v4864_v34, %v8044_v20 }
  0xba   : > { %v577_v33 = vmul.f32 %v4932_v45, %v4932_v45  ;;  %v4961_v47 = vsub.f32 %v4864_v34, %v8045_v63  ;;  %v4967_v3 = vsub.f32 %v4864_v34, %v4606_v53 }
  0xbb   : > { %v506_v1 = vadd.f32 0.81, %v503_v44  ;;  %v634_v32 = vmul.f32 %v4952_v24, %v4952_v24  ;;  %v4971_v44 = vsub.f32 %v4940_v27, %v4584_v58  ;;  %v708_v48 = vmul.f32 %v4957_v51, %v4957_v51 }
  0xbc   : > { %v3462_v0 = vpop.eup %3461  ;;  %v580_v15 = vadd.f32 0.81, %v577_v33  ;;  %v783_v33 = vmul.f32 %v4961_v47, %v4961_v47  ;;  %v857_v53 = vmul.f32 %v4967_v3, %v4967_v3 }
  0xbd   : > { %v3464_v42 = vpop.eup %3463  ;;  %v513_v13 = vmul.f32 %v3462_v0, %v4848_v57  ;;  %3477 = vrsqrt.f32 %v506_v1  ;;  %v637_v34 = vadd.f32 0.81, %v634_v32  ;;  %v711_v35 = vadd.f32 0.81, %v708_v48 }
  0xbe   : > { %v3466_v63 = vpop.eup %3465  ;;  %v587_v20 = vmul.f32 %v3464_v42, %v4854_v2  ;;  %3479 = vrsqrt.f32 %v580_v15  ;;  %v786_v57 = vadd.f32 0.81, %v783_v33  ;;  %v912_v1 = vmul.f32 %v4971_v44, %v4971_v44 }
  0xbf   : > { %v3468_v58 = vpop.eup %3467  ;;  %v516_v61 = vsub.f32 %v4840_v10, %v513_v13  ;;  %3481 = vrsqrt.f32 %v637_v34  ;;  %v860_v2 = vadd.f32 0.81, %v857_v53 }
  0xc0   : > { %v3470_v0 = vpop.eup %3469  ;;  %v590_v39 = vsub.f32 %v4843_v30, %v587_v20  ;;  %v644_v7 = vmul.f32 %v3468_v58, %v4869_v28  ;;  %3483 = vrsqrt.f32 %v711_v35  ;;  %v914_v59 = vadd.f32 0.81, %v912_v1 }
  0xc1   : > { %v3472_v42 = vpop.eup %3471  ;;  %v4986_v32 = vmul.f32 %v516_v61, %v516_v61  ;;  %v718_v15 = vmul.f32 %v3470_v0, %v4872_v6  ;;  %3485 = vrsqrt.f32 %v786_v57 }
  0xc2   : > { %v3474_v10 = vpop.eup %3473  ;;  %v4989_v48 = vmul.f32 %v590_v39, %v590_v39  ;;  %v647_v13 = vsub.f32 %v4851_v14, %v644_v7  ;;  %v793_v33 = vmul.f32 %v3472_v42, %v4875_v4  ;;  %3487 = vrsqrt.f32 %v860_v2 }
  0xc3   : > { %v3476_v30 = vpop.eup %3475  ;;  %v522_v58 = vadd.f32 0.1, %v4986_v32  ;;  %v721_v53 = vsub.f32 %v4857_v26, %v718_v15  ;;  %v867_v28 = vmul.f32 %v3474_v10, %v4880_v16  ;;  %v5006_v4 = vsub.f32 %v4940_v27, %v4412_v38 }
  0xc4   : > { %v596_v6 = vadd.f32 0.1, %v4989_v48  ;;  %v4997_v35 = vmul.f32 %v647_v13, %v647_v13  ;;  %v796_v39 = vsub.f32 %v4860_v17, %v793_v33  ;;  %v454_v61 = vmul.f32 %v3476_v30, %v4884_v60 }
  0xc5   : > { %3489 = vrcp.f32 %v522_v58  ;;  %v5001_v14 = vmul.f32 %v721_v53, %v721_v53  ;;  %v870_v7 = vsub.f32 %v4887_v54, %v867_v28  ;;  %v946_v54 = vmul.f32 %v5006_v4, %v5006_v4 }
  0xc6   : > { %3491 = vrcp.f32 %v596_v6  ;;  %v653_v26 = vadd.f32 0.1, %v4997_v35  ;;  %v5009_v16 = vmul.f32 %v796_v39, %v796_v39  ;;  %v456_v20 = vsub.f32 %v4894_v40, %v454_v61 }
  0xc7   : > { %v3478_v34 = vpop.eup %3477  ;;  %v727_v17 = vadd.f32 0.1, %v5001_v14  ;;  %v5013_v60 = vmul.f32 %v870_v7, %v870_v7  ;;  %3493 = vrsqrt.f32 %v914_v59  ;;  %v705_v40 = vmul.f32 %v4934_v23, %v4784_v22 }
  0xc8   : > { %v3480_v57 = vpop.eup %3479  ;;  %3495 = vrcp.f32 %v653_v26  ;;  %v802_v1 = vadd.f32 0.1, %v5009_v16  ;;  %v5018_v0 = vmul.f32 %v456_v20, %v456_v20  ;;  %v512_v2 = vmul.f32 %v3478_v34, %v4920_v36 }
  0xc9   : > { %3497 = vrcp.f32 %v727_v17  ;;  %v876_v42 = vadd.f32 0.1, %v5013_v60  ;;  %v586_v15 = vmul.f32 %v3480_v57, %v4932_v45  ;;  %v3482_v59 = vpop.eup %3481  ;;  %v780_v10 = vmul.f32 %v4942_v43, %v4795_v12 }
  0xca   : > { %3499 = vrcp.f32 %v802_v1  ;;  %v460_v13 = vadd.f32 0.1, %v5018_v0  ;;  %v515_v33 = vsub.f32 %v4910_v46, %v512_v2  ;;  %v3484_v30 = vpop.eup %3483  ;;  %v854_v36 = vmul.f32 %v3466_v63, %v4818_v49 }
  0xcb   : > { %3501 = vrcp.f32 %v876_v42  ;;  %v589_v22 = vsub.f32 %v4916_v56, %v586_v15  ;;  %v643_v23 = vmul.f32 %v3482_v59, %v4952_v24  ;;  %v3486_v58 = vpop.eup %3485  ;;  %v717_v45 = vmul.f32 %v3484_v30, %v4957_v51  ;;  %v5043_v56 = vld [vmem:[#allocation2 + $0x8] sm:$0xff] }
  0xcc   : > { %v5032_v53 = vmul.f32 %v515_v33, %v515_v33  ;;  %v949_v28 = vadd.f32 0.81, %v946_v54  ;;  %v5037_v12 = vsub.f32 %v4940_v27, %v4418_v41  ;;  %v3488_v43 = vpop.eup %3487  ;;  %v792_v63 = vmul.f32 %v3486_v58, %v4961_v47 }
  0xcd   : > { %v5039_v46 = vmul.f32 %v589_v22, %v589_v22  ;;  %v646_v49 = vsub.f32 %v4928_v8, %v643_v23  ;;  %v5047_v24 = vsub.f32 %v4940_v27, %v5043_v56  ;;  %3503 = vrcp.f32 %v460_v13 }
  0xce   : > { %v521_v51 = vadd.f32 0.1, %v5032_v53  ;;  %v720_v6 = vsub.f32 %v705_v40, %v717_v45  ;;  %v866_v39 = vmul.f32 %v3488_v43, %v4967_v3  ;;  %v5053_v7 = vmul.f32 %v4922_v25, %v4821_v19  ;;  %v5097_v43 = vpop.permute.xlu0 %895 }
  0xcf   : > { %v3490_v61 = vpop.eup %3489  ;;  %v595_v8 = vadd.f32 0.1, %v5039_v46  ;;  %v5056_v47 = vmul.f32 %v646_v49, %v646_v49  ;;  %v795_v26 = vsub.f32 %v780_v10, %v792_v63  ;;  %v1003_v54 = vmul.f32 %v5037_v12, %v5037_v12 }
  0xd0   : > { %v3492_v20 = vpop.eup %3491  ;;  %3505 = vrcp.f32 %v521_v51  ;;  %v5058_v34 = vmul.f32 %v720_v6, %v720_v6  ;;  %v869_v17 = vsub.f32 %v854_v36, %v866_v39  ;;  %v1060_v42 = vmul.f32 %v5047_v24, %v5047_v24 }
  0xd1   : > { %v3494_v57 = vpop.eup %3493  ;;  %3507 = vrcp.f32 %v595_v8  ;;  %v652_v19 = vadd.f32 0.1, %v5056_v47  ;;  %v5064_v25 = vmul.f32 %v795_v26, %v795_v26  ;;  %v5072_v59 = vmul.f32 %v3490_v61, %v4986_v32 }
  0xd2   : > { %v3496_v1 = vpop.eup %3495  ;;  %v726_v2 = vadd.f32 0.1, %v5058_v34  ;;  %v5067_v40 = vmul.f32 %v869_v17, %v869_v17  ;;  %3509 = vrsqrt.f32 %v949_v28  ;;  %v5075_v10 = vmul.f32 %v3492_v20, %v4989_v48 }
  0xd3   : > { %v3498_v15 = vpop.eup %3497  ;;  %3511 = vrcp.f32 %v652_v19  ;;  %v801_v13 = vadd.f32 0.1, %v5064_v25  ;;  %v5079_v30 = vmul.f32 %v3496_v1, %v4997_v35  ;;  %v1006_v22 = vadd.f32 0.81, %v1003_v54 }
  0xd4   : > { %v3500_v33 = vpop.eup %3499  ;;  %3513 = vrcp.f32 %v726_v2  ;;  %v875_v36 = vadd.f32 0.1, %v5067_v40  ;;  %v5084_v32 = vmul.f32 %v3498_v15, %v5001_v14  ;;  %v5088_v48 = vsub.f32 %v4940_v27, %v4449_v52 }
  0xd5   : > { %v3502_v23 = vpop.eup %3501  ;;  %3515 = vrcp.f32 %v801_v13  ;;  %v5091_v45 = vmul.f32 %v3500_v33, %v5009_v16  ;;  %v1063_v35 = vadd.f32 0.81, %v1060_v42  ;;  %v5095_v28 = vsub.f32 %v4940_v27, %v4455_v55 }
  0xd6   : > { %3517 = vrcp.f32 %v875_v36  ;;  %v536_v49 = vrot.slane %v5072_v59, 1  ;;  %v609_v14 = vrot.slane %v5075_v10, 2  ;;  %v5102_v63 = vmul.f32 %v3494_v57, %v4971_v44  ;;  %v8046_v57 = vld [vmem:[#allocation8_spill] sm:$0xff] }
  0xd7   : > { %v1117_v51 = vmul.f32 %v5088_v48, %v5088_v48  ;;  %v3504_v16 = vpop.eup %3503  ;;  %v666_v6 = vrot.slane %v5079_v30, 3  ;;  %v5108_v39 = vmul.f32 %v3502_v23, %v5013_v60  ;;  %3519 = vrsqrt.f32 %v1006_v22  ;;  %v5140_v30 = vld [vmem:[#allocation2] sm:$0xff]  ;;  %v8048_v23 = vld [vmem:[#allocation15_spill] sm:$0xff] }
  0xd8   : > { %v1174_v61 = vmul.f32 %v5095_v28, %v5095_v28  ;;  %v5114_v26 = vsub.f32 %v4940_v27, %v4590_v11  ;;  %v5118_v44 = vsub.f32 %v5097_v43, %v4581_v5  ;;  %v5122_v20 = vsub.f32 %v5097_v43, %v4369_v21  ;;  %8047 = vst [vmem:[#allocation4_spill] sm:$0xff] %v5140_v30 }
  0xd9   : > { %v1120_v8 = vadd.f32 0.81, %v1117_v51  ;;  %v741_v60 = vrot.slane %v5084_v32, 4  ;;  %3521 = vrsqrt.f32 %v1063_v35  ;;  %v5128_v19 = vsub.f32 %v5097_v43, %v8046_v57 }
  0xda   : > { %v3506_v17 = vpop.eup %3505  ;;  %v464_v1 = vmul.f32 %v3504_v16, %v5018_v0  ;;  %v1231_v42 = vmul.f32 %v5114_v26, %v5114_v26  ;;  %v911_v15 = vmul.f32 %v5118_v44, %v5118_v44  ;;  %v945_v33 = vmul.f32 %v5122_v20, %v5122_v20 }
  0xdb   : > { %v3508_v27 = vpop.eup %3507  ;;  %v527_v2 = vmul.f32 %v3506_v17, %v5032_v53  ;;  %v5144_v0 = vsub.f32 %v5097_v43, %v5140_v30  ;;  %3523 = vrsqrt.f32 %v1120_v8  ;;  %v1177_v22 = vadd.f32 0.81, %v1174_v61 }
  0xdc   : > { %v3510_v59 = vpop.eup %3509  ;;  %v601_v13 = vmul.f32 %v3508_v27, %v5039_v46  ;;  %v5148_v32 = vsub.f32 %v5097_v43, %v8048_v23  ;;  %v1234_v16 = vadd.f32 0.81, %v1231_v42  ;;  %v1002_v17 = vmul.f32 %v5128_v19, %v5128_v19 }
  0xdd   : > { %v3512_v53 = vpop.eup %3511  ;;  %v534_v36 = vrot.slane %v527_v2, 1  ;;  %v8049_v10 = vrot.slane %v4901_v18, 1  ;;  %v913_v2 = vadd.f32 0.81, %v911_v15  ;;  %v948_v23 = vadd.f32 0.81, %v945_v33 }
  0xde   : > { %v3514_v35 = vpop.eup %3513  ;;  %v607_v51 = vrot.slane %v601_v13, 2  ;;  %v658_v46 = vmul.f32 %v3512_v53, %v5056_v47  ;;  %v1059_v47 = vmul.f32 %v5144_v0, %v5144_v0  ;;  %v8050_v42 = vrot.slane %v4904_v29, 2 }
  0xdf   : > { %v3516_v27 = vpop.eup %3515  ;;  %v535_v58 = vsel %vm532_vm1, %v8049_v10, %v534_v36  ;;  %v537_v8 = vsel %vm532_vm1, %v534_v36, %v536_v49  ;;  %v732_v61 = vmul.f32 %v3514_v35, %v5058_v34  ;;  %v1005_v30 = vadd.f32 0.81, %v1002_v17 }
  0xe0   : > { %v3518_v54 = vpop.eup %3517  ;;  %v540_v3 = vadd.f32 %v535_v58, %v4925_v37  ;;  %v541_v13 = vadd.f32 %v537_v8, %v464_v1  ;;  %v608_v53 = vsel %vm467_vm0, %v8050_v42, %v607_v51  ;;  %v610_v18 = vsel %vm467_vm0, %v607_v51, %v609_v14 }
  0xe1   : > { %v664_v10 = vrot.slane %v658_v46, 3  ;;  %v807_v49 = vmul.f32 %v3516_v27, %v5064_v25  ;;  %v3520_v36 = vpop.eup %3519  ;;  %v739_v35 = vrot.slane %v732_v61, 4  ;;  %v8051_v37 = vrot.slane %v4907_v62, 3  ;;  %v902_v27 = vpop.permute.xlu1 %901 }
  0xe2   : > { %v613_v34 = vadd.f32 %v608_v53, %v540_v3  ;;  %v614_v15 = vadd.f32 %v610_v18, %v541_v13  ;;  %v5171_v29 = vmul.f32 %v3518_v54, %v5067_v40  ;;  %3525 = vrsqrt.f32 %v913_v2 }
  0xe3   : > { %v665_v58 = vsel %vm417_vm5, %v8051_v37, %v664_v10  ;;  %v667_v1 = vsel %vm417_vm5, %v664_v10, %v666_v6  ;;  %v3522_v33 = vpop.eup %3521  ;;  %v5174_v25 = vmul.f32 %v3510_v59, %v5006_v4  ;;  %3527 = vrsqrt.f32 %v1177_v22 }
  0xe4   : > { %v670_v14 = vadd.f32 %v665_v58, %v613_v34  ;;  %v671_v51 = vadd.f32 %v667_v1, %v614_v15  ;;  %v814_v3 = vrot.slane %v807_v49, 5  ;;  %3529 = vrsqrt.f32 %v948_v23  ;;  %v8061_v58 = vld [vmem:[#allocation26_spill] sm:$0xff] }
  0xe5   : > { %v1062_v46 = vadd.f32 0.81, %v1059_v47  ;;  %v1116_v62 = vmul.f32 %v5148_v32, %v5148_v32  ;;  %v8052_v17 = vrot.slane %v4913_v9, 4  ;;  %v742_v40 = vsel %vm737_vm6, %v739_v35, %v741_v60  ;;  %v5185_v4 = vpop.eup %3523  ;;  %v8053_v9 = vld [vmem:[#allocation16_spill] sm:$0xff]  ;;  %v8054_v60 = vld [vmem:[#allocation39_spill] sm:$0xff] }
  0xe6   : > { %v5183_v54 = vmul.f32 %v3520_v36, %v5037_v12  ;;  %3531 = vrsqrt.f32 %v1234_v16  ;;  %v5189_v22 = vmul.f32 %v3522_v33, %v5047_v24  ;;  %v5193_v61 = vsub.f32 %v5097_v43, %v8053_v9  ;;  %v8056_v24 = vld [vmem:[#allocation40_spill] sm:$0xff]  ;;  %v8059_v36 = vld [vmem:[#allocation6_spill] sm:$0xff] }
  0xe7   : > { %v740_v6 = vsel %vm737_vm6, %v8052_v17, %v739_v35  ;;  %3533 = vrsqrt.f32 %v1005_v30  ;;  %v1119_v23 = vadd.f32 0.81, %v1116_v62  ;;  %v5197_v12 = vsub.f32 %v5097_v43, %v8054_v60  ;;  %v8057_v30 = vld [vmem:[#allocation5_spill] sm:$0xff]  ;;  %v8062_v33 = vld [vmem:[#allocation32_spill] sm:$0xff] }
  0xe8   : > { %v745_v8 = vadd.f32 %v740_v6, %v670_v14  ;;  %3535 = vrsqrt.f32 %v1062_v46  ;;  %v5199_v16 = vadd.f32 %v742_v40, %v671_v51  ;;  %v8055_v2 = vrot.slane %v4946_v50, 5  ;;  %v900_v51 = vpop.permute.xlu0 %899 }
  0xe9   : > { %v5205_v47 = vsub.f32 %v902_v27, %v8056_v24  ;;  %v5208_v42 = vsub.f32 %v902_v27, %v8057_v30  ;;  %v8058_v53 = vrot.slane %v5091_v45, 5  ;;  %3537 = vrsqrt.f32 %v1119_v23  ;;  %v5226_v45 = vld [vmem:[#allocation3] sm:$0xff] }
  0xea   : > { %v815_v13 = vsel %vm812_vm4, %v8055_v2, %v814_v3  ;;  %v1173_v43 = vmul.f32 %v5193_v61, %v5193_v61  ;;  %v1230_v50 = vmul.f32 %v5197_v12, %v5197_v12  ;;  %v5224_v34 = vsub.f32 %v902_v27, %v8059_v36  ;;  %8060 = vst [vmem:[#allocation63_spill] sm:$0xff] %v5226_v45 }
  0xeb   : > { %v5213_v18 = vsel %vm812_vm4, %v814_v3, %v8058_v53  ;;  %v919_v10 = vmul.f32 %v5205_v47, %v5205_v47  ;;  %v957_v49 = vmul.f32 %v5208_v42, %v5208_v42  ;;  %v5229_v15 = vsub.f32 %v902_v27, %v5226_v45 }
  0xec   : > { %v1176_v35 = vadd.f32 0.81, %v1173_v43  ;;  %v1233_v37 = vadd.f32 0.81, %v1230_v50  ;;  %v5232_v1 = vsub.f32 %v902_v27, %v8061_v58  ;;  %v5235_v14 = vsub.f32 %v902_v27, %v8062_v33  ;;  %v3526_v3 = vpop.eup %3525 }
  0xed   : > { %v5237_v46 = vadd.f32 %v815_v13, %v745_v8  ;;  %v921_v62 = vadd.f32 0.81, %v919_v10  ;;  %v960_v17 = vadd.f32 0.81, %v957_v49  ;;  %v1014_v6 = vmul.f32 %v5224_v34, %v5224_v34  ;;  %v5241_v40 = vpop.eup %3527  ;;  %v8063_v13 = vld [vmem:[#allocation34_spill] sm:$0xff]  ;;  %v8064_v10 = vld [vmem:[#allocation9_spill] sm:$0xff] }
  0xee   : > { %3539 = vrsqrt.f32 %v1176_v35  ;;  %v1071_v23 = vmul.f32 %v5229_v15, %v5229_v15  ;;  %v1128_v2 = vmul.f32 %v5232_v1, %v5232_v1  ;;  %v1185_v53 = vmul.f32 %v5235_v14, %v5235_v14  ;;  %v3530_v43 = vpop.eup %3529 }
  0xef   : > { %3541 = vrsqrt.f32 %v1233_v37  ;;  %v1017_v8 = vadd.f32 0.81, %v1014_v6  ;;  %v5250_v50 = vsub.f32 %v902_v27, %v8063_v13  ;;  %v5253_v49 = vsub.f32 %v900_v51, %v8064_v10  ;;  %v8065_v13 = vld [vmem:[#allocation10_spill] sm:$0xff] }
  0xf0   : > { %v5255_v59 = vpop.eup %3531  ;;  %v5258_v35 = vmul.f32 %v3526_v3, %v5118_v44  ;;  %3543 = vrsqrt.f32 %v921_v62  ;;  %v1074_v33 = vadd.f32 0.81, %v1071_v23  ;;  %v1131_v58 = vadd.f32 0.81, %v1128_v2  ;;  %v5268_v44 = vld [vmem:[#allocation2 + $0x10] sm:$0x3f]  ;;  %v5277_v2 = vpop.permute.xlu1 %905 }
  0xf1   : > { %v3534_v45 = vpop.eup %3533  ;;  %3545 = vrsqrt.f32 %v960_v17  ;;  %v1188_v36 = vadd.f32 0.81, %v1185_v53  ;;  %v1242_v37 = vmul.f32 %v5250_v50, %v5250_v50  ;;  %v947_v27 = vmul.f32 %v5253_v49, %v5253_v49  ;;  %8066 = vst [vmem:[#allocation64_spill] sm:$0xff] %v5268_v44 }
  0xf2   : > { %v3536_v6 = vpop.eup %3535  ;;  %v954_v10 = vmul.f32 %v3530_v43, %v5122_v20  ;;  %3547 = vrsqrt.f32 %v1017_v8  ;;  %v5266_v30 = vsub.f32 %v900_v51, %v8065_v13  ;;  %v5271_v3 = vsub.f32 %v900_v51, %v5268_v44  ;;  %v8067_v44 = vld [vmem:[#allocation11_spill] sm:$0xff] }
  0xf3   : > { %v1011_v62 = vmul.f32 %v3534_v45, %v5128_v19  ;;  %v5275_v17 = vmul.f32 %v3536_v6, %v5144_v0  ;;  %3549 = vrsqrt.f32 %v1074_v33  ;;  %v1245_v23 = vadd.f32 0.81, %v1242_v37  ;;  %v3538_v53 = vpop.eup %3537  ;;  %v8068_v19 = vld [vmem:[#allocation12_spill] sm:$0xff]  ;;  %v8069_v45 = vld [vmem:[#allocation17_spill] sm:$0xff] }
  0xf4   : > { %3551 = vrsqrt.f32 %v1131_v58  ;;  %v950_v20 = vadd.f32 0.81, %v947_v27  ;;  %v1004_v43 = vmul.f32 %v5266_v30, %v5266_v30  ;;  %v1061_v8 = vmul.f32 %v5271_v3, %v5271_v3 }
  0xf5   : > { %3553 = vrsqrt.f32 %v1188_v36  ;;  %v5284_v13 = vsub.f32 %v900_v51, %v8067_v44  ;;  %v5287_v0 = vsub.f32 %v900_v51, %v8068_v19  ;;  %v5290_v33 = vsub.f32 %v900_v51, %v8069_v45 }
  0xf6   : > { %3555 = vrsqrt.f32 %v1245_v23  ;;  %v1007_v37 = vadd.f32 0.81, %v1004_v43  ;;  %v1064_v58 = vadd.f32 0.81, %v1061_v8  ;;  %v5294_v27 = vsub.f32 %v5277_v2, %v8036_v31  ;;  %v8070_v43 = vld [vmem:[#allocation21_spill] sm:$0xff] }
  0xf7   : > { %v1125_v6 = vmul.f32 %v3538_v53, %v5148_v32  ;;  %v1118_v36 = vmul.f32 %v5284_v13, %v5284_v13  ;;  %v1175_v44 = vmul.f32 %v5287_v0, %v5287_v0  ;;  %v1232_v19 = vmul.f32 %v5290_v33, %v5290_v33  ;;  %v5309_v31 = vld [vmem:[#allocation3 + $0x10] sm:$0x3f] }
  0xf8   : > { %v3540_v51 = vpop.eup %3539  ;;  %3557 = vrsqrt.f32 %v950_v20  ;;  %v959_v23 = vmul.f32 %v5294_v27, %v5294_v27  ;;  %v5307_v8 = vsub.f32 %v5277_v2, %v8070_v43  ;;  %8071 = vst [vmem:[#allocation65_spill] sm:$0xff] %v5309_v31  ;;  %v5313_v32 = vsub.f32 %v5277_v2, %v5309_v31 }
  0xf9   : > { %v3542_v53 = vpop.eup %3541  ;;  %v1182_v45 = vmul.f32 %v3540_v51, %v5193_v61  ;;  %3559 = vrsqrt.f32 %v1007_v37  ;;  %v1121_v24 = vadd.f32 0.81, %v1118_v36  ;;  %v1178_v60 = vadd.f32 0.81, %v1175_v44 }
  0xfa   : > { %v3544_v20 = vpop.eup %3543  ;;  %3561 = vrsqrt.f32 %v1064_v58  ;;  %v1235_v9 = vadd.f32 0.81, %v1232_v19  ;;  %v962_v57 = vadd.f32 0.81, %v959_v23  ;;  %v1016_v43 = vmul.f32 %v5307_v8, %v5307_v8  ;;  %v8072_v58 = vld [vmem:[#allocation25_spill] sm:$0xff] }
  0xfb   : > { %v3546_v21 = vpop.eup %3545  ;;  %v1239_v5 = vmul.f32 %v3542_v53, %v5197_v12  ;;  %v925_v11 = vmul.f32 %v3544_v20, %v5205_v47  ;;  %3563 = vrsqrt.f32 %v1121_v24  ;;  %v1073_v31 = vmul.f32 %v5313_v32, %v5313_v32  ;;  %v8073_v20 = vld [vmem:[#allocation27_spill] sm:$0xff] }
  0xfc   : > { %v3548_v61 = vpop.eup %3547  ;;  %v966_v37 = vmul.f32 %v3546_v21, %v5208_v42  ;;  %3565 = vrsqrt.f32 %v1178_v60  ;;  %v1019_v44 = vadd.f32 0.81, %v1016_v43  ;;  %v5325_v19 = vsub.f32 %v5277_v2, %v8072_v58 }
  0xfd   : > { %v3550_v36 = vpop.eup %3549  ;;  %v927_v51 = vsub.f32 %v5258_v35, %v925_v11  ;;  %v1023_v12 = vmul.f32 %v3548_v61, %v5224_v34  ;;  %3567 = vrsqrt.f32 %v1235_v9  ;;  %v1076_v47 = vadd.f32 0.81, %v1073_v31 }
  0xfe   : > { %v3552_v24 = vpop.eup %3551  ;;  %v969_v23 = vsub.f32 %v954_v10, %v966_v37  ;;  %v1080_v53 = vmul.f32 %v3550_v36, %v5229_v15  ;;  %3569 = vrsqrt.f32 %v962_v57  ;;  %v5332_v21 = vsub.f32 %v5277_v2, %v8073_v20 }
  0xff   : > { %v3554_v60 = vpop.eup %3553  ;;  %v5334_v42 = vmul.f32 %v927_v51, %v927_v51  ;;  %v1026_v43 = vsub.f32 %v1011_v62, %v1023_v12  ;;  %v1137_v58 = vmul.f32 %v3552_v24, %v5232_v1  ;;  %3571 = vrsqrt.f32 %v1019_v44 }
 0x100   : > { %v3556_v11 = vpop.eup %3555  ;;  %v5337_v34 = vmul.f32 %v969_v23, %v969_v23  ;;  %v1083_v31 = vsub.f32 %v5275_v17, %v1080_v53  ;;  %v1194_v9 = vmul.f32 %v3554_v60, %v5235_v14  ;;  %3573 = vrsqrt.f32 %v1076_v47 }
 0x101   : > { %v931_v57 = vadd.f32 0.1, %v5334_v42  ;;  %v5342_v15 = vmul.f32 %v1026_v43, %v1026_v43  ;;  %v1140_v10 = vsub.f32 %v1125_v6, %v1137_v58  ;;  %v1251_v35 = vmul.f32 %v3556_v11, %v5250_v50 }
 0x102   : > { %v3558_v61 = vpop.eup %3557  ;;  %v975_v62 = vadd.f32 0.1, %v5337_v34  ;;  %v5346_v1 = vmul.f32 %v1083_v31, %v1083_v31  ;;  %v1197_v37 = vsub.f32 %v1182_v45, %v1194_v9  ;;  %v1130_v44 = vmul.f32 %v5325_v19, %v5325_v19 }
 0x103   : > { %v3560_v17 = vpop.eup %3559  ;;  %3575 = vrcp.f32 %v931_v57  ;;  %v1032_v14 = vadd.f32 0.1, %v5342_v15  ;;  %v5351_v36 = vmul.f32 %v1140_v10, %v1140_v10  ;;  %v1254_v51 = vsub.f32 %v1239_v5, %v1251_v35  ;;  %v8076_v35 = vld [vmem:[#allocation28_spill] sm:$0xff] }
 0x104   : > { %v3562_v12 = vpop.eup %3561  ;;  %v5355_v50 = vmul.f32 %v5185_v4, %v5088_v48  ;;  %3577 = vrcp.f32 %v975_v62  ;;  %v1089_v6 = vadd.f32 0.1, %v5346_v1  ;;  %v5358_v58 = vmul.f32 %v1197_v37, %v1197_v37  ;;  %v5387_v37 = vpop.permute.xlu0 %903 }
 0x105   : > { %v3564_v45 = vpop.eup %3563  ;;  %v5362_v47 = vmul.f32 %v5241_v40, %v5095_v28  ;;  %3579 = vrcp.f32 %v1032_v14  ;;  %v1146_v24 = vadd.f32 0.1, %v5351_v36  ;;  %v5365_v23 = vmul.f32 %v1254_v51, %v1254_v51  ;;  %v8077_v14 = vld [vmem:[#allocation45_spill] sm:$0xff] }
 0x106   : > { %v3566_v5 = vpop.eup %3565  ;;  %v8074_v53 = vrot.slane %v5171_v29, 6  ;;  %v8075_v48 = vrot.slane %v5053_v7, 6  ;;  %3581 = vrcp.f32 %v1089_v6  ;;  %v1203_v60 = vadd.f32 0.1, %v5358_v58  ;;  %v8078_v6 = vld [vmem:[#allocation30_spill] sm:$0xff] }
 0x107   : > { %v1133_v43 = vadd.f32 0.81, %v1130_v44  ;;  %v3568_v11 = vpop.eup %3567  ;;  %v5375_v28 = vmul.f32 %v5255_v59, %v5114_v26  ;;  %v956_v31 = vmul.f32 %v3558_v61, %v5253_v49  ;;  %v1187_v9 = vmul.f32 %v5332_v21, %v5332_v21 }
 0x108   : > { %v888_v4 = vsel %vm747_vm3, %v8075_v48, %v8074_v53  ;;  %v3570_v57 = vpop.eup %3569  ;;  %3583 = vrcp.f32 %v1146_v24  ;;  %v1013_v7 = vmul.f32 %v3560_v17, %v5266_v30  ;;  %v1070_v10 = vmul.f32 %v3562_v12, %v5271_v3 }
 0x109   : > { %v893_v40 = vadd.f32 %v888_v4, %v5237_v46  ;;  %v5385_v62 = vsub.f32 %v5277_v2, %v8076_v35  ;;  %v3572_v26 = vpop.eup %3571  ;;  %3585 = vrcp.f32 %v1203_v60  ;;  %v1260_v59 = vadd.f32 0.1, %v5365_v23 }
 0x10a   : > { %v968_v46 = vmul.f32 %v3570_v57, %v5294_v27  ;;  %v1190_v49 = vadd.f32 0.81, %v1187_v9  ;;  %v3574_v61 = vpop.eup %3573  ;;  %v5392_v44 = vmul.f32 %v3564_v45, %v5284_v13  ;;  %v1025_v30 = vmul.f32 %v3572_v26, %v5307_v8 }
 0x10b   : > { %3587 = vrsqrt.f32 %v1133_v43  ;;  %v1244_v3 = vmul.f32 %v5385_v62, %v5385_v62  ;;  %v1082_v17 = vmul.f32 %v3574_v61, %v5313_v32  ;;  %v5400_v51 = vsub.f32 %v5387_v37, %v8077_v14 }
 0x10c   : > { %v971_v2 = vsub.f32 %v956_v31, %v968_v46  ;;  %3589 = vrsqrt.f32 %v1190_v49  ;;  %v1028_v27 = vsub.f32 %v1013_v7, %v1025_v30  ;;  %v821_v13 = vadd.f32 %v5213_v18, %v5199_v16  ;;  %v8079_v16 = vld [vmem:[#allocation31_spill] sm:$0xff]  ;;  %v5425_v7 = vld [vmem:[#allocation3 + $0x8] sm:$0xff] }
 0x10d   : > { %v1247_v12 = vadd.f32 0.81, %v1244_v3  ;;  %v5406_v8 = vsub.f32 %v5387_v37, %v8078_v6  ;;  %v3576_v45 = vpop.eup %3575  ;;  %3591 = vrcp.f32 %v1260_v59  ;;  %v1085_v53 = vsub.f32 %v1070_v10, %v1082_v17 }
 0x10e   : > { %v5408_v24 = vmul.f32 %v971_v2, %v971_v2  ;;  %v920_v32 = vmul.f32 %v5400_v51, %v5400_v51  ;;  %v3578_v48 = vpop.eup %3577  ;;  %v5412_v4 = vmul.f32 %v1028_v27, %v1028_v27  ;;  %v5418_v18 = vsub.f32 %v5387_v37, %v8079_v16 }
 0x10f   : > { %3593 = vrsqrt.f32 %v1247_v12  ;;  %v958_v60 = vmul.f32 %v5406_v8, %v5406_v8  ;;  %v3580_v43 = vpop.eup %3579  ;;  %v935_v31 = vmul.f32 %v3576_v45, %v5334_v42  ;;  %v5422_v9 = vmul.f32 %v3578_v48, %v5337_v34 }
 0x110   : > { %v977_v57 = vadd.f32 0.1, %v5408_v24  ;;  %v5429_v10 = vsub.f32 %v5387_v37, %v5425_v7  ;;  %v3582_v26 = vpop.eup %3581  ;;  %v5432_v59 = vmul.f32 %v3580_v43, %v5342_v15  ;;  %v1034_v46 = vadd.f32 0.1, %v5412_v4 }
 0x111   : > { %v5435_v49 = vmul.f32 %v1085_v53, %v1085_v53  ;;  %v922_v42 = vadd.f32 0.81, %v920_v32  ;;  %v1184_v34 = vmul.f32 %v3566_v5, %v5287_v0  ;;  %v1241_v61 = vmul.f32 %v3568_v11, %v5290_v33 }
 0x112   : > { %v8080_v30 = vrot.slane %v5108_v39, 6  ;;  %v8081_v3 = vrot.slane %v5171_v29, 6  ;;  %v961_v17 = vadd.f32 0.81, %v958_v60  ;;  %v3584_v27 = vpop.eup %3583  ;;  %v5444_v12 = vadd.f32 %v935_v31, %v893_v40  ;;  %v5462_v60 = vpop.permute.xlu1 %1283 }
 0x113   : > { %3595 = vrcp.f32 %v977_v57  ;;  %v1015_v45 = vmul.f32 %v5418_v18, %v5418_v18  ;;  %v3586_v53 = vpop.eup %3585  ;;  %v5452_v33 = vmul.f32 %v3582_v26, %v5346_v1  ;;  %v1072_v39 = vmul.f32 %v5429_v10, %v5429_v10  ;;  %v8082_v57 = vld [vmem:[#allocation35_spill] sm:$0xff] }
 0x114   : > { %v890_v2 = vsel %vm747_vm3, %v8081_v3, %v8080_v30  ;;  %3597 = vrcp.f32 %v1034_v46  ;;  %v1091_v11 = vadd.f32 0.1, %v5435_v49  ;;  %v5459_v32 = vmul.f32 %v3584_v27, %v5351_v36  ;;  %v8084_v30 = vld [vmem:[#allocation46_spill] sm:$0xff] }
 0x115   : > { %v5446_v15 = vadd.f32 %v890_v2, %v821_v13  ;;  %v3588_v29 = vpop.eup %3587  ;;  %3599 = vrsqrt.f32 %v922_v42  ;;  %v1018_v40 = vadd.f32 0.81, %v1015_v45  ;;  %v1075_v1 = vadd.f32 0.81, %v1072_v39  ;;  %v8083_v42 = vld [vmem:[#allocation36_spill] sm:$0xff] }
 0x116   : > { %v3590_v13 = vpop.eup %3589  ;;  %v1139_v48 = vmul.f32 %v3588_v29, %v5325_v19  ;;  %3601 = vrsqrt.f32 %v961_v17  ;;  %v5465_v43 = vmul.f32 %v3586_v53, %v5358_v58  ;;  %v5470_v26 = vsub.f32 %v5387_v37, %v8082_v57  ;;  %v8085_v17 = vld [vmem:[#allocation42_spill] sm:$0xff] }
 0x117   : > { %v1196_v31 = vmul.f32 %v3590_v13, %v5332_v21  ;;  %3603 = vrsqrt.f32 %v1018_v40  ;;  %v3592_v46 = vpop.eup %3591  ;;  %v5475_v19 = vsub.f32 %v5387_v37, %v8083_v42  ;;  %v5479_v3 = vsub.f32 %v5387_v37, %v8084_v30 }
 0x118   : > { %v1142_v36 = vsub.f32 %v5392_v44, %v1139_v48  ;;  %3605 = vrsqrt.f32 %v1075_v1  ;;  %v1129_v21 = vmul.f32 %v5470_v26, %v5470_v26  ;;  %v5485_v27 = vsub.f32 %v5462_v60, %v8085_v17 }
 0x119   : > { %v3594_v58 = vpop.eup %3593  ;;  %v1199_v2 = vsub.f32 %v1184_v34, %v1196_v31  ;;  %v5489_v44 = vsub.f32 %v5462_v60, %v4412_v38  ;;  %v1186_v37 = vmul.f32 %v5475_v19, %v5475_v19  ;;  %v1243_v34 = vmul.f32 %v5479_v3, %v5479_v3 }
 0x11a   : > { %v5491_v45 = vmul.f32 %v1142_v36, %v1142_v36  ;;  %v1253_v53 = vmul.f32 %v3594_v58, %v5385_v62  ;;  %v5499_v39 = vmul.f32 %v3592_v46, %v5365_v23  ;;  %3607 = vrcp.f32 %v1091_v11 }
 0x11b   : > { %v5501_v29 = vmul.f32 %v1199_v2, %v1199_v2  ;;  %v1132_v40 = vadd.f32 0.81, %v1129_v21  ;;  %v1189_v1 = vadd.f32 0.81, %v1186_v37  ;;  %v1298_v62 = vmul.f32 %v5485_v27, %v5485_v27 }
 0x11c   : > { %v1148_v13 = vadd.f32 0.1, %v5491_v45  ;;  %v1256_v48 = vsub.f32 %v1241_v61, %v1253_v53  ;;  %v1246_v5 = vadd.f32 0.81, %v1243_v34  ;;  %v1332_v61 = vmul.f32 %v5489_v44, %v5489_v44 }
 0x11d   : > { %v3596_v31 = vpop.eup %3595  ;;  %v1205_v58 = vadd.f32 0.1, %v5501_v29  ;;  %3609 = vrsqrt.f32 %v1132_v40  ;;  %v5517_v37 = vsub.f32 %v5462_v60, %v4418_v41 }
 0x11e   : > { %v3598_v23 = vpop.eup %3597  ;;  %3611 = vrcp.f32 %v1148_v13  ;;  %v5509_v46 = vmul.f32 %v1256_v48, %v1256_v48  ;;  %v1300_v48 = vadd.f32 0.81, %v1298_v62  ;;  %v5522_v36 = vmul.f32 %v3596_v31, %v5408_v24 }
 0x11f   : > { %v3600_v2 = vpop.eup %3599  ;;  %3613 = vrcp.f32 %v1205_v58  ;;  %v1389_v58 = vmul.f32 %v5517_v37, %v5517_v37  ;;  %v1335_v38 = vadd.f32 0.81, %v1332_v61  ;;  %v8086_v61 = vld [vmem:[#allocation43_spill] sm:$0xff] }
 0x120   : > { %v3602_v34 = vpop.eup %3601  ;;  %v1262_v40 = vadd.f32 0.1, %v5509_v46  ;;  %v926_v13 = vmul.f32 %v3600_v2, %v5400_v51  ;;  %3615 = vrsqrt.f32 %v1189_v1  ;;  %v5531_v51 = vsub.f32 %v5462_v60, %v5043_v56 }
 0x121   : > { %v3604_v11 = vpop.eup %3603  ;;  %v967_v21 = vmul.f32 %v3602_v34, %v5406_v8  ;;  %3617 = vrsqrt.f32 %v1246_v5  ;;  %v5534_v1 = vmul.f32 %v3598_v23, %v5412_v4  ;;  %v5548_v23 = vsub.f32 %v5462_v60, %v4449_v52 }
 0x122   : > { %v3606_v53 = vpop.eup %3605  ;;  %v928_v0 = vsub.f32 %v5102_v63, %v926_v13  ;;  %v1024_v41 = vmul.f32 %v3604_v11, %v5418_v18  ;;  %3619 = vrcp.f32 %v1262_v40  ;;  %v1392_v63 = vadd.f32 0.81, %v1389_v58 }
 0x123   : > { %v970_v8 = vsub.f32 %v5174_v25, %v967_v21  ;;  %v1081_v24 = vmul.f32 %v3606_v53, %v5429_v10  ;;  %3621 = vrsqrt.f32 %v1300_v48  ;;  %v1446_v4 = vmul.f32 %v5531_v51, %v5531_v51 }
 0x124   : > { %v5538_v5 = vmul.f32 %v928_v0, %v928_v0  ;;  %v1027_v62 = vsub.f32 %v5183_v54, %v1024_v41  ;;  %v3608_v18 = vpop.eup %3607  ;;  %3623 = vrsqrt.f32 %v1335_v38  ;;  %v5555_v41 = vsub.f32 %v5462_v60, %v4455_v55 }
 0x125   : > { %v5541_v31 = vmul.f32 %v970_v8, %v970_v8  ;;  %v1084_v56 = vsub.f32 %v5189_v22, %v1081_v24  ;;  %v1503_v11 = vmul.f32 %v5548_v23, %v5548_v23  ;;  %v5564_v2 = vsub.f32 %v5462_v60, %v8086_v61 }
 0x126   : > { %v932_v25 = vadd.f32 0.1, %v5538_v5  ;;  %v5551_v10 = vmul.f32 %v1027_v62, %v1027_v62  ;;  %v1560_v34 = vmul.f32 %v5555_v41, %v5555_v41  ;;  %v5571_v13 = vmul.f32 %v3608_v18, %v5435_v49 }
 0x127   : > { %v3610_v54 = vpop.eup %3609  ;;  %v976_v0 = vadd.f32 0.1, %v5541_v31  ;;  %v5558_v22 = vmul.f32 %v1084_v56, %v1084_v56  ;;  %v1449_v58 = vadd.f32 0.81, %v1446_v4  ;;  %v1506_v62 = vadd.f32 0.81, %v1503_v11 }
 0x128   : > { %v3612_v21 = vpop.eup %3611  ;;  %3625 = vrcp.f32 %v932_v25  ;;  %v1033_v38 = vadd.f32 0.1, %v5551_v10  ;;  %v1138_v53 = vmul.f32 %v3610_v54, %v5470_v26  ;;  %v1563_v25 = vadd.f32 0.81, %v1560_v34 }
 0x129   : > { %v3614_v40 = vpop.eup %3613  ;;  %3627 = vrcp.f32 %v976_v0  ;;  %v1090_v48 = vadd.f32 0.1, %v5558_v22  ;;  %v5575_v60 = vmul.f32 %v3612_v21, %v5491_v45  ;;  %v1617_v49 = vmul.f32 %v5564_v2, %v5564_v2  ;;  %v8091_v0 = vld [vmem:[#allocation15_spill] sm:$0xff] }
 0x12a   : > { %v3616_v8 = vpop.eup %3615  ;;  %3629 = vrcp.f32 %v1033_v38  ;;  %v1141_v24 = vsub.f32 %v5355_v50, %v1138_v53  ;;  %v5582_v18 = vmul.f32 %v3614_v40, %v5501_v29  ;;  %v990_v50 = vrot.slane %v5522_v36, 1 }
 0x12b   : > { %v3618_v26 = vpop.eup %3617  ;;  %3631 = vrcp.f32 %v1090_v48  ;;  %v1195_v56 = vmul.f32 %v3616_v8, %v5475_v19  ;;  %v5590_v19 = vpop.permute.xlu0 %1281  ;;  %v1620_v53 = vadd.f32 0.81, %v1617_v49  ;;  %v8087_v48 = vld [vmem:[#allocation41_spill] sm:$0xff]  ;;  %v8088_v8 = vld [vmem:[#allocation7_spill] sm:$0xff] }
 0x12c   : > { %v5584_v4 = vmul.f32 %v1141_v24, %v1141_v24  ;;  %v1252_v45 = vmul.f32 %v3618_v26, %v5479_v3  ;;  %3633 = vrsqrt.f32 %v1392_v63  ;;  %v3620_v54 = vpop.eup %3619  ;;  %v5608_v24 = vsub.f32 %v5590_v19, %v8088_v8 }
 0x12d   : > { %v1198_v11 = vsub.f32 %v5362_v47, %v1195_v56  ;;  %3635 = vrsqrt.f32 %v1449_v58  ;;  %v3622_v21 = vpop.eup %3621  ;;  %v5603_v58 = vsub.f32 %v5590_v19, %v8087_v48  ;;  %v8090_v56 = vld [vmem:[#allocation4_spill] sm:$0xff] }
 0x12e   : > { %v1147_v38 = vadd.f32 0.1, %v5584_v4  ;;  %v1255_v29 = vsub.f32 %v5375_v28, %v1252_v45  ;;  %3637 = vrsqrt.f32 %v1506_v62  ;;  %v3624_v36 = vpop.eup %3623  ;;  %v8089_v62 = vld [vmem:[#allocation8_spill] sm:$0xff]  ;;  %v5619_v45 = vmul.f32 %v3620_v54, %v5509_v46 }
 0x12f   : > { %v5596_v34 = vmul.f32 %v1198_v11, %v1198_v11  ;;  %3639 = vrsqrt.f32 %v1563_v25  ;;  %v5612_v26 = vsub.f32 %v5590_v19, %v8089_v62  ;;  %v5616_v25 = vsub.f32 %v5590_v19, %v8090_v56 }
 0x130   : > { %3641 = vrcp.f32 %v1147_v38  ;;  %v5599_v40 = vmul.f32 %v1255_v29, %v1255_v29  ;;  %v1297_v38 = vmul.f32 %v5603_v58, %v5603_v58  ;;  %v1331_v63 = vmul.f32 %v5608_v24, %v5608_v24 }
 0x131   : > { %v1204_v28 = vadd.f32 0.1, %v5596_v34  ;;  %3643 = vrsqrt.f32 %v1620_v53  ;;  %v1388_v56 = vmul.f32 %v5612_v26, %v5612_v26  ;;  %v5632_v53 = vsub.f32 %v5590_v19, %v8091_v0 }
 0x132   : > { %v3626_v49 = vpop.eup %3625  ;;  %v1261_v11 = vadd.f32 0.1, %v5599_v40  ;;  %v1299_v54 = vadd.f32 0.81, %v1297_v38  ;;  %v8095_v38 = vrot.slane %v5432_v59, 2 }
 0x133   : > { %v3628_v29 = vpop.eup %3627  ;;  %v936_v47 = vmul.f32 %v3626_v49, %v5538_v5  ;;  %3645 = vrcp.f32 %v1204_v28  ;;  %v1334_v28 = vadd.f32 0.81, %v1331_v63  ;;  %v1445_v49 = vmul.f32 %v5616_v25, %v5616_v25 }
 0x134   : > { %v3630_v3 = vpop.eup %3629  ;;  %v982_v46 = vmul.f32 %v3628_v29, %v5541_v31  ;;  %3647 = vrcp.f32 %v1261_v11  ;;  %v5640_v31 = vmul.f32 %v3622_v21, %v5485_v27  ;;  %v1391_v0 = vadd.f32 0.81, %v1388_v56 }
 0x135   : > { %v3632_v62 = vpop.eup %3631  ;;  %v938_v8 = vadd.f32 %v936_v47, %v5446_v15  ;;  %v1039_v5 = vmul.f32 %v3630_v3, %v5551_v10  ;;  %3649 = vrsqrt.f32 %v1299_v54  ;;  %v8093_v15 = vld [vmem:[#allocation16_spill] sm:$0xff]  ;;  %v8094_v63 = vrot.slane %v5422_v9, 1 }
 0x136   : > { %v3634_v61 = vpop.eup %3633  ;;  %v988_v55 = vrot.slane %v982_v46, 1  ;;  %v1096_v52 = vmul.f32 %v3632_v62, %v5558_v22  ;;  %8092 = vst [vmem:[#allocation4_spill] sm:$0xff] %v5640_v31  ;;  %v5645_v10 = vsub.f32 %v5590_v19, %v8093_v15  ;;  %v1502_v27 = vmul.f32 %v5632_v53, %v5632_v53 }
 0x137   : > { %v3636_v11 = vpop.eup %3635  ;;  %v1045_v29 = vrot.slane %v1039_v5, 2  ;;  %3651 = vrsqrt.f32 %v1334_v28  ;;  %v1448_v56 = vadd.f32 0.81, %v1445_v49  ;;  %v5658_v9 = vmul.f32 %v3624_v36, %v5489_v44 }
 0x138   : > { %v3638_v3 = vpop.eup %3637  ;;  %v989_v47 = vsel %vm532_vm1, %v8094_v63, %v988_v55  ;;  %v991_v22 = vsel %vm532_vm1, %v988_v55, %v990_v50  ;;  %v1102_v62 = vrot.slane %v1096_v52, 3  ;;  %v5661_v55 = vmul.f32 %v3634_v61, %v5517_v37  ;;  %v1288_v50 = vpop.permute.xlu1 %1287 }
 0x139   : > { %v3640_v21 = vpop.eup %3639  ;;  %v994_v46 = vadd.f32 %v989_v47, %v5444_v12  ;;  %v995_v54 = vadd.f32 %v991_v22, %v938_v8  ;;  %v1046_v15 = vsel %vm467_vm0, %v8095_v38, %v1045_v29  ;;  %8096 = vst [vmem:[#allocation66_spill] sm:$0xff] %v5658_v9  ;;  %v5664_v52 = vmul.f32 %v3636_v11, %v5531_v51  ;;  %v8101_v51 = vld [vmem:[#allocation39_spill] sm:$0xff] }
 0x13a   : > { %v3642_v5 = vpop.eup %3641  ;;  %8097 = vst [vmem:[#allocation67_spill] sm:$0xff] %v5661_v55  ;;  %v8099_v12 = vrot.slane %v5534_v1, 2  ;;  %v8100_v49 = vrot.slane %v5452_v33, 3  ;;  %3653 = vrsqrt.f32 %v1391_v0  ;;  %v1505_v36 = vadd.f32 0.81, %v1502_v27  ;;  %v8122_v55 = vld [vmem:[#allocation20_spill] sm:$0xff] }
 0x13b   : > { %8098 = vst [vmem:[#allocation68_spill] sm:$0xff] %v5664_v52  ;;  %v1051_v28 = vadd.f32 %v1046_v15, %v994_v46  ;;  %v1153_v38 = vmul.f32 %v3642_v5, %v5584_v4  ;;  %v3644_v44 = vpop.eup %3643  ;;  %v1559_v37 = vmul.f32 %v5645_v10, %v5645_v10  ;;  %v5677_v61 = vsub.f32 %v5590_v19, %v8101_v51  ;;  %v8102_v15 = vld [vmem:[#allocation40_spill] sm:$0xff] }
 0x13c   : > { %v1048_v8 = vsel %vm467_vm0, %v1045_v29, %v8099_v12  ;;  %v1103_v59 = vsel %vm417_vm5, %v8100_v49, %v1102_v62  ;;  %3655 = vrsqrt.f32 %v1448_v56  ;;  %v5680_v33 = vsub.f32 %v1288_v50, %v8102_v15 }
 0x13d   : > { %v3646_v1 = vpop.eup %3645  ;;  %v1052_v11 = vadd.f32 %v1048_v8, %v995_v54  ;;  %v1159_v29 = vrot.slane %v1153_v38, 4  ;;  %v1108_v47 = vadd.f32 %v1103_v59, %v1051_v28  ;;  %v1562_v0 = vadd.f32 0.81, %v1559_v37  ;;  %v8109_v59 = vld [vmem:[#allocation5_spill] sm:$0xff]  ;;  %v8111_v37 = vld [vmem:[#allocation63_spill] sm:$0xff] }
 0x13e   : > { %v3648_v63 = vpop.eup %3647  ;;  %v5683_v4 = vmul.f32 %v3646_v1, %v5596_v34  ;;  %v1616_v22 = vmul.f32 %v5677_v61, %v5677_v61  ;;  %v8103_v27 = vrot.slane %v5571_v13, 3  ;;  %v5694_v54 = vmul.f32 %v3638_v3, %v5548_v23 }
 0x13f   : > { %v5691_v46 = vmul.f32 %v3648_v63, %v5599_v40  ;;  %v1305_v56 = vmul.f32 %v5680_v33, %v5680_v33  ;;  %v3650_v5 = vpop.eup %3649  ;;  %v8105_v34 = vrot.slane %v5459_v32, 4  ;;  %v5702_v8 = vmul.f32 %v3640_v21, %v5555_v41 }
 0x140   : > { %v1105_v19 = vsel %vm417_vm5, %v1102_v62, %v8103_v27  ;;  %8104 = vst [vmem:[#allocation69_spill] sm:$0xff] %v5694_v54  ;;  %v5705_v13 = vmul.f32 %v3644_v44, %v5564_v2  ;;  %3657 = vrsqrt.f32 %v1505_v36  ;;  %v7928_v40 = vrot.slane %v5683_v4, 5  ;;  %v8110_v44 = vld [vmem:[#allocation6_spill] sm:$0xff] }
 0x141   : > { %v1160_v12 = vsel %vm737_vm6, %v8105_v34, %v1159_v29  ;;  %8106 = vst [vmem:[#allocation70_spill] sm:$0xff] %v5702_v8  ;;  %3659 = vrsqrt.f32 %v1562_v0  ;;  %v1619_v23 = vadd.f32 0.81, %v1616_v22  ;;  %v1307_v3 = vadd.f32 0.81, %v1305_v56  ;;  %v3652_v21 = vpop.eup %3651  ;;  %v8114_v0 = vld [vmem:[#allocation32_spill] sm:$0xff]  ;;  %v1286_v56 = vpop.permute.xlu0 %1285 }
 0x142   : > { %8107 = vst [vmem:[#allocation71_spill] sm:$0xff] %v5705_v13  ;;  %v5708_v62 = vadd.f32 %v1105_v19, %v1052_v11  ;;  %v8108_v28 = vrot.slane %v5575_v60, 4  ;;  %v1165_v49 = vadd.f32 %v1160_v12, %v1108_v47  ;;  %v5716_v41 = vsub.f32 %v1288_v50, %v8109_v59  ;;  %v8112_v11 = vld [vmem:[#allocation26_spill] sm:$0xff] }
 0x143   : > { %v5720_v38 = vmul.f32 %v3650_v5, %v5603_v58  ;;  %3661 = vrsqrt.f32 %v1619_v23  ;;  %v5723_v36 = vsub.f32 %v1288_v50, %v8110_v44  ;;  %v5728_v1 = vsub.f32 %v1288_v50, %v8111_v37  ;;  %v8115_v27 = vld [vmem:[#allocation34_spill] sm:$0xff] }
 0x144   : > { %v5713_v32 = vsel %vm737_vm6, %v1159_v29, %v8108_v28  ;;  %3663 = vrsqrt.f32 %v1307_v3  ;;  %v1343_v60 = vmul.f32 %v5716_v41, %v5716_v41  ;;  %v5731_v29 = vsub.f32 %v1288_v50, %v8112_v11  ;;  %v3654_v5 = vpop.eup %3653  ;;  %v8119_v11 = vld [vmem:[#allocation11_spill] sm:$0xff] }
 0x145   : > { %v8113_v63 = vrot.slane %v5465_v43, 5  ;;  %v1400_v47 = vmul.f32 %v5723_v36, %v5723_v36  ;;  %v5741_v22 = vsub.f32 %v1288_v50, %v8114_v0  ;;  %v5744_v19 = vsub.f32 %v1288_v50, %v8115_v27  ;;  %v8118_v0 = vld [vmem:[#allocation64_spill] sm:$0xff] }
 0x146   : > { %v5747_v34 = vmul.f32 %v3652_v21, %v5608_v24  ;;  %v1346_v12 = vadd.f32 0.81, %v1343_v60  ;;  %v1457_v43 = vmul.f32 %v5728_v1, %v5728_v1  ;;  %v1514_v23 = vmul.f32 %v5731_v29, %v5731_v29  ;;  %v3656_v3 = vpop.eup %3655  ;;  %v8116_v60 = vld [vmem:[#allocation9_spill] sm:$0xff] }
 0x147   : > { %v1217_v58 = vsel %vm812_vm4, %v8113_v63, %v7928_v40  ;;  %v1403_v37 = vadd.f32 0.81, %v1400_v47  ;;  %v1571_v50 = vmul.f32 %v5741_v22, %v5741_v22  ;;  %v1628_v63 = vmul.f32 %v5744_v19, %v5744_v19  ;;  %v8117_v47 = vld [vmem:[#allocation10_spill] sm:$0xff] }
 0x148   : > { %v5753_v28 = vadd.f32 %v1217_v58, %v1165_v49  ;;  %3665 = vrsqrt.f32 %v1346_v12  ;;  %v1460_v24 = vadd.f32 0.81, %v1457_v43  ;;  %v1517_v21 = vadd.f32 0.81, %v1514_v23 }
 0x149   : > { %v5760_v40 = vsub.f32 %v1286_v56, %v8116_v60  ;;  %v1397_v2 = vmul.f32 %v3654_v5, %v5612_v26  ;;  %3667 = vrsqrt.f32 %v1403_v37  ;;  %v1574_v44 = vadd.f32 0.81, %v1571_v50  ;;  %v8120_v5 = vld [vmem:[#allocation12_spill] sm:$0xff] }
 0x14a   : > { %v1631_v59 = vadd.f32 0.81, %v1628_v63  ;;  %v3658_v49 = vpop.eup %3657  ;;  %3669 = vrsqrt.f32 %v1460_v24  ;;  %v5766_v27 = vsub.f32 %v1286_v56, %v8117_v47  ;;  %v5769_v12 = vsub.f32 %v1286_v56, %v8118_v0 }
 0x14b   : > { %v1333_v58 = vmul.f32 %v5760_v40, %v5760_v40  ;;  %v3660_v43 = vpop.eup %3659  ;;  %v1454_v23 = vmul.f32 %v3656_v3, %v5616_v25  ;;  %3671 = vrsqrt.f32 %v1517_v21  ;;  %v5773_v26 = vsub.f32 %v1286_v56, %v8119_v11  ;;  %v8121_v21 = vld [vmem:[#allocation17_spill] sm:$0xff] }
 0x14c   : > { %v5776_v37 = vsub.f32 %v1286_v56, %v8120_v5  ;;  %3673 = vrsqrt.f32 %v1574_v44  ;;  %v1390_v63 = vmul.f32 %v5766_v27, %v5766_v27  ;;  %v1447_v24 = vmul.f32 %v5769_v12, %v5769_v12  ;;  %v5789_v5 = vpop.permute.xlu1 %1291 }
 0x14d   : > { %v1336_v50 = vadd.f32 0.81, %v1333_v58  ;;  %v3662_v0 = vpop.eup %3661  ;;  %3675 = vrsqrt.f32 %v1631_v59  ;;  %v1504_v25 = vmul.f32 %v5773_v26, %v5773_v26  ;;  %v5787_v11 = vsub.f32 %v1286_v56, %v8121_v21  ;;  %v8123_v21 = vld [vmem:[#allocation21_spill] sm:$0xff] }
 0x14e   : > { %v1561_v3 = vmul.f32 %v5776_v37, %v5776_v37  ;;  %v3664_v44 = vpop.eup %3663  ;;  %v1511_v58 = vmul.f32 %v3658_v49, %v5632_v53  ;;  %v1568_v47 = vmul.f32 %v3660_v43, %v5645_v10  ;;  %v1393_v51 = vadd.f32 0.81, %v1390_v63  ;;  %v8124_v53 = vld [vmem:[#allocation65_spill] sm:$0xff] }
 0x14f   : > { %v1450_v13 = vadd.f32 0.81, %v1447_v24  ;;  %v1311_v59 = vmul.f32 %v3664_v44, %v5680_v33  ;;  %3677 = vrsqrt.f32 %v1336_v50  ;;  %v1507_v8 = vadd.f32 0.81, %v1504_v25  ;;  %v8125_v43 = vld [vmem:[#allocation25_spill] sm:$0xff] }
 0x150   : > { %v1618_v54 = vmul.f32 %v5787_v11, %v5787_v11  ;;  %v1564_v52 = vadd.f32 0.81, %v1561_v3  ;;  %v5798_v56 = vsub.f32 %v5789_v5, %v8122_v55  ;;  %v5802_v9 = vsub.f32 %v5789_v5, %v8123_v21 }
 0x151   : > { %v5806_v10 = vsub.f32 %v5789_v5, %v8124_v53  ;;  %v1625_v33 = vmul.f32 %v3662_v0, %v5677_v61  ;;  %v1313_v49 = vsub.f32 %v5720_v38, %v1311_v59  ;;  %3679 = vrsqrt.f32 %v1393_v51 }
 0x152   : > { %v5812_v50 = vsub.f32 %v5789_v5, %v8125_v43  ;;  %v3666_v63 = vpop.eup %3665  ;;  %3681 = vrsqrt.f32 %v1450_v13  ;;  %v1345_v24 = vmul.f32 %v5798_v56, %v5798_v56  ;;  %v1402_v25 = vmul.f32 %v5802_v9, %v5802_v9 }
 0x153   : > { %v1459_v3 = vmul.f32 %v5806_v10, %v5806_v10  ;;  %v3668_v44 = vpop.eup %3667  ;;  %v5820_v61 = vmul.f32 %v1313_v49, %v1313_v49  ;;  %v1352_v51 = vmul.f32 %v3666_v63, %v5716_v41  ;;  %3683 = vrsqrt.f32 %v1507_v8 }
 0x154   : > { %v1621_v38 = vadd.f32 0.81, %v1618_v54  ;;  %v3670_v0 = vpop.eup %3669  ;;  %v1409_v59 = vmul.f32 %v3668_v44, %v5723_v36  ;;  %3685 = vrsqrt.f32 %v1564_v52  ;;  %v1348_v13 = vadd.f32 0.81, %v1345_v24 }
 0x155   : > { %v1405_v53 = vadd.f32 0.81, %v1402_v25  ;;  %v3672_v43 = vpop.eup %3671  ;;  %v1317_v21 = vadd.f32 0.1, %v5820_v61  ;;  %v1355_v31 = vsub.f32 %v5747_v34, %v1352_v51  ;;  %v1466_v48 = vmul.f32 %v3670_v0, %v5728_v1 }
 0x156   : > { %v1516_v49 = vmul.f32 %v5812_v50, %v5812_v50  ;;  %v3674_v30 = vpop.eup %3673  ;;  %v1412_v41 = vsub.f32 %v1397_v2, %v1409_v59  ;;  %v1523_v54 = vmul.f32 %v3672_v43, %v5731_v29  ;;  %3687 = vrsqrt.f32 %v1348_v13 }
 0x157   : > { %v1462_v8 = vadd.f32 0.81, %v1459_v3  ;;  %v3676_v36 = vpop.eup %3675  ;;  %3689 = vrcp.f32 %v1317_v21  ;;  %v5830_v52 = vmul.f32 %v1355_v31, %v1355_v31  ;;  %v1469_v63 = vsub.f32 %v1454_v23, %v1466_v48 }
 0x158   : > { %v1580_v24 = vmul.f32 %v3674_v30, %v5741_v22  ;;  %v5833_v25 = vmul.f32 %v1412_v41, %v1412_v41  ;;  %v1526_v34 = vsub.f32 %v1511_v58, %v1523_v54  ;;  %v1637_v1 = vmul.f32 %v3676_v36, %v5744_v19 }
 0x159   : > { %3691 = vrsqrt.f32 %v1405_v53  ;;  %v3678_v44 = vpop.eup %3677  ;;  %v1361_v2 = vadd.f32 0.1, %v5830_v52  ;;  %v5837_v51 = vmul.f32 %v1469_v63, %v1469_v63  ;;  %v5844_v22 = vadd.f32 %v5713_v32, %v5708_v62 }
 0x15a   : > { %v1583_v29 = vsub.f32 %v1568_v47, %v1580_v24  ;;  %3693 = vrsqrt.f32 %v1621_v38  ;;  %v1418_v21 = vadd.f32 0.1, %v5833_v25  ;;  %v5840_v31 = vmul.f32 %v1526_v34, %v1526_v34  ;;  %v5879_v24 = vld [vmem:[#allocation3] sm:$0xff] }
 0x15b   : > { %v1640_v48 = vsub.f32 %v1625_v33, %v1637_v1  ;;  %3695 = vrsqrt.f32 %v1462_v8  ;;  %v3680_v30 = vpop.eup %3679  ;;  %v1475_v19 = vadd.f32 0.1, %v5837_v51  ;;  %v8126_v47 = vrot.slane %v5691_v46, 6  ;;  %v5871_v8 = vld [vmem:[#allocation2 + $0x8] sm:$0xff] }
 0x15c   : > { %3697 = vrcp.f32 %v1361_v2  ;;  %v5847_v23 = vmul.f32 %v1583_v29, %v1583_v29  ;;  %v3682_v58 = vpop.eup %3681  ;;  %v8127_v43 = vrot.slane %v5499_v39, 6  ;;  %v1532_v33 = vadd.f32 0.1, %v5840_v31 }
 0x15d   : > { %3699 = vrcp.f32 %v1418_v21  ;;  %v5855_v38 = vmul.f32 %v1640_v48, %v1640_v48  ;;  %v3684_v0 = vpop.eup %3683  ;;  %v1519_v32 = vadd.f32 0.81, %v1516_v49  ;;  %v5860_v59 = vsub.f32 %v5789_v5, %v8073_v20 }
 0x15e   : > { %v1274_v3 = vsel %vm747_vm3, %v8127_v43, %v8126_v47  ;;  %3701 = vrcp.f32 %v1475_v19  ;;  %v1589_v62 = vadd.f32 0.1, %v5847_v23  ;;  %v3686_v13 = vpop.eup %3685  ;;  %v5866_v41 = vsub.f32 %v5789_v5, %v8076_v35 }
 0x15f   : > { %v1279_v53 = vadd.f32 %v1274_v3, %v5753_v28  ;;  %3703 = vrcp.f32 %v1532_v33  ;;  %v1646_v39 = vadd.f32 0.1, %v5855_v38  ;;  %v1342_v54 = vmul.f32 %v3678_v44, %v5760_v40 }
 0x160   : > { %3705 = vrcp.f32 %v1589_v62  ;;  %v1573_v49 = vmul.f32 %v5860_v59, %v5860_v59  ;;  %v5875_v36 = vsub.f32 %v5871_v8, %v8085_v17  ;;  %v3688_v28 = vpop.eup %3687  ;;  %v1630_v63 = vmul.f32 %v5866_v41, %v5866_v41 }
 0x161   : > { %3707 = vrcp.f32 %v1646_v39  ;;  %v5883_v5 = vsub.f32 %v5879_v24, %v8102_v15  ;;  %v5887_v40 = vsub.f32 %v5425_v7, %v8077_v14  ;;  %v3690_v34 = vpop.eup %3689  ;;  %v1354_v1 = vmul.f32 %v3688_v28, %v5798_v56 }
 0x162   : > { %3709 = vrsqrt.f32 %v1519_v32  ;;  %v1576_v44 = vadd.f32 0.81, %v1573_v49  ;;  %v1672_v2 = vmul.f32 %v5875_v36, %v5875_v36  ;;  %v1399_v21 = vmul.f32 %v3680_v30, %v5766_v27 }
 0x163   : > { %v3692_v29 = vpop.eup %3691  ;;  %v1633_v48 = vadd.f32 0.81, %v1630_v63  ;;  %v1679_v19 = vmul.f32 %v5883_v5, %v5883_v5  ;;  %v1680_v47 = vmul.f32 %v5887_v40, %v5887_v40  ;;  %v1357_v3 = vsub.f32 %v1342_v54, %v1354_v1  ;;  %v5906_v1 = vld [vmem:[#allocation2 + $0x10] sm:$0x3f] }
 0x164   : > { %v3694_v43 = vpop.eup %3693  ;;  %v1411_v33 = vmul.f32 %v3692_v29, %v5802_v9  ;;  %3711 = vrsqrt.f32 %v1576_v44  ;;  %v1674_v56 = vadd.f32 0.81, %v1672_v2  ;;  %v1321_v32 = vmul.f32 %v3690_v34, %v5820_v61 }
 0x165   : > { %v3696_v62 = vpop.eup %3695  ;;  %v1456_v39 = vmul.f32 %v3682_v58, %v5769_v12  ;;  %3713 = vrsqrt.f32 %v1633_v48  ;;  %v1682_v27 = vadd.f32 0.81, %v1680_v47  ;;  %v5900_v49 = vmul.f32 %v1357_v3, %v1357_v3  ;;  %v4190_v12 = vld [vmem:[#allocation3 + $0x10] sm:$0x3f] }
 0x166   : > { %v3698_v30 = vpop.eup %3697  ;;  %v1414_v28 = vsub.f32 %v1399_v21, %v1411_v33  ;;  %v1468_v63 = vmul.f32 %v3696_v62, %v5806_v10  ;;  %3715 = vrsqrt.f32 %v1674_v56  ;;  %v1681_v9 = vadd.f32 0.81, %v1679_v19 }
 0x167   : > { %v3700_v35 = vpop.eup %3699  ;;  %v5904_v54 = vmul.f32 %v3698_v30, %v5830_v52  ;;  %v5910_v61 = vsub.f32 %v5906_v1, %v8116_v60  ;;  %v5913_v58 = vsub.f32 %v4190_v12, %v8122_v55  ;;  %v1363_v10 = vadd.f32 0.1, %v5900_v49 }
 0x168   : > { %v3702_v34 = vpop.eup %3701  ;;  %v5916_v44 = vmul.f32 %v3700_v35, %v5833_v25  ;;  %v5919_v2 = vmul.f32 %v1414_v28, %v1414_v28  ;;  %v1471_v52 = vsub.f32 %v1456_v39, %v1468_v63  ;;  %v8128_v21 = vrot.slane %v5582_v18, 5  ;;  %v8130_v63 = vld [vmem:[#allocation62_spill] sm:$0xff] }
 0x169   : > { %v3704_v29 = vpop.eup %3703  ;;  %v8129_v48 = vrot.slane %v5683_v4, 5  ;;  %v1513_v47 = vmul.f32 %v3684_v0, %v5773_v26  ;;  %3717 = vrsqrt.f32 %v1682_v27  ;;  %v1707_v3 = vmul.f32 %v5910_v61, %v5910_v61  ;;  %v8140_v27 = vld [vmem:[#allocation4_spill] sm:$0xff] }
 0x16a   : > { %v3706_v35 = vpop.eup %3705  ;;  %v5929_v25 = vadd.f32 %v1321_v32, %v1279_v53  ;;  %v5932_v33 = vmul.f32 %v3702_v34, %v5837_v51  ;;  %v1570_v56 = vmul.f32 %v3686_v13, %v5776_v37  ;;  %v1627_v18 = vmul.f32 %v3694_v43, %v5787_v11  ;;  %v5954_v34 = vpop.permute.xlu0 %1289 }
 0x16b   : > { %v1219_v19 = vsel %vm812_vm4, %v8129_v48, %v8128_v21  ;;  %v3708_v62 = vpop.eup %3707  ;;  %v1420_v4 = vadd.f32 0.1, %v5919_v2  ;;  %v5937_v39 = vmul.f32 %v1471_v52, %v1471_v52  ;;  %3719 = vrsqrt.f32 %v1681_v9  ;;  %v8131_v9 = vld [vmem:[#allocation52_spill] sm:$0xff] }
 0x16c   : > { %v1710_v26 = vadd.f32 0.81, %v1707_v3  ;;  %v3710_v0 = vpop.eup %3709  ;;  %3721 = vrcp.f32 %v1363_v10  ;;  %v1719_v51 = vmul.f32 %v5913_v58, %v5913_v58  ;;  %v5944_v37 = vmul.f32 %v3704_v29, %v5840_v31 }
 0x16d   : > { %v1477_v11 = vadd.f32 0.1, %v5937_v39  ;;  %v1525_v13 = vmul.f32 %v3710_v0, %v5812_v50  ;;  %v5950_v30 = vmul.f32 %v3706_v35, %v5847_v23  ;;  %v1730_v12 = vsub.f32 %v8131_v9, %v8130_v63 }
 0x16e   : > { %3723 = vrsqrt.f32 %v1710_v26  ;;  %v3712_v43 = vpop.eup %3711  ;;  %v1722_v28 = vadd.f32 0.81, %v1719_v51  ;;  %v5957_v31 = vmul.f32 %v3708_v62, %v5855_v38  ;;  %v1223_v48 = vadd.f32 %v1219_v19, %v5844_v22 }
 0x16f   : > { %v3714_v10 = vpop.eup %3713  ;;  %3725 = vrcp.f32 %v1420_v4  ;;  %v1528_v52 = vsub.f32 %v1513_v47, %v1525_v13  ;;  %v1582_v50 = vmul.f32 %v3712_v43, %v5860_v59  ;;  %v5961_v23 = vmul.f32 %v1730_v12, %v1730_v12 }
 0x170   : > { %v3716_v29 = vpop.eup %3715  ;;  %v1639_v21 = vmul.f32 %v3714_v10, %v5866_v41  ;;  %3727 = vrsqrt.f32 %v1722_v28  ;;  %v5968_v38 = vsub.f32 %v5954_v34, %v8077_v14  ;;  %v5974_v41 = vsub.f32 %v5954_v34, %v8078_v6  ;;  %v8147_v6 = vld [vmem:[#allocation71_spill] sm:$0xff] }
 0x171   : > { %3729 = vrcp.f32 %v1477_v11  ;;  %v5964_v3 = vmul.f32 %v1528_v52, %v1528_v52  ;;  %v1585_v35 = vsub.f32 %v1570_v56, %v1582_v50  ;;  %v1678_v47 = vmul.f32 %v3716_v29, %v5875_v36 }
 0x172   : > { %v1642_v62 = vsub.f32 %v1627_v18, %v1639_v21  ;;  %v1736_v59 = vadd.f32 0.1, %v5961_v23  ;;  %v1306_v56 = vmul.f32 %v5968_v38, %v5968_v38  ;;  %v5983_v26 = vsub.f32 %v5954_v34, %v8079_v16 }
 0x173   : > { %v3718_v4 = vpop.eup %3717  ;;  %v1534_v22 = vadd.f32 0.1, %v5964_v3  ;;  %v5977_v19 = vmul.f32 %v1585_v35, %v1585_v35  ;;  %v1344_v0 = vmul.f32 %v5974_v41, %v5974_v41  ;;  %v8132_v9 = vrot.slane %v5619_v45, 6 }
 0x174   : > { %v5985_v18 = vmul.f32 %v1642_v62, %v1642_v62  ;;  %v1686_v36 = vmul.f32 %v3718_v4, %v5887_v40  ;;  %3731 = vrcp.f32 %v1736_v59  ;;  %v1308_v43 = vadd.f32 0.81, %v1306_v56 }
 0x175   : > { %v3720_v51 = vpop.eup %3719  ;;  %3733 = vrcp.f32 %v1534_v22  ;;  %v1591_v13 = vadd.f32 0.1, %v5977_v19  ;;  %v8133_v12 = vrot.slane %v5691_v46, 6  ;;  %v1347_v40 = vadd.f32 0.81, %v1344_v0 }
 0x176   : > { %v3722_v28 = vpop.eup %3721  ;;  %v1688_v63 = vsub.f32 %v1678_v47, %v1686_v36  ;;  %v1401_v52 = vmul.f32 %v5983_v26, %v5983_v26  ;;  %v6005_v62 = vsub.f32 %v5954_v34, %v5425_v7  ;;  %v1648_v45 = vadd.f32 0.1, %v5985_v18 }
 0x177   : > { %v1276_v10 = vsel %vm747_vm3, %v8133_v12, %v8132_v9  ;;  %3735 = vrcp.f32 %v1591_v13  ;;  %v6018_v7 = vmul.f32 %v3722_v28, %v5900_v49  ;;  %v6021_v36 = vmul.f32 %v3720_v51, %v5883_v5  ;;  %v8134_v51 = vld [vmem:[#allocation46_spill] sm:$0xff] }
 0x178   : > { %v3724_v50 = vpop.eup %3723  ;;  %v6001_v35 = vadd.f32 %v1276_v10, %v1223_v48  ;;  %v6008_v46 = vmul.f32 %v1688_v63, %v1688_v63  ;;  %v1404_v47 = vadd.f32 0.81, %v1401_v52  ;;  %3737 = vrsqrt.f32 %v1308_v43  ;;  %v6037_v10 = vld [vmem:[#allocation2] sm:$0xff]  ;;  %v6043_v52 = vpop.permute.xlu1 %1986 }
 0x179   : > { %v3726_v59 = vpop.eup %3725  ;;  %v1716_v4 = vmul.f32 %v3724_v50, %v5910_v61  ;;  %v1458_v22 = vmul.f32 %v6005_v62, %v6005_v62  ;;  %v6015_v48 = vsub.f32 %v5954_v34, %v8082_v57  ;;  %3739 = vrsqrt.f32 %v1347_v40  ;;  %v8153_v57 = vld [vmem:[#allocation8_spill] sm:$0xff] }
 0x17a   : > { %v3728_v56 = vpop.eup %3727  ;;  %v6025_v0 = vsub.f32 %v5954_v34, %v8083_v42  ;;  %3741 = vrsqrt.f32 %v1404_v47  ;;  %v1692_v49 = vadd.f32 0.1, %v6008_v46  ;;  %v6035_v28 = vsub.f32 %v5954_v34, %v8134_v51 }
 0x17b   : > { %v3730_v61 = vpop.eup %3729  ;;  %v1728_v13 = vmul.f32 %v3728_v56, %v5913_v58  ;;  %v1461_v43 = vadd.f32 0.81, %v1458_v22  ;;  %v1515_v63 = vmul.f32 %v6015_v48, %v6015_v48  ;;  %3743 = vrcp.f32 %v1648_v45  ;;  %v8135_v58 = vld [vmem:[#allocation41_spill] sm:$0xff]  ;;  %v8136_v22 = vld [vmem:[#allocation44_spill] sm:$0xff] }
 0x17c   : > { %v1572_v5 = vmul.f32 %v6025_v0, %v6025_v0  ;;  %v6041_v40 = vsub.f32 %v6037_v10, %v8135_v58  ;;  %v1629_v47 = vmul.f32 %v6035_v28, %v6035_v28  ;;  %v8137_v56 = vld [vmem:[#allocation48_spill] sm:$0xff]  ;;  %v6061_v21 = vmul.f32 %v3730_v61, %v5937_v39 }
 0x17d   : > { %v1731_v9 = vsub.f32 %v1716_v4, %v1728_v13  ;;  %3745 = vrsqrt.f32 %v1461_v43  ;;  %v1518_v12 = vadd.f32 0.81, %v1515_v63  ;;  %v1729_v34 = vsub.f32 %v8137_v56, %v8136_v22 }
 0x17e   : > { %v3732_v50 = vpop.eup %3731  ;;  %v1575_v45 = vadd.f32 0.81, %v1572_v5  ;;  %v6051_v4 = vsub.f32 %v6043_v52, %v8085_v17  ;;  %v6054_v43 = vmul.f32 %v3726_v59, %v5919_v2  ;;  %v1671_v5 = vmul.f32 %v6041_v40, %v6041_v40 }
 0x17f   : > { %v3734_v13 = vpop.eup %3733  ;;  %v6056_v63 = vmul.f32 %v1731_v9, %v1731_v9  ;;  %3747 = vrsqrt.f32 %v1518_v12  ;;  %v1632_v29 = vadd.f32 0.81, %v1629_v47  ;;  %v6063_v22 = vmul.f32 %v1729_v34, %v1729_v34  ;;  %v8138_v47 = vld [vmem:[#allocation13_spill] sm:$0xff] }
 0x180   : > { %3749 = vrsqrt.f32 %v1575_v45  ;;  %v1673_v11 = vadd.f32 0.81, %v1671_v5  ;;  %v2001_v2 = vmul.f32 %v6051_v4, %v6051_v4  ;;  %v6069_v9 = vmul.f32 %v3734_v13, %v5964_v3  ;;  %v8142_v45 = vld [vmem:[#allocation67_spill] sm:$0xff] }
 0x181   : > { %3751 = vrcp.f32 %v1692_v49  ;;  %v1737_v56 = vadd.f32 0.1, %v6056_v63  ;;  %v3736_v59 = vpop.eup %3735  ;;  %v6072_v12 = vmul.f32 %v3732_v50, %v5961_v23  ;;  %v1735_v39 = vadd.f32 0.1, %v6063_v22  ;;  %v8139_v49 = vld [vmem:[#allocation14_spill] sm:$0xff] }
 0x182   : > { %3753 = vrsqrt.f32 %v1632_v29  ;;  %v3738_v61 = vpop.eup %3737  ;;  %v6079_v34 = vsub.f32 %v6043_v52, %v8138_v47  ;;  %v2003_v23 = vadd.f32 0.81, %v2001_v2 }
 0x183   : > { %3755 = vrcp.f32 %v1737_v56  ;;  %v3740_v5 = vpop.eup %3739  ;;  %v1312_v13 = vmul.f32 %v3738_v61, %v5968_v38  ;;  %v6088_v56 = vsub.f32 %v6043_v52, %v8139_v49  ;;  %v6100_v49 = vsub.f32 %v6043_v52, %v5871_v8 }
 0x184   : > { %3757 = vrsqrt.f32 %v1673_v11  ;;  %v3742_v29 = vpop.eup %3741  ;;  %v1353_v50 = vmul.f32 %v3740_v5, %v5974_v41  ;;  %v2035_v32 = vmul.f32 %v6079_v34, %v6079_v34  ;;  %v6095_v41 = vmul.f32 %v3736_v59, %v5977_v19 }
 0x185   : > { %3759 = vrcp.f32 %v1735_v39  ;;  %v3744_v53 = vpop.eup %3743  ;;  %v1314_v38 = vsub.f32 %v8140_v27, %v1312_v13  ;;  %v1410_v11 = vmul.f32 %v3742_v29, %v5983_v26  ;;  %v8141_v39 = vld [vmem:[#allocation66_spill] sm:$0xff] }
 0x186   : > { %v1356_v61 = vsub.f32 %v8141_v39, %v1353_v50  ;;  %v2038_v5 = vadd.f32 0.81, %v2035_v32  ;;  %3761 = vrsqrt.f32 %v2003_v23  ;;  %v6107_v26 = vmul.f32 %v3744_v53, %v5985_v18  ;;  %v8143_v50 = vld [vmem:[#allocation68_spill] sm:$0xff] }
 0x187   : > { %v3746_v2 = vpop.eup %3745  ;;  %v6102_v47 = vmul.f32 %v1314_v38, %v1314_v38  ;;  %v1413_v17 = vsub.f32 %v8142_v45, %v1410_v11  ;;  %v2092_v32 = vmul.f32 %v6088_v56, %v6088_v56  ;;  %v2149_v18 = vmul.f32 %v6100_v49, %v6100_v49  ;;  %v8144_v11 = vld [vmem:[#allocation18_spill] sm:$0xff] }
 0x188   : > { %v1467_v3 = vmul.f32 %v3746_v2, %v6005_v62  ;;  %v6109_v19 = vmul.f32 %v1356_v61, %v1356_v61  ;;  %3763 = vrsqrt.f32 %v2038_v5  ;;  %v6124_v2 = vsub.f32 %v6043_v52, %v8144_v11 }
 0x189   : > { %v3748_v27 = vpop.eup %3747  ;;  %v1318_v13 = vadd.f32 0.1, %v6102_v47  ;;  %v6114_v29 = vmul.f32 %v1413_v17, %v1413_v17 }
 0x18a   : > { %v3750_v59 = vpop.eup %3749  ;;  %v1470_v45 = vsub.f32 %v8143_v50, %v1467_v3  ;;  %v1524_v62 = vmul.f32 %v3748_v27, %v6015_v48  ;;  %v1362_v38 = vadd.f32 0.1, %v6109_v19  ;;  %v8145_v3 = vld [vmem:[#allocation69_spill] sm:$0xff]  ;;  %v8146_v27 = vld [vmem:[#allocation70_spill] sm:$0xff] }
 0x18b   : > { %v3752_v23 = vpop.eup %3751  ;;  %v1581_v53 = vmul.f32 %v3750_v59, %v6025_v0  ;;  %3765 = vrcp.f32 %v1318_v13  ;;  %v1419_v17 = vadd.f32 0.1, %v6114_v29  ;;  %v2095_v59 = vadd.f32 0.81, %v2092_v32 }
 0x18c   : > { %v3754_v39 = vpop.eup %3753  ;;  %v6127_v61 = vmul.f32 %v1470_v45, %v1470_v45  ;;  %v1527_v48 = vsub.f32 %v8145_v3, %v1524_v62  ;;  %3767 = vrcp.f32 %v1362_v38  ;;  %v2152_v3 = vadd.f32 0.81, %v2149_v18 }
 0x18d   : > { %v3756_v5 = vpop.eup %3755  ;;  %v1584_v50 = vsub.f32 %v8146_v27, %v1581_v53  ;;  %v1638_v0 = vmul.f32 %v3754_v39, %v6035_v28  ;;  %3769 = vrcp.f32 %v1419_v17  ;;  %v2206_v32 = vmul.f32 %v6124_v2, %v6124_v2 }
 0x18e   : > { %v3758_v42 = vpop.eup %3757  ;;  %v1476_v11 = vadd.f32 0.1, %v6127_v61  ;;  %v6134_v13 = vmul.f32 %v1527_v48, %v1527_v48  ;;  %v1743_v53 = vmul.f32 %v3756_v5, %v6056_v63  ;;  %v8148_v5 = vld [vmem:[#allocation19_spill] sm:$0xff] }
 0x18f   : > { %v3760_v16 = vpop.eup %3759  ;;  %v6136_v45 = vmul.f32 %v1584_v50, %v1584_v50  ;;  %v1641_v62 = vsub.f32 %v8147_v6, %v1638_v0  ;;  %v1677_v38 = vmul.f32 %v3758_v42, %v6041_v40  ;;  %v6150_v42 = vmul.f32 %v3752_v23, %v6008_v46  ;;  %v6164_v23 = vpop.permute.xlu0 %1984 }
 0x190   : > { %3771 = vrcp.f32 %v1476_v11  ;;  %v1533_v28 = vadd.f32 0.1, %v6134_v13  ;;  %v3762_v27 = vpop.eup %3761  ;;  %v1741_v40 = vmul.f32 %v3760_v16, %v6063_v22  ;;  %v6158_v50 = vsub.f32 %v6043_v52, %v8148_v5 }
 0x191   : > { %v1590_v39 = vadd.f32 0.1, %v6136_v45  ;;  %v6145_v17 = vmul.f32 %v1641_v62, %v1641_v62  ;;  %v1687_v48 = vsub.f32 %v1677_v38, %v6021_v36  ;;  %3773 = vrsqrt.f32 %v2095_v59  ;;  %v8149_v59 = vld [vmem:[#allocation43_spill] sm:$0xff] }
 0x192   : > { %3775 = vrcp.f32 %v1533_v28  ;;  %v3764_v63 = vpop.eup %3763  ;;  %v1750_v36 = vrot.slane %v1743_v53, 1  ;;  %v2209_v0 = vadd.f32 0.81, %v2206_v32  ;;  %v6162_v46 = vsub.f32 %v6043_v52, %v8149_v59  ;;  %v8152_v28 = vld [vmem:[#allocation7_spill] sm:$0xff] }
 0x193   : > { %3777 = vrcp.f32 %v1590_v39  ;;  %v1647_v18 = vadd.f32 0.1, %v6145_v17  ;;  %v6154_v11 = vmul.f32 %v1687_v48, %v1687_v48  ;;  %v2263_v22 = vmul.f32 %v6158_v50, %v6158_v50 }
 0x194   : > { %3779 = vrsqrt.f32 %v2152_v3  ;;  %8150 = vst [vmem:[#allocation63_spill] sm:$0xff] %v6162_v46  ;;  %v6171_v62 = vsub.f32 %v6164_v23, %v8135_v58  ;;  %v1747_v53 = vrot.slane %v1741_v40, 1  ;;  %v6174_v3 = vmul.f32 %v3762_v27, %v6051_v4 }
 0x195   : > { %3781 = vrcp.f32 %v1647_v18  ;;  %v1691_v16 = vadd.f32 0.1, %v6154_v11  ;;  %v3766_v38 = vpop.eup %3765  ;;  %v2320_v52 = vmul.f32 %v6162_v46, %v6162_v46  ;;  %v6180_v32 = vsub.f32 %v6164_v23, %v8152_v28 }
 0x196   : > { %8151 = vst [vmem:[#allocation64_spill] sm:$0xff] %v6174_v3  ;;  %v3768_v39 = vpop.eup %3767  ;;  %v1322_v48 = vmul.f32 %v3766_v38, %v6102_v47  ;;  %v2266_v18 = vadd.f32 0.81, %v2263_v22  ;;  %v2000_v6 = vmul.f32 %v6171_v62, %v6171_v62  ;;  %v6187_v40 = vsub.f32 %v6164_v23, %v8153_v57 }
 0x197   : > { %v3770_v4 = vpop.eup %3769  ;;  %v8154_v27 = vrot.slane %v6072_v12, 1  ;;  %v1368_v28 = vmul.f32 %v3768_v39, %v6109_v19  ;;  %3783 = vrsqrt.f32 %v2209_v0  ;;  %v2034_v47 = vmul.f32 %v6180_v32, %v6180_v32 }
 0x198   : > { %v1324_v22 = vadd.f32 %v1322_v48, %v6001_v35  ;;  %v1425_v38 = vmul.f32 %v3770_v4, %v6114_v29  ;;  %3785 = vrcp.f32 %v1691_v16  ;;  %v2002_v5 = vadd.f32 0.81, %v2000_v6 }
 0x199   : > { %v6192_v58 = vsel %vm532_vm1, %v8154_v27, %v1750_v36  ;;  %v1374_v3 = vrot.slane %v1368_v28, 1  ;;  %v8155_v14 = vmov %v8154_v27  ;;  %3787 = vrsqrt.f32 %v2266_v18 }
 0x19a   : > { %v3772_v57 = vpop.eup %3771  ;;  %v6202_v46 = vsel %vm532_vm1, %v1747_v53, %v8155_v14  ;;  %v2037_v36 = vadd.f32 0.81, %v2034_v47  ;;  %v1431_v0 = vrot.slane %v1425_v38, 2  ;;  %v2323_v27 = vadd.f32 0.81, %v2320_v52 }
 0x19b   : > { %v3774_v19 = vpop.eup %3773  ;;  %v1482_v39 = vmul.f32 %v3772_v57, %v6127_v61  ;;  %v2091_v35 = vmul.f32 %v6187_v40, %v6187_v40  ;;  %v8156_v6 = vrot.slane %v5904_v54, 1  ;;  %v8157_v12 = vrot.slane %v6018_v7, 1 }
 0x19c   : > { %v3776_v29 = vpop.eup %3775  ;;  %3789 = vrsqrt.f32 %v2002_v5  ;;  %v6215_v53 = vsub.f32 %v6164_v23, %v6037_v10  ;;  %v8158_v52 = vrot.slane %v5916_v44, 2  ;;  %v8159_v18 = vrot.slane %v6054_v43, 2 }
 0x19d   : > { %v1375_v16 = vsel %vm532_vm1, %v8156_v6, %v1374_v3  ;;  %v1377_v14 = vsel %vm532_vm1, %v1374_v3, %v8157_v12  ;;  %v3778_v28 = vpop.eup %3777  ;;  %3791 = vrsqrt.f32 %v2037_v36  ;;  %v1488_v3 = vrot.slane %v1482_v39, 3 }
 0x19e   : > { %v1380_v57 = vadd.f32 %v1375_v16, %v5929_v25  ;;  %v1381_v61 = vadd.f32 %v1377_v14, %v1324_v22  ;;  %v1432_v48 = vsel %vm467_vm0, %v8158_v52, %v1431_v0  ;;  %v3780_v54 = vpop.eup %3779  ;;  %v1434_v7 = vsel %vm467_vm0, %v1431_v0, %v8159_v18 }
 0x19f   : > { %v1539_v5 = vmul.f32 %v3776_v29, %v6134_v13  ;;  %v1596_v4 = vmul.f32 %v3778_v28, %v6136_v45  ;;  %v3782_v47 = vpop.eup %3781  ;;  %v6227_v25 = vmul.f32 %v3764_v63, %v6079_v34  ;;  %v2148_v44 = vmul.f32 %v6215_v53, %v6215_v53 }
 0x1a0   : > { %v1437_v38 = vadd.f32 %v1432_v48, %v1380_v57  ;;  %v1438_v6 = vadd.f32 %v1434_v7, %v1381_v61  ;;  %v8160_v22 = vrot.slane %v5932_v33, 3  ;;  %v8161_v36 = vrot.slane %v6061_v21, 3 }
 0x1a1   : > { %v1545_v13 = vrot.slane %v1539_v5, 4  ;;  %v1602_v39 = vrot.slane %v1596_v4, 5  ;;  %v1653_v16 = vmul.f32 %v3782_v47, %v6145_v17  ;;  %v2094_v12 = vadd.f32 0.81, %v2091_v35  ;;  %v3784_v34 = vpop.eup %3783 }
 0x1a2   : > { %v1489_v43 = vsel %vm417_vm5, %v8160_v22, %v1488_v3  ;;  %v1491_v0 = vsel %vm417_vm5, %v1488_v3, %v8161_v36  ;;  %v8162_v63 = vrot.slane %v5944_v37, 4  ;;  %v8163_v33 = vrot.slane %v6069_v9, 4  ;;  %v3786_v57 = vpop.eup %3785  ;;  %v8166_v3 = vld [vmem:[#allocation15_spill] sm:$0xff] }
 0x1a3   : > { %v1494_v45 = vadd.f32 %v1489_v43, %v1437_v38  ;;  %v1495_v29 = vadd.f32 %v1491_v0, %v1438_v6  ;;  %v6245_v21 = vmul.f32 %v3774_v19, %v6088_v56  ;;  %3793 = vrsqrt.f32 %v2323_v27  ;;  %v3788_v17 = vpop.eup %3787  ;;  %v8167_v56 = vld [vmem:[#allocation16_spill] sm:$0xff]  ;;  %v8169_v0 = vld [vmem:[#allocation39_spill] sm:$0xff] }
 0x1a4   : > { %v1546_v14 = vsel %vm737_vm6, %v8162_v63, %v1545_v13  ;;  %v1548_v28 = vsel %vm737_vm6, %v1545_v13, %v8163_v33  ;;  %v1659_v48 = vrot.slane %v1653_v16, 6  ;;  %v2151_v18 = vadd.f32 0.81, %v2148_v44  ;;  %v8173_v63 = vld [vmem:[#allocation58_spill] sm:$0xff]  ;;  %v8174_v33 = vld [vmem:[#allocation32_spill] sm:$0xff] }
 0x1a5   : > { %v1551_v61 = vadd.f32 %v1546_v14, %v1494_v45  ;;  %v1552_v52 = vadd.f32 %v1548_v28, %v1495_v29  ;;  %v8164_v35 = vrot.slane %v5950_v30, 5  ;;  %v8165_v7 = vrot.slane %v6095_v41, 5  ;;  %v8171_v45 = vld [vmem:[#allocation26_spill] sm:$0xff] }
 0x1a6   : > { %v6255_v5 = vsub.f32 %v6164_v23, %v8166_v3  ;;  %v6259_v19 = vsub.f32 %v6164_v23, %v8167_v56  ;;  %v6262_v47 = vmul.f32 %v3780_v54, %v6100_v49  ;;  %3795 = vrsqrt.f32 %v2094_v12  ;;  %v3790_v30 = vpop.eup %3789 }
 0x1a7   : > { %v1603_v37 = vsel %vm812_vm4, %v8164_v35, %v1602_v39  ;;  %v1605_v9 = vsel %vm812_vm4, %v1602_v39, %v8165_v7  ;;  %v8168_v38 = vrot.slane %v5957_v31, 6  ;;  %v6268_v6 = vmul.f32 %v3784_v34, %v6124_v2  ;;  %v3792_v43 = vpop.eup %3791  ;;  %v8172_v34 = vld [vmem:[#allocation37_spill] sm:$0xff]  ;;  %v8177_v35 = vld [vmem:[#allocation34_spill] sm:$0xff] }
 0x1a8   : > { %v1608_v27 = vadd.f32 %v1603_v37, %v1551_v61  ;;  %v1609_v4 = vadd.f32 %v1605_v9, %v1552_v52  ;;  %v2205_v44 = vmul.f32 %v6255_v5, %v6255_v5  ;;  %v2262_v22 = vmul.f32 %v6259_v19, %v6259_v19  ;;  %v8175_v61 = vld [vmem:[#allocation38_spill] sm:$0xff]  ;;  %v8176_v52 = vld [vmem:[#allocation59_spill] sm:$0xff] }
 0x1a9   : > { %v1660_v41 = vsel %vm747_vm3, %v8168_v38, %v1659_v48  ;;  %v1695_v49 = vmul.f32 %v3786_v57, %v6154_v11  ;;  %v6276_v54 = vmul.f32 %v3788_v17, %v6158_v50  ;;  %v6280_v31 = vsub.f32 %v6164_v23, %v8169_v0  ;;  %v6315_v7 = vld [vmem:[#allocation3 + $0x8] sm:$0xff]  ;;  %v8180_v38 = vld [vmem:[#allocation33_spill] sm:$0xff] }
 0x1aa   : > { %v1665_v36 = vadd.f32 %v1660_v41, %v1608_v27  ;;  %v8170_v2 = vrot.slane %v6107_v26, 6  ;;  %3797 = vrsqrt.f32 %v2151_v18  ;;  %v2208_v39 = vadd.f32 0.81, %v2205_v44  ;;  %v8178_v27 = vld [vmem:[#allocation47_spill] sm:$0xff]  ;;  %v8181_v41 = vld [vmem:[#allocation53_spill] sm:$0xff] }
 0x1ab   : > { %v6287_v29 = vsub.f32 %v5879_v24, %v8171_v45  ;;  %v6290_v11 = vmul.f32 %v3790_v30, %v6171_v62  ;;  %v2265_v50 = vadd.f32 0.81, %v2262_v22  ;;  %v2319_v12 = vmul.f32 %v6280_v31, %v6280_v31 }
 0x1ac   : > { %v1662_v13 = vsel %vm747_vm3, %v1659_v48, %v8170_v2  ;;  %v6295_v23 = vmul.f32 %v3792_v43, %v6180_v32  ;;  %v1841_v14 = vmul.f32 %v8173_v63, %v8172_v34  ;;  %v6303_v28 = vsub.f32 %v5879_v24, %v8174_v33  ;;  %v1991_v34 = vpop.permute.xlu1 %1990  ;;  %v8182_v63 = vld [vmem:[#allocation23_spill] sm:$0xff] }
 0x1ad   : > { %v1666_v16 = vadd.f32 %v1662_v13, %v1609_v4  ;;  %v1831_v26 = vmul.f32 %v6287_v29, %v6287_v29  ;;  %v1697_v57 = vadd.f32 %v1695_v49, %v1665_v36  ;;  %3799 = vrsqrt.f32 %v2208_v39  ;;  %v6307_v18 = vpop.eup %3793  ;;  %v8179_v4 = vld [vmem:[#allocation49_spill] sm:$0xff] }
 0x1ae   : > { %v2322_v62 = vadd.f32 0.81, %v2319_v12  ;;  %v1898_v48 = vmul.f32 %v8176_v52, %v8175_v61  ;;  %v1888_v17 = vmul.f32 %v6303_v28, %v6303_v28  ;;  %v6313_v37 = vsub.f32 %v5879_v24, %v8177_v35  ;;  %v8183_v61 = vld [vmem:[#allocation55_spill] sm:$0xff] }
 0x1af   : > { %v1834_v32 = vadd.f32 0.81, %v1831_v26  ;;  %v6319_v9 = vsub.f32 %v6315_v7, %v8134_v51  ;;  %3801 = vrsqrt.f32 %v2265_v50  ;;  %v1786_v30 = vsub.f32 %v8179_v4, %v8178_v27 }
 0x1b0   : > { %v1787_v44 = vsub.f32 %v8181_v41, %v8180_v38  ;;  %v6327_v22 = vsub.f32 %v6037_v10, %v8166_v3  ;;  %v1891_v43 = vadd.f32 0.81, %v1888_v17  ;;  %v1945_v36 = vmul.f32 %v6313_v37, %v6313_v37  ;;  %v3796_v2 = vpop.eup %3795  ;;  %v8184_v38 = vld [vmem:[#allocation24_spill] sm:$0xff] }
 0x1b1   : > { %3803 = vrsqrt.f32 %v1834_v32  ;;  %v1946_v49 = vmul.f32 %v6319_v9, %v6319_v9  ;;  %v6333_v13 = vmul.f32 %v1786_v30, %v1786_v30  ;;  %v1829_v52 = vmul.f32 %v8183_v61, %v8182_v63  ;;  %v8185_v41 = vld [vmem:[#allocation56_spill] sm:$0xff] }
 0x1b2   : > { %3805 = vrsqrt.f32 %v2322_v62  ;;  %v6335_v39 = vmul.f32 %v1787_v44, %v1787_v44  ;;  %v1819_v50 = vmul.f32 %v6327_v22, %v6327_v22  ;;  %v1948_v12 = vadd.f32 0.81, %v1945_v36 }
 0x1b3   : > { %3807 = vrsqrt.f32 %v1891_v43  ;;  %v1949_v26 = vadd.f32 0.81, %v1946_v49  ;;  %v1792_v32 = vadd.f32 0.1, %v6333_v13  ;;  %v6345_v62 = vsub.f32 %v6037_v10, %v8167_v56 }
 0x1b4   : > { %v1793_v17 = vadd.f32 0.1, %v6335_v39  ;;  %v1822_v27 = vadd.f32 0.81, %v1819_v50  ;;  %v3798_v4 = vpop.eup %3797  ;;  %3809 = vrsqrt.f32 %v1948_v12  ;;  %v1844_v30 = vsub.f32 %v1829_v52, %v1841_v14 }
 0x1b5   : > { %v1886_v44 = vmul.f32 %v8185_v41, %v8184_v38  ;;  %v6351_v43 = vsub.f32 %v6037_v10, %v8169_v0  ;;  %3811 = vrsqrt.f32 %v1949_v26  ;;  %v1876_v36 = vmul.f32 %v6345_v62, %v6345_v62 }
 0x1b6   : > { %v6357_v49 = vsub.f32 %v5871_v8, %v8149_v59  ;;  %v6360_v50 = vsub.f32 %v1991_v34, %v8102_v15  ;;  %3813 = vrcp.f32 %v1792_v32  ;;  %v6362_v14 = vmul.f32 %v1844_v30, %v1844_v30 }
 0x1b7   : > { %v1901_v12 = vsub.f32 %v1886_v44, %v1898_v48  ;;  %v1933_v63 = vmul.f32 %v6351_v43, %v6351_v43  ;;  %v6366_v10 = vpop.eup %3799  ;;  %v6369_v26 = vadd.f32 %v6150_v42, %v1666_v16  ;;  %3815 = vrcp.f32 %v1793_v17 }
 0x1b8   : > { %v1879_v61 = vadd.f32 0.81, %v1876_v36  ;;  %v1934_v8 = vmul.f32 %v6357_v49, %v6357_v49  ;;  %v6374_v52 = vmul.f32 %v3796_v2, %v6187_v40  ;;  %3817 = vrsqrt.f32 %v1822_v27  ;;  %v8186_v2 = vld [vmem:[#allocation5_spill] sm:$0xff] }
 0x1b9   : > { %v1850_v32 = vadd.f32 0.1, %v6362_v14  ;;  %v6377_v48 = vmul.f32 %v1901_v12, %v1901_v12  ;;  %v6379_v30 = vpop.eup %3801  ;;  %v1936_v38 = vadd.f32 0.81, %v1933_v63  ;;  %v2008_v42 = vmul.f32 %v6360_v50, %v6360_v50  ;;  %v8187_v63 = vld [vmem:[#allocation6_spill] sm:$0xff] }
 0x1ba   : > { %3819 = vrsqrt.f32 %v1879_v61  ;;  %v1937_v41 = vadd.f32 0.81, %v1934_v8  ;;  %v6384_v17 = vadd.f32 %v6202_v46, %v1697_v57  ;;  %v6388_v27 = vsub.f32 %v1991_v34, %v8186_v2 }
 0x1bb   : > { %v3804_v16 = vpop.eup %3803  ;;  %3821 = vrcp.f32 %v1850_v32  ;;  %v1907_v40 = vadd.f32 0.1, %v6377_v48  ;;  %v6391_v36 = vmul.f32 %v3798_v4, %v6215_v53  ;;  %v2010_v12 = vadd.f32 0.81, %v2008_v42 }
 0x1bc   : > { %v3806_v44 = vpop.eup %3805  ;;  %3823 = vrsqrt.f32 %v1936_v38  ;;  %v6394_v61 = vsub.f32 %v1991_v34, %v8187_v63  ;;  %v2046_v46 = vmul.f32 %v6388_v27, %v6388_v27  ;;  %v6399_v57 = vsub.f32 %v1991_v34, %v5879_v24 }
 0x1bd   : > { %v3808_v8 = vpop.eup %3807  ;;  %3825 = vrcp.f32 %v1907_v40  ;;  %v6402_v32 = vsub.f32 %v1991_v34, %v8171_v45  ;;  %v1840_v2 = vmul.f32 %v3804_v16, %v6287_v29  ;;  %v6408_v4 = vsub.f32 %v1991_v34, %v8174_v33 }
 0x1be   : > { %3827 = vrsqrt.f32 %v1937_v41  ;;  %v2103_v53 = vmul.f32 %v6394_v61, %v6394_v61  ;;  %v3810_v38 = vpop.eup %3809  ;;  %v2049_v42 = vadd.f32 0.81, %v2046_v46  ;;  %v2160_v40 = vmul.f32 %v6399_v57, %v6399_v57 }
 0x1bf   : > { %3829 = vrsqrt.f32 %v2010_v12  ;;  %v2217_v24 = vmul.f32 %v6402_v32, %v6402_v32  ;;  %v3812_v45 = vpop.eup %3811  ;;  %v1897_v63 = vmul.f32 %v3808_v8, %v6303_v28  ;;  %v2274_v41 = vmul.f32 %v6408_v4, %v6408_v4  ;;  %v6424_v8 = vpop.permute.xlu0 %1988 }
 0x1c0   : > { %v2106_v29 = vadd.f32 0.81, %v2103_v53  ;;  %v6418_v16 = vsub.f32 %v1991_v34, %v8177_v35  ;;  %v3814_v33 = vpop.eup %3813  ;;  %v1954_v12 = vmul.f32 %v3810_v38, %v6313_v37  ;;  %3831 = vrsqrt.f32 %v2049_v42  ;;  %v8188_v38 = vld [vmem:[#allocation10_spill] sm:$0xff] }
 0x1c1   : > { %v2163_v46 = vadd.f32 0.81, %v2160_v40  ;;  %v2220_v15 = vadd.f32 0.81, %v2217_v24  ;;  %v3816_v0 = vpop.eup %3815  ;;  %v1798_v56 = vmul.f32 %v3814_v33, %v6333_v13  ;;  %v2277_v3 = vadd.f32 0.81, %v2274_v41 }
 0x1c2   : > { %3833 = vrsqrt.f32 %v2106_v29  ;;  %v2331_v28 = vmul.f32 %v6418_v16, %v6418_v16  ;;  %v3818_v53 = vpop.eup %3817  ;;  %v6427_v34 = vmul.f32 %v3816_v0, %v6335_v39  ;;  %v6431_v37 = vsub.f32 %v6424_v8, %v8116_v60 }
 0x1c3   : > { %3835 = vrsqrt.f32 %v2163_v46  ;;  %v6435_v42 = vsub.f32 %v6424_v8, %v8188_v38  ;;  %v1804_v13 = vrot.slane %v1798_v56, 2  ;;  %v1828_v40 = vmul.f32 %v3818_v53, %v6327_v22 }
 0x1c4   : > { %v3820_v33 = vpop.eup %3819  ;;  %3837 = vrsqrt.f32 %v2220_v15  ;;  %v2334_v24 = vadd.f32 0.81, %v2331_v28  ;;  %v2036_v39 = vmul.f32 %v6431_v37, %v6431_v37  ;;  %v2214_v60 = vmul.f32 %v6366_v10, %v6255_v5 }
 0x1c5   : > { %v3822_v29 = vpop.eup %3821  ;;  %v1885_v0 = vmul.f32 %v3820_v33, %v6345_v62  ;;  %3839 = vrsqrt.f32 %v2277_v3  ;;  %v1955_v35 = vmul.f32 %v3812_v45, %v6319_v9  ;;  %v1843_v56 = vsub.f32 %v1828_v40, %v1840_v2 }
 0x1c6   : > { %v3824_v46 = vpop.eup %3823  ;;  %3841 = vrsqrt.f32 %v2334_v24  ;;  %v2039_v53 = vadd.f32 0.81, %v2036_v39  ;;  %v2093_v62 = vmul.f32 %v6435_v42, %v6435_v42  ;;  %v2271_v33 = vmul.f32 %v6379_v30, %v6259_v19 }
 0x1c7   : > { %v3826_v22 = vpop.eup %3825  ;;  %v1900_v15 = vsub.f32 %v1885_v0, %v1897_v63  ;;  %v1942_v28 = vmul.f32 %v3824_v46, %v6351_v43  ;;  %v2328_v41 = vmul.f32 %v3806_v44, %v6280_v31  ;;  %v6451_v59 = vmul.f32 %v1843_v56, %v1843_v56 }
 0x1c8   : > { %v3828_v3 = vpop.eup %3827  ;;  %v6454_v5 = vmul.f32 %v3822_v29, %v6362_v14  ;;  %v8189_v9 = vrot.slane %v6427_v34, 2  ;;  %v6464_v19 = vmul.f32 %v3826_v22, %v6377_v48  ;;  %3843 = vrsqrt.f32 %v2039_v53 }
 0x1c9   : > { %v3830_v45 = vpop.eup %3829  ;;  %v6459_v10 = vmul.f32 %v1900_v15, %v1900_v15  ;;  %v1943_v2 = vmul.f32 %v3828_v3, %v6357_v49  ;;  %v1957_v63 = vsub.f32 %v1942_v28, %v1954_v12  ;;  %v1849_v40 = vadd.f32 0.1, %v6451_v59 }
 0x1ca   : > { %v1806_v43 = vsel %vm467_vm0, %v1804_v13, %v8189_v9  ;;  %v2014_v31 = vmul.f32 %v3830_v45, %v6360_v50  ;;  %v3832_v14 = vpop.eup %3831  ;;  %v2096_v13 = vadd.f32 0.81, %v2093_v62  ;;  %v6474_v48 = vsub.f32 %v6424_v8, %v5906_v1 }
 0x1cb   : > { %v1906_v30 = vadd.f32 0.1, %v6459_v10  ;;  %v1958_v44 = vsub.f32 %v1943_v2, %v1955_v35  ;;  %v6468_v24 = vmul.f32 %v1957_v63, %v1957_v63  ;;  %3845 = vrcp.f32 %v1849_v40 }
 0x1cc   : > { %v3834_v29 = vpop.eup %3833  ;;  %v2016_v49 = vsub.f32 %v6290_v11, %v2014_v31  ;;  %v2055_v12 = vmul.f32 %v3832_v14, %v6388_v27  ;;  %v8190_v27 = vld [vmem:[#allocation11_spill] sm:$0xff] }
 0x1cd   : > { %v3836_v0 = vpop.eup %3835  ;;  %3847 = vrcp.f32 %v1906_v30  ;;  %v6476_v50 = vmul.f32 %v1958_v44, %v1958_v44  ;;  %v1963_v39 = vadd.f32 0.1, %v6468_v24  ;;  %v2112_v35 = vmul.f32 %v3834_v29, %v6394_v61 }
 0x1ce   : > { %v3838_v46 = vpop.eup %3837  ;;  %v6480_v56 = vmul.f32 %v2016_v49, %v2016_v49  ;;  %v2058_v22 = vsub.f32 %v6295_v23, %v2055_v12  ;;  %v2169_v11 = vmul.f32 %v3836_v0, %v6399_v57  ;;  %v6486_v15 = vsub.f32 %v6424_v8, %v8190_v27 }
 0x1cf   : > { %v3840_v1 = vpop.eup %3839  ;;  %v1964_v28 = vadd.f32 0.1, %v6476_v50  ;;  %3849 = vrcp.f32 %v1963_v39  ;;  %v2115_v53 = vsub.f32 %v6374_v52, %v2112_v35  ;;  %v2226_v62 = vmul.f32 %v3838_v46, %v6402_v32  ;;  %v8191_v39 = vld [vmem:[#allocation12_spill] sm:$0xff] }
 0x1d0   : > { %v3842_v61 = vpop.eup %3841  ;;  %v2020_v3 = vadd.f32 0.1, %v6480_v56  ;;  %v6492_v45 = vmul.f32 %v2058_v22, %v2058_v22  ;;  %v2172_v23 = vsub.f32 %v6391_v36, %v2169_v11  ;;  %v2283_v57 = vmul.f32 %v3840_v1, %v6408_v4  ;;  %v8192_v22 = vld [vmem:[#allocation17_spill] sm:$0xff] }
 0x1d1   : > { %3851 = vrcp.f32 %v1964_v28  ;;  %v6496_v9 = vmul.f32 %v2115_v53, %v2115_v53  ;;  %v2229_v2 = vsub.f32 %v2214_v60, %v2226_v62  ;;  %v2340_v63 = vmul.f32 %v3842_v61, %v6418_v16  ;;  %v6531_v53 = vpop.permute.xlu1 %1994 }
 0x1d2   : > { %v2064_v40 = vadd.f32 0.1, %v6492_v45  ;;  %v6500_v52 = vmul.f32 %v2172_v23, %v2172_v23  ;;  %v2286_v32 = vsub.f32 %v2271_v33, %v2283_v57  ;;  %3853 = vrsqrt.f32 %v2096_v13  ;;  %v6507_v4 = vpop.eup %3843 }
 0x1d3   : > { %3855 = vrcp.f32 %v2020_v3  ;;  %v2121_v31 = vadd.f32 0.1, %v6496_v9  ;;  %v6503_v14 = vmul.f32 %v2229_v2, %v2229_v2  ;;  %v2150_v36 = vmul.f32 %v6474_v48, %v6474_v48 }
 0x1d4   : > { %v1811_v60 = vadd.f32 %v1806_v43, %v6384_v17  ;;  %3857 = vrcp.f32 %v2064_v40  ;;  %v2178_v16 = vadd.f32 0.1, %v6500_v52  ;;  %v6511_v30 = vmul.f32 %v2286_v32, %v2286_v32 }
 0x1d5   : > { %v7949_v33 = vrot.slane %v6454_v5, 4  ;;  %3859 = vrcp.f32 %v2121_v31  ;;  %v2235_v44 = vadd.f32 0.1, %v6503_v14  ;;  %v2343_v13 = vsub.f32 %v2328_v41, %v2340_v63  ;;  %v3846_v29 = vpop.eup %3845 }
 0x1d6   : > { %v2292_v49 = vadd.f32 0.1, %v6511_v30  ;;  %v2153_v12 = vadd.f32 0.81, %v2150_v36  ;;  %v2207_v0 = vmul.f32 %v6486_v15, %v6486_v15  ;;  %v6520_v17 = vsub.f32 %v6424_v8, %v8191_v39 }
 0x1d7   : > { %v3848_v43 = vpop.eup %3847  ;;  %v1855_v35 = vmul.f32 %v3846_v29, %v6451_v59  ;;  %v7948_v46 = vrot.slane %v6464_v19, 5  ;;  %3861 = vrcp.f32 %v2178_v16  ;;  %v6526_v41 = vsub.f32 %v6424_v8, %v8192_v22 }
 0x1d8   : > { %v1912_v11 = vmul.f32 %v3848_v43, %v6459_v10  ;;  %3863 = vrcp.f32 %v2235_v44  ;;  %v2210_v1 = vadd.f32 0.81, %v2207_v0  ;;  %v2264_v28 = vmul.f32 %v6520_v17, %v6520_v17 }
 0x1d9   : > { %v3850_v62 = vpop.eup %3849  ;;  %v1861_v61 = vrot.slane %v1855_v35, 4  ;;  %3865 = vrcp.f32 %v2292_v49  ;;  %v6533_v59 = vmul.f32 %v2343_v13, %v2343_v13  ;;  %v2321_v3 = vmul.f32 %v6526_v41, %v6526_v41  ;;  %v8193_v49 = vld [vmem:[#allocation21_spill] sm:$0xff]  ;;  %v6559_v35 = vld [vmem:[#allocation3 + $0x10] sm:$0x3f] }
 0x1da   : > { %v1918_v23 = vrot.slane %v1912_v11, 5  ;;  %v1969_v8 = vmul.f32 %v3850_v62, %v6468_v24  ;;  %3867 = vrsqrt.f32 %v2153_v12  ;;  %v2267_v10 = vadd.f32 0.81, %v2264_v28  ;;  %8194 = vst [vmem:[#allocation65_spill] sm:$0xff] %v6559_v35 }
 0x1db   : > { %v3852_v57 = vpop.eup %3851  ;;  %v1863_v2 = vsel %vm737_vm6, %v1861_v61, %v7949_v33  ;;  %3869 = vrsqrt.f32 %v2210_v1  ;;  %v2324_v63 = vadd.f32 0.81, %v2321_v3  ;;  %v6543_v40 = vsub.f32 %v6531_v53, %v8122_v55  ;;  %v8195_v61 = vld [vmem:[#allocation25_spill] sm:$0xff] }
 0x1dc   : > { %v3854_v32 = vpop.eup %3853  ;;  %v1868_v31 = vadd.f32 %v1863_v2, %v1811_v60  ;;  %v1920_v36 = vsel %vm812_vm4, %v1918_v23, %v7948_v46  ;;  %v6549_v24 = vmul.f32 %v3852_v57, %v6476_v50  ;;  %v1975_v16 = vrot.slane %v1969_v8, 6 }
 0x1dd   : > { %v3856_v44 = vpop.eup %3855  ;;  %v2349_v13 = vadd.f32 0.1, %v6533_v59  ;;  %3871 = vrsqrt.f32 %v2267_v10  ;;  %v2048_v29 = vmul.f32 %v6543_v40, %v6543_v40  ;;  %v6556_v12 = vsub.f32 %v6531_v53, %v8193_v49 }
 0x1de   : > { %v3858_v60 = vpop.eup %3857  ;;  %v1925_v0 = vadd.f32 %v1920_v36, %v1868_v31  ;;  %v7947_v43 = vrot.slane %v6549_v24, 6  ;;  %3873 = vrsqrt.f32 %v2324_v63  ;;  %v6563_v50 = vsub.f32 %v6531_v53, %v6559_v35  ;;  %v8196_v63 = vld [vmem:[#allocation63_spill] sm:$0xff] }
 0x1df   : > { %v3860_v11 = vpop.eup %3859  ;;  %v6566_v1 = vmul.f32 %v3858_v60, %v6492_v45  ;;  %v2051_v28 = vadd.f32 0.81, %v2048_v29  ;;  %v2105_v62 = vmul.f32 %v6556_v12, %v6556_v12  ;;  %v6572_v3 = vsub.f32 %v6531_v53, %v8195_v61 }
 0x1e0   : > { %v1977_v23 = vsel %vm747_vm3, %v1975_v16, %v7947_v43  ;;  %v6578_v8 = vmul.f32 %v3860_v11, %v6496_v9  ;;  %v2162_v10 = vmul.f32 %v6563_v50, %v6563_v50  ;;  %v6584_v45 = vsub.f32 %v6531_v53, %v8073_v20  ;;  %v8206_v20 = vld [vmem:[#allocation45_spill] sm:$0xff] }
 0x1e1   : > { %v3862_v57 = vpop.eup %3861  ;;  %v6588_v2 = vadd.f32 %v6192_v58, %v6369_v26  ;;  %v6592_v31 = vmul.f32 %v6307_v18, %v8196_v63  ;;  %v1982_v36 = vadd.f32 %v1977_v23, %v1925_v0  ;;  %3875 = vrsqrt.f32 %v2051_v28  ;;  %v6624_v63 = vld [vmem:[#allocation2 + $0x10] sm:$0x3f] }
 0x1e2   : > { %v3864_v9 = vpop.eup %3863  ;;  %3877 = vrcp.f32 %v2349_v13  ;;  %v2045_v16 = vmul.f32 %v6507_v4, %v6431_v37  ;;  %v2108_v29 = vadd.f32 0.81, %v2105_v62  ;;  %v2165_v60 = vadd.f32 0.81, %v2162_v10  ;;  %v8203_v13 = vld [vmem:[#allocation54_spill] sm:$0xff] }
 0x1e3   : > { %v6596_v11 = vpop.eup %3865  ;;  %v2024_v43 = vmul.f32 %v3856_v44, %v6480_v56  ;;  %v6601_v26 = vmul.f32 %v3854_v32, %v6435_v42  ;;  %v2219_v18 = vmul.f32 %v6572_v3, %v6572_v3  ;;  %v6607_v28 = vmul.f32 %v3862_v57, %v6500_v52  ;;  %v8197_v52 = vld [vmem:[#allocation28_spill] sm:$0xff] }
 0x1e4   : > { %v3868_v0 = vpop.eup %3867  ;;  %3879 = vrsqrt.f32 %v2108_v29  ;;  %v2276_v37 = vmul.f32 %v6584_v45, %v6584_v45  ;;  %v6614_v44 = vmul.f32 %v3864_v9, %v6503_v14  ;;  %v6622_v10 = vsub.f32 %v6531_v53, %v8197_v52 }
 0x1e5   : > { %v3870_v4 = vpop.eup %3869  ;;  %v6611_v56 = vadd.f32 %v2024_v43, %v1982_v36  ;;  %3881 = vrsqrt.f32 %v2165_v60  ;;  %v2222_v42 = vadd.f32 0.81, %v2219_v18  ;;  %v2159_v32 = vmul.f32 %v3868_v0, %v6474_v48  ;;  %v8198_v48 = vld [vmem:[#allocation60_spill] sm:$0xff]  ;;  %v8200_v60 = vld [vmem:[#allocation61_spill] sm:$0xff]  ;;  %v8201_v18 = vld [vmem:[#allocation51_spill] sm:$0xff] }
 0x1e6   : > { %v6618_v62 = vmul.f32 %v3870_v4, %v6486_v15  ;;  %v2279_v23 = vadd.f32 0.81, %v2276_v37  ;;  %v6628_v14 = vsub.f32 %v6624_v63, %v8188_v38  ;;  %v6632_v43 = vsub.f32 %v6559_v35, %v8193_v49  ;;  %v8199_v15 = vld [vmem:[#allocation50_spill] sm:$0xff]  ;;  %v6641_v37 = vpop.permute.xlu0 %1992 }
 0x1e7   : > { %v3872_v57 = vpop.eup %3871  ;;  %3883 = vrsqrt.f32 %v2222_v42  ;;  %v1845_v36 = vsub.f32 %v8199_v15, %v8198_v48  ;;  %v2333_v53 = vmul.f32 %v6622_v10, %v6622_v10  ;;  %v1902_v0 = vsub.f32 %v8201_v18, %v8200_v60  ;;  %v8204_v60 = vld [vmem:[#allocation29_spill] sm:$0xff] }
 0x1e8   : > { %v3874_v9 = vpop.eup %3873  ;;  %v2273_v29 = vmul.f32 %v3872_v57, %v6520_v17  ;;  %3885 = vrsqrt.f32 %v2279_v23  ;;  %v1764_v42 = vmul.f32 %v6628_v14, %v6628_v14  ;;  %v1776_v48 = vmul.f32 %v6632_v43, %v6632_v43  ;;  %v8202_v57 = vld [vmem:[#allocation22_spill] sm:$0xff]  ;;  %v8205_v18 = vld [vmem:[#allocation57_spill] sm:$0xff] }
 0x1e9   : > { %v6644_v4 = vmul.f32 %v3874_v9, %v6526_v41  ;;  %v6650_v15 = vmul.f32 %v1845_v36, %v1845_v36  ;;  %v2336_v17 = vadd.f32 0.81, %v2333_v53  ;;  %v6652_v23 = vmul.f32 %v1902_v0, %v1902_v0 }
 0x1ea   : > { %v1944_v58 = vmul.f32 %v8203_v13, %v8202_v57  ;;  %v1956_v46 = vmul.f32 %v8205_v18, %v8204_v60  ;;  %v1767_v41 = vadd.f32 0.81, %v1764_v42  ;;  %v1779_v9 = vadd.f32 0.81, %v1776_v48  ;;  %v8207_v42 = vld [vmem:[#allocation30_spill] sm:$0xff]  ;;  %v8208_v60 = vld [vmem:[#allocation31_spill] sm:$0xff] }
 0x1eb   : > { %v3876_v33 = vpop.eup %3875  ;;  %v1851_v52 = vadd.f32 0.1, %v6650_v15  ;;  %v6661_v61 = vsub.f32 %v6641_v37, %v8206_v20  ;;  %3887 = vrsqrt.f32 %v2336_v17  ;;  %v1908_v0 = vadd.f32 0.1, %v6652_v23 }
 0x1ec   : > { %v6663_v36 = vpop.eup %3877  ;;  %v2057_v53 = vmul.f32 %v3876_v33, %v6543_v40  ;;  %v1959_v13 = vsub.f32 %v1944_v58, %v1956_v46  ;;  %3889 = vrsqrt.f32 %v1767_v41  ;;  %v6671_v48 = vsub.f32 %v6641_v37, %v8207_v42 }
 0x1ed   : > { %v2009_v57 = vmul.f32 %v6661_v61, %v6661_v61  ;;  %v6675_v18 = vsub.f32 %v6641_v37, %v8208_v60  ;;  %3891 = vrsqrt.f32 %v1779_v9  ;;  %v6681_v46 = vsub.f32 %v6641_v37, %v6315_v7 }
 0x1ee   : > { %v3880_v20 = vpop.eup %3879  ;;  %v2060_v35 = vsub.f32 %v2045_v16, %v2057_v53  ;;  %v6677_v33 = vmul.f32 %v1959_v13, %v1959_v13  ;;  %3893 = vrcp.f32 %v1851_v52  ;;  %v2047_v41 = vmul.f32 %v6671_v48, %v6671_v48 }
 0x1ef   : > { %v3882_v40 = vpop.eup %3881  ;;  %v2114_v58 = vmul.f32 %v3880_v20, %v6556_v12  ;;  %v2011_v17 = vadd.f32 0.81, %v2009_v57  ;;  %3895 = vrcp.f32 %v1908_v0  ;;  %v2104_v20 = vmul.f32 %v6675_v18, %v6675_v18 }
 0x1f0   : > { %v6686_v42 = vmul.f32 %v2060_v35, %v2060_v35  ;;  %v2171_v60 = vmul.f32 %v3882_v40, %v6563_v50  ;;  %v1965_v16 = vadd.f32 0.1, %v6677_v33  ;;  %v2050_v7 = vadd.f32 0.81, %v2047_v41 }
 0x1f1   : > { %v3884_v9 = vpop.eup %3883  ;;  %v2117_v53 = vsub.f32 %v6601_v26, %v2114_v58  ;;  %3897 = vrsqrt.f32 %v2011_v17  ;;  %v2107_v0 = vadd.f32 0.81, %v2104_v20  ;;  %v2161_v58 = vmul.f32 %v6681_v46, %v6681_v46 }
 0x1f2   : > { %v3886_v12 = vpop.eup %3885  ;;  %v2066_v52 = vadd.f32 0.1, %v6686_v42  ;;  %v2174_v13 = vsub.f32 %v2159_v32, %v2171_v60  ;;  %v2228_v35 = vmul.f32 %v3884_v9, %v6572_v3  ;;  %3899 = vrcp.f32 %v1965_v16  ;;  %v8209_v3 = vld [vmem:[#allocation35_spill] sm:$0xff] }
 0x1f3   : > { %v6695_v57 = vmul.f32 %v2117_v53, %v2117_v53  ;;  %v2285_v50 = vmul.f32 %v3886_v12, %v6584_v45  ;;  %3901 = vrsqrt.f32 %v2050_v7  ;;  %v6706_v60 = vsub.f32 %v6641_v37, %v8209_v3  ;;  %v8210_v53 = vld [vmem:[#allocation36_spill] sm:$0xff] }
 0x1f4   : > { %3903 = vrcp.f32 %v2066_v52  ;;  %v6698_v26 = vmul.f32 %v2174_v13, %v2174_v13  ;;  %v2231_v40 = vsub.f32 %v6618_v62, %v2228_v35  ;;  %v2164_v9 = vadd.f32 0.81, %v2161_v58 }
 0x1f5   : > { %v2123_v17 = vadd.f32 0.1, %v6695_v57  ;;  %v2288_v32 = vsub.f32 %v2273_v29, %v2285_v50  ;;  %3905 = vrsqrt.f32 %v2107_v0  ;;  %v3888_v41 = vpop.eup %3887  ;;  %v6713_v62 = vsub.f32 %v6641_v37, %v8210_v53 }
 0x1f6   : > { %v2180_v45 = vadd.f32 0.1, %v6698_v26  ;;  %v6709_v16 = vmul.f32 %v2231_v40, %v2231_v40  ;;  %v3890_v7 = vpop.eup %3889  ;;  %v2342_v29 = vmul.f32 %v3888_v41, %v6622_v10  ;;  %v2218_v12 = vmul.f32 %v6706_v60, %v6706_v60 }
 0x1f7   : > { %3907 = vrcp.f32 %v2123_v17  ;;  %v3892_v52 = vpop.eup %3891  ;;  %v6721_v13 = vmul.f32 %v6596_v11, %v6511_v30  ;;  %v6723_v35 = vmul.f32 %v2288_v32, %v2288_v32  ;;  %v1773_v50 = vmul.f32 %v3890_v7, %v6628_v14  ;;  %v6863_v14 = vpop.permute.xlu0 %2370 }
 0x1f8   : > { %v2275_v0 = vmul.f32 %v6713_v62, %v6713_v62  ;;  %v3894_v40 = vpop.eup %3893  ;;  %v2237_v58 = vadd.f32 0.1, %v6709_v16  ;;  %v2345_v10 = vsub.f32 %v6644_v4, %v2342_v29  ;;  %v1785_v17 = vmul.f32 %v3892_v52, %v6632_v43 }
 0x1f9   : > { %3909 = vrsqrt.f32 %v2164_v9  ;;  %v3896_v41 = vpop.eup %3895  ;;  %v1857_v30 = vmul.f32 %v3894_v40, %v6650_v15  ;;  %v2221_v11 = vadd.f32 0.81, %v2218_v12  ;;  %v6735_v7 = vmul.f32 %v6663_v36, %v6533_v59 }
 0x1fa   : > { %3911 = vrcp.f32 %v2180_v45  ;;  %v2278_v32 = vadd.f32 0.81, %v2275_v0  ;;  %v6737_v53 = vmul.f32 %v2345_v10, %v2345_v10  ;;  %v1788_v3 = vsub.f32 %v1773_v50, %v1785_v17  ;;  %v8211_v50 = vld [vmem:[#allocation64_spill] sm:$0xff] }
 0x1fb   : > { %v3898_v20 = vpop.eup %3897  ;;  %v2294_v43 = vadd.f32 0.1, %v6723_v35  ;;  %v1914_v9 = vmul.f32 %v3896_v41, %v6652_v23  ;;  %3913 = vrsqrt.f32 %v2221_v11  ;;  %v6747_v59 = vsub.f32 %v6641_v37, %v8134_v51 }
 0x1fc   : > { %v3900_v4 = vpop.eup %3899  ;;  %v2015_v45 = vmul.f32 %v3898_v20, %v6661_v61  ;;  %3915 = vrcp.f32 %v2237_v58  ;;  %v6742_v29 = vmul.f32 %v1788_v3, %v1788_v3  ;;  %v1864_v52 = vrot.slane %v1857_v30, 4  ;;  %v8218_v20 = vld [vmem:[#allocation18_spill] sm:$0xff] }
 0x1fd   : > { %v3902_v15 = vpop.eup %3901  ;;  %v1971_v12 = vmul.f32 %v3900_v4, %v6677_v33  ;;  %3917 = vrsqrt.f32 %v2278_v32  ;;  %v2351_v3 = vadd.f32 0.1, %v6737_v53  ;;  %v1921_v58 = vrot.slane %v1914_v9, 5 }
 0x1fe   : > { %v3904_v36 = vpop.eup %3903  ;;  %v2017_v0 = vsub.f32 %v8211_v50, %v2015_v45  ;;  %v2056_v40 = vmul.f32 %v3902_v15, %v6671_v48  ;;  %v1794_v33 = vadd.f32 0.1, %v6742_v29  ;;  %3919 = vrcp.f32 %v2294_v43  ;;  %v8213_v45 = vld [vmem:[#allocation42_spill] sm:$0xff] }
 0x1ff   : > { %v3906_v23 = vpop.eup %3905  ;;  %v6758_v41 = vmul.f32 %v3904_v36, %v6686_v42  ;;  %v1978_v48 = vrot.slane %v1971_v12, 6  ;;  %v2332_v30 = vmul.f32 %v6747_v59, %v6747_v59  ;;  %v8212_v11 = vrot.slane %v6454_v5, 4  ;;  %v8214_v12 = vld [vmem:[#allocation13_spill] sm:$0xff] }
 0x200   : > { %v2059_v37 = vsub.f32 %v6227_v25, %v2056_v40  ;;  %v2113_v10 = vmul.f32 %v3906_v23, %v6675_v18  ;;  %3921 = vrcp.f32 %v1794_v33  ;;  %v6767_v4 = vmul.f32 %v2017_v0, %v2017_v0  ;;  %v6772_v18 = vpop.permute.xlu1 %2372 }
 0x201   : > { %v3908_v17 = vpop.eup %3907  ;;  %v6765_v32 = vsel %vm737_vm6, %v8212_v11, %v1864_v52  ;;  %3923 = vrcp.f32 %v2351_v3  ;;  %v2335_v9 = vadd.f32 0.81, %v2332_v30  ;;  %v6776_v15 = vsub.f32 %v6772_v18, %v8213_v45 }
 0x202   : > { %v6769_v43 = vmul.f32 %v2059_v37, %v2059_v37  ;;  %v2116_v25 = vsub.f32 %v6245_v21, %v2113_v10  ;;  %v6780_v5 = vsub.f32 %v6772_v18, %v8214_v12  ;;  %v6783_v52 = vmul.f32 %v3908_v17, %v6695_v57 }
 0x203   : > { %v3910_v42 = vpop.eup %3909  ;;  %v8215_v50 = vrot.slane %v6464_v19, 5  ;;  %v8216_v3 = vrot.slane %v6549_v24, 6  ;;  %3925 = vrsqrt.f32 %v2335_v9  ;;  %v2021_v19 = vadd.f32 0.1, %v6767_v4  ;;  %v8217_v9 = vld [vmem:[#allocation14_spill] sm:$0xff] }
 0x204   : > { %v3912_v36 = vpop.eup %3911  ;;  %v2065_v0 = vadd.f32 0.1, %v6769_v43  ;;  %v6791_v40 = vmul.f32 %v2116_v25, %v2116_v25  ;;  %v2170_v37 = vmul.f32 %v3910_v42, %v6681_v46  ;;  %v2387_v10 = vmul.f32 %v6776_v15, %v6776_v15 }
 0x205   : > { %v6788_v21 = vsel %vm812_vm4, %v8215_v50, %v1921_v58  ;;  %v6797_v33 = vsel %vm747_vm3, %v8216_v3, %v1978_v48  ;;  %v3914_v57 = vpop.eup %3913  ;;  %v6805_v30 = vmul.f32 %v3912_v36, %v6698_v26  ;;  %v2421_v46 = vmul.f32 %v6780_v5, %v6780_v5 }
 0x206   : > { %3927 = vrcp.f32 %v2065_v0  ;;  %v2122_v58 = vadd.f32 0.1, %v6791_v40  ;;  %v3916_v17 = vpop.eup %3915  ;;  %v2173_v24 = vsub.f32 %v6262_v47, %v2170_v37  ;;  %v2227_v48 = vmul.f32 %v3914_v57, %v6706_v60  ;;  %v6825_v57 = vld [vmem:[#allocation2 + $0x8] sm:$0xff] }
 0x207   : > { %v3918_v11 = vpop.eup %3917  ;;  %v2389_v42 = vadd.f32 0.81, %v2387_v10  ;;  %v6814_v50 = vsub.f32 %v6772_v18, %v8217_v9  ;;  %v2424_v36 = vadd.f32 0.81, %v2421_v46  ;;  %v6821_v3 = vmul.f32 %v3916_v17, %v6709_v16 }
 0x208   : > { %3929 = vrcp.f32 %v2122_v58  ;;  %v6816_v0 = vmul.f32 %v2173_v24, %v2173_v24  ;;  %v2230_v26 = vsub.f32 %v6268_v6, %v2227_v48  ;;  %v2284_v47 = vmul.f32 %v3918_v11, %v6713_v62  ;;  %v3920_v60 = vpop.eup %3919 }
 0x209   : > { %3931 = vrcp.f32 %v2021_v19  ;;  %v2478_v37 = vmul.f32 %v6814_v50, %v6814_v50  ;;  %v6829_v58 = vsub.f32 %v6772_v18, %v6825_v57 }
 0x20a   : > { %v3922_v10 = vpop.eup %3921  ;;  %v2179_v6 = vadd.f32 0.1, %v6816_v0  ;;  %v6832_v24 = vmul.f32 %v2230_v26, %v2230_v26  ;;  %v2287_v62 = vsub.f32 %v6276_v54, %v2284_v47  ;;  %3933 = vrsqrt.f32 %v2389_v42  ;;  %v8219_v42 = vld [vmem:[#allocation19_spill] sm:$0xff] }
 0x20b   : > { %v1800_v16 = vmul.f32 %v3922_v10, %v6742_v29  ;;  %3935 = vrsqrt.f32 %v2424_v36  ;;  %v2481_v19 = vadd.f32 0.81, %v2478_v37  ;;  %v2535_v17 = vmul.f32 %v6829_v58, %v6829_v58  ;;  %v3924_v48 = vpop.eup %3923 }
 0x20c   : > { %3937 = vrcp.f32 %v2179_v6  ;;  %v2236_v46 = vadd.f32 0.1, %v6832_v24  ;;  %v6839_v11 = vmul.f32 %v2287_v62, %v2287_v62  ;;  %v6843_v26 = vsub.f32 %v6772_v18, %v8218_v20 }
 0x20d   : > { %v1807_v61 = vrot.slane %v1800_v16, 2  ;;  %3939 = vrsqrt.f32 %v2481_v19  ;;  %v2538_v54 = vadd.f32 0.81, %v2535_v17  ;;  %v6847_v29 = vsub.f32 %v6772_v18, %v8219_v42  ;;  %v3926_v47 = vpop.eup %3925 }
 0x20e   : > { %v6850_v36 = vmul.f32 %v3920_v60, %v6723_v35  ;;  %3941 = vrcp.f32 %v2236_v46  ;;  %v2293_v37 = vadd.f32 0.1, %v6839_v11  ;;  %v2592_v10 = vmul.f32 %v6843_v26, %v6843_v26 }
 0x20f   : > { %v8220_v62 = vrot.slane %v6427_v34, 2  ;;  %v2341_v19 = vmul.f32 %v3926_v47, %v6747_v59  ;;  %3943 = vrsqrt.f32 %v2538_v54  ;;  %v2649_v17 = vmul.f32 %v6847_v29, %v6847_v29  ;;  %v8222_v54 = vld [vmem:[#allocation41_spill] sm:$0xff] }
 0x210   : > { %v3928_v6 = vpop.eup %3927  ;;  %3945 = vrcp.f32 %v2293_v37  ;;  %v2595_v46 = vadd.f32 0.81, %v2592_v10  ;;  %v6866_v23 = vmul.f32 %v3924_v48, %v6737_v53  ;;  %v6875_v47 = vsub.f32 %v6863_v14, %v8222_v54 }
 0x211   : > { %v1808_v16 = vsel %vm467_vm0, %v8220_v62, %v1807_v61  ;;  %v2071_v60 = vmul.f32 %v3928_v6, %v6769_v43  ;;  %v2344_v34 = vsub.f32 %v6592_v31, %v2341_v19  ;;  %v8221_v61 = vld [vmem:[#allocation43_spill] sm:$0xff]  ;;  %v2652_v10 = vadd.f32 0.81, %v2649_v17 }
 0x212   : > { %v1812_v35 = vadd.f32 %v1808_v16, %v6588_v2  ;;  %v3930_v25 = vpop.eup %3929  ;;  %v6871_v59 = vsub.f32 %v6772_v18, %v8221_v61  ;;  %v2193_v53 = vrot.slane %v6805_v30, 3  ;;  %3947 = vrsqrt.f32 %v2595_v46 }
 0x213   : > { %v2077_v43 = vrot.slane %v2071_v60, 1  ;;  %v2128_v37 = vmul.f32 %v3930_v25, %v6791_v40  ;;  %v3932_v6 = vpop.eup %3931  ;;  %v6880_v48 = vmul.f32 %v2344_v34, %v2344_v34  ;;  %v2386_v31 = vmul.f32 %v6875_v47, %v6875_v47 }
 0x214   : > { %v1869_v2 = vadd.f32 %v6765_v32, %v1812_v35  ;;  %v3934_v18 = vpop.eup %3933  ;;  %v2250_v62 = vrot.slane %v6821_v3, 4  ;;  %v8223_v25 = vrot.slane %v6566_v1, 1  ;;  %v2706_v60 = vmul.f32 %v6871_v59, %v6871_v59 }
 0x215   : > { %v2134_v19 = vrot.slane %v2128_v37, 2  ;;  %v3936_v35 = vpop.eup %3935  ;;  %v2350_v17 = vadd.f32 0.1, %v6880_v48  ;;  %v2025_v34 = vmul.f32 %v3932_v6, %v6767_v4  ;;  %3949 = vrsqrt.f32 %v2652_v10 }
 0x216   : > { %v1926_v32 = vadd.f32 %v6788_v21, %v1869_v2  ;;  %v2078_v30 = vsel %vm532_vm1, %v8223_v25, %v2077_v43  ;;  %v3938_v46 = vpop.eup %3937  ;;  %v8224_v37 = vrot.slane %v6758_v41, 1  ;;  %v2388_v40 = vadd.f32 0.81, %v2386_v31 }
 0x217   : > { %v2083_v21 = vadd.f32 %v2078_v30, %v6611_v56  ;;  %v3940_v2 = vpop.eup %3939  ;;  %v2185_v25 = vmul.f32 %v3938_v46, %v6816_v0  ;;  %3951 = vrcp.f32 %v2350_v17  ;;  %v8225_v61 = vrot.slane %v6578_v8, 2  ;;  %v8226_v56 = vld [vmem:[#allocation7_spill] sm:$0xff] }
 0x218   : > { %v1983_v3 = vadd.f32 %v6797_v33, %v1926_v32  ;;  %v2080_v1 = vsel %vm532_vm1, %v2077_v43, %v8224_v37  ;;  %v3942_v16 = vpop.eup %3941  ;;  %v6905_v4 = vmul.f32 %v3934_v18, %v6776_v15  ;;  %v6909_v10 = vsub.f32 %v6863_v14, %v8226_v56  ;;  %v8227_v32 = vld [vmem:[#allocation8_spill] sm:$0xff]  ;;  %v8244_v56 = vld [vmem:[#allocation65_spill] sm:$0xff] }
 0x219   : > { %v2135_v33 = vsel %vm467_vm0, %v8225_v61, %v2134_v19  ;;  %v3944_v41 = vpop.eup %3943  ;;  %v2191_v6 = vrot.slane %v2185_v25, 3  ;;  %v2242_v43 = vmul.f32 %v3942_v16, %v6832_v24  ;;  %v2709_v0 = vadd.f32 0.81, %v2706_v60  ;;  %v6924_v24 = vld [vmem:[#allocation2] sm:$0xff] }
 0x21a   : > { %v2027_v54 = vadd.f32 %v2025_v34, %v1983_v3  ;;  %v6914_v31 = vsub.f32 %v6863_v14, %v8227_v32  ;;  %v3946_v30 = vpop.eup %3945  ;;  %v2140_v17 = vadd.f32 %v2135_v33, %v2083_v21  ;;  %3953 = vrsqrt.f32 %v2388_v40  ;;  %8228 = vst [vmem:[#allocation62_spill] sm:$0xff] %v6924_v24 }
 0x21b   : > { %v2420_v15 = vmul.f32 %v6909_v10, %v6909_v10  ;;  %v2248_v61 = vrot.slane %v2242_v43, 4  ;;  %v6919_v18 = vmul.f32 %v3946_v30, %v6839_v11  ;;  %v6922_v46 = vmul.f32 %v3936_v35, %v6780_v5 }
 0x21c   : > { %v2084_v8 = vadd.f32 %v2080_v1, %v2027_v54  ;;  %v6928_v16 = vsub.f32 %v6863_v14, %v6924_v24  ;;  %v8229_v54 = vrot.slane %v6783_v52, 2  ;;  %v6934_v60 = vmul.f32 %v3940_v2, %v6814_v50  ;;  %v3948_v34 = vpop.eup %3947  ;;  %v2377_v1 = vpop.permute.xlu1 %2376  ;;  %v8243_v24 = vld [vmem:[#allocation9_spill] sm:$0xff] }
 0x21d   : > { %v2423_v3 = vadd.f32 0.81, %v2420_v15  ;;  %v2477_v11 = vmul.f32 %v6914_v31, %v6914_v31  ;;  %v8230_v35 = vrot.slane %v6607_v28, 3  ;;  %v6942_v37 = vmul.f32 %v3944_v41, %v6829_v58 }
 0x21e   : > { %v2137_v40 = vsel %vm467_vm0, %v2134_v19, %v8229_v54  ;;  %3955 = vrsqrt.f32 %v2709_v0  ;;  %v2194_v52 = vsel %vm417_vm5, %v2191_v6, %v2193_v53  ;;  %v8231_v50 = vrot.slane %v6614_v44, 4  ;;  %v8232_v53 = vld [vmem:[#allocation15_spill] sm:$0xff] }
 0x21f   : > { %v2141_v5 = vadd.f32 %v2137_v40, %v2084_v8  ;;  %v2192_v21 = vsel %vm417_vm5, %v8230_v35, %v2191_v6  ;;  %3957 = vrsqrt.f32 %v2423_v3  ;;  %v6949_v25 = vsel %vm737_vm6, %v2248_v61, %v2250_v62  ;;  %v3950_v41 = vpop.eup %3949  ;;  %v8233_v6 = vld [vmem:[#allocation16_spill] sm:$0xff]  ;;  %v8234_v62 = vld [vmem:[#allocation39_spill] sm:$0xff] }
 0x220   : > { %v2197_v19 = vadd.f32 %v2192_v21, %v2140_v17  ;;  %v2249_v2 = vsel %vm737_vm6, %v8231_v50, %v2248_v61  ;;  %v7952_v28 = vrot.slane %v6919_v18, 5  ;;  %v2480_v33 = vadd.f32 0.81, %v2477_v11  ;;  %v8235_v61 = vld [vmem:[#allocation40_spill] sm:$0xff] }
 0x221   : > { %v2534_v58 = vmul.f32 %v6928_v16, %v6928_v16  ;;  %v6955_v43 = vmul.f32 %v3948_v34, %v6843_v26  ;;  %v6959_v44 = vsub.f32 %v6863_v14, %v8232_v53  ;;  %v6963_v0 = vsub.f32 %v6863_v14, %v8233_v6  ;;  %v3952_v8 = vpop.eup %3951  ;;  %v2375_v6 = vpop.permute.xlu0 %2374 }
 0x222   : > { %v6967_v30 = vsub.f32 %v6863_v14, %v8234_v62  ;;  %v6969_v17 = vadd.f32 %v2194_v52, %v2141_v5  ;;  %3959 = vrsqrt.f32 %v2480_v33  ;;  %v6972_v26 = vsub.f32 %v2377_v1, %v8235_v61  ;;  %v8236_v5 = vld [vmem:[#allocation5_spill] sm:$0xff] }
 0x223   : > { %v2537_v15 = vadd.f32 0.81, %v2534_v58  ;;  %v6975_v54 = vmul.f32 %v3952_v8, %v6880_v48  ;;  %v2591_v40 = vmul.f32 %v6959_v44, %v6959_v44  ;;  %v2648_v3 = vmul.f32 %v6963_v0, %v6963_v0 }
 0x224   : > { %v2705_v14 = vmul.f32 %v6967_v30, %v6967_v30  ;;  %v6983_v11 = vadd.f32 %v2249_v2, %v2197_v19  ;;  %v2394_v34 = vmul.f32 %v6972_v26, %v6972_v26  ;;  %v6988_v35 = vsub.f32 %v2377_v1, %v8236_v5  ;;  %v3954_v48 = vpop.eup %3953 }
 0x225   : > { %3961 = vrsqrt.f32 %v2537_v15  ;;  %v8237_v21 = vrot.slane %v6721_v13, 5  ;;  %v6998_v50 = vmul.f32 %v3950_v41, %v6847_v29  ;;  %v2594_v19 = vadd.f32 0.81, %v2591_v40  ;;  %v8238_v15 = vld [vmem:[#allocation6_spill] sm:$0xff]  ;;  %v7006_v13 = vld [vmem:[#allocation3] sm:$0xff] }
 0x226   : > { %v2651_v2 = vadd.f32 0.81, %v2648_v3  ;;  %v2708_v33 = vadd.f32 0.81, %v2705_v14  ;;  %v2396_v58 = vadd.f32 0.81, %v2394_v34  ;;  %v2432_v8 = vmul.f32 %v6988_v35, %v6988_v35 }
 0x227   : > { %v6995_v52 = vsel %vm812_vm4, %v8237_v21, %v7952_v28  ;;  %v7003_v5 = vsub.f32 %v2377_v1, %v8238_v15  ;;  %3963 = vrsqrt.f32 %v2594_v19  ;;  %8239 = vst [vmem:[#allocation52_spill] sm:$0xff] %v7006_v13  ;;  %v7009_v21 = vsub.f32 %v2377_v1, %v7006_v13  ;;  %v8240_v29 = vld [vmem:[#allocation26_spill] sm:$0xff] }
 0x228   : > { %v7012_v41 = vsub.f32 %v2377_v1, %v8240_v29  ;;  %v7014_v40 = vpop.eup %3955  ;;  %v7017_v3 = vmul.f32 %v3954_v48, %v6875_v47  ;;  %3965 = vrsqrt.f32 %v2651_v2  ;;  %v2435_v14 = vadd.f32 0.81, %v2432_v8  ;;  %v8241_v29 = vld [vmem:[#allocation32_spill] sm:$0xff]  ;;  %v8242_v48 = vld [vmem:[#allocation34_spill] sm:$0xff] }
 0x229   : > { %v2489_v34 = vmul.f32 %v7003_v5, %v7003_v5  ;;  %v3958_v61 = vpop.eup %3957  ;;  %3967 = vrsqrt.f32 %v2708_v33  ;;  %v2546_v19 = vmul.f32 %v7009_v21, %v7009_v21  ;;  %v7026_v13 = vsub.f32 %v2377_v1, %v8241_v29 }
 0x22a   : > { %v2603_v28 = vmul.f32 %v7012_v41, %v7012_v41  ;;  %v7029_v15 = vmul.f32 %v3958_v61, %v6909_v10  ;;  %3969 = vrsqrt.f32 %v2396_v58  ;;  %v7032_v2 = vsub.f32 %v2377_v1, %v8242_v48 }
 0x22b   : > { %v2492_v47 = vadd.f32 0.81, %v2489_v34  ;;  %3971 = vrsqrt.f32 %v2435_v14  ;;  %v2549_v8 = vadd.f32 0.81, %v2546_v19  ;;  %v2660_v62 = vmul.f32 %v7026_v13, %v7026_v13 }
 0x22c   : > { %v2606_v33 = vadd.f32 0.81, %v2603_v28  ;;  %v3960_v53 = vpop.eup %3959  ;;  %v2717_v29 = vmul.f32 %v7032_v2, %v7032_v2  ;;  %v7039_v10 = vsub.f32 %v2375_v6, %v8243_v24  ;;  %v7042_v61 = vsub.f32 %v2375_v6, %v8188_v38  ;;  %v7052_v24 = vpop.permute.xlu1 %2380 }
 0x22d   : > { %3973 = vrsqrt.f32 %v2492_v47  ;;  %v2486_v1 = vmul.f32 %v3960_v53, %v6914_v31  ;;  %v2663_v58 = vadd.f32 0.81, %v2660_v62  ;;  %v7046_v28 = vsub.f32 %v2375_v6, %v6624_v63 }
 0x22e   : > { %3975 = vrsqrt.f32 %v2549_v8  ;;  %v2720_v34 = vadd.f32 0.81, %v2717_v29  ;;  %v2422_v19 = vmul.f32 %v7039_v10, %v7039_v10  ;;  %v2479_v47 = vmul.f32 %v7042_v61, %v7042_v61 }
 0x22f   : > { %v3962_v14 = vpop.eup %3961  ;;  %3977 = vrsqrt.f32 %v2606_v33  ;;  %v2536_v31 = vmul.f32 %v7046_v28, %v7046_v28  ;;  %v7058_v63 = vsub.f32 %v2375_v6, %v8190_v27  ;;  %v7061_v29 = vsub.f32 %v2375_v6, %v8191_v39 }
 0x230   : > { %v2543_v38 = vmul.f32 %v3962_v14, %v6928_v16  ;;  %3979 = vrsqrt.f32 %v2663_v58  ;;  %v2425_v53 = vadd.f32 0.81, %v2422_v19  ;;  %v2482_v62 = vadd.f32 0.81, %v2479_v47 }
 0x231   : > { %3981 = vrsqrt.f32 %v2720_v34  ;;  %v3964_v8 = vpop.eup %3963  ;;  %v2539_v33 = vadd.f32 0.81, %v2536_v31  ;;  %v2593_v48 = vmul.f32 %v7058_v63, %v7058_v63  ;;  %v7066_v16 = vsub.f32 %v2375_v6, %v8192_v22 }
 0x232   : > { %v7070_v58 = vsub.f32 %v7052_v24, %v8122_v55  ;;  %v3966_v14 = vpop.eup %3965  ;;  %v2600_v34 = vmul.f32 %v3964_v8, %v6959_v44  ;;  %3983 = vrsqrt.f32 %v2425_v53  ;;  %v2650_v19 = vmul.f32 %v7061_v29, %v7061_v29 }
 0x233   : > { %v7077_v47 = vsub.f32 %v7052_v24, %v8193_v49  ;;  %v3968_v31 = vpop.eup %3967  ;;  %v2657_v39 = vmul.f32 %v3966_v14, %v6963_v0  ;;  %3985 = vrsqrt.f32 %v2482_v62  ;;  %v2596_v6 = vadd.f32 0.81, %v2593_v48 }
 0x234   : > { %v2707_v55 = vmul.f32 %v7066_v16, %v7066_v16  ;;  %v3970_v22 = vpop.eup %3969  ;;  %v2714_v27 = vmul.f32 %v3968_v31, %v6967_v30  ;;  %3987 = vrsqrt.f32 %v2539_v33  ;;  %v2653_v44 = vadd.f32 0.81, %v2650_v19 }
 0x235   : > { %v2434_v53 = vmul.f32 %v7070_v58, %v7070_v58  ;;  %v3972_v8 = vpop.eup %3971  ;;  %v2400_v49 = vmul.f32 %v3970_v22, %v6972_v26  ;;  %3989 = vrsqrt.f32 %v2596_v6  ;;  %v2491_v0 = vmul.f32 %v7077_v47, %v7077_v47 }
 0x236   : > { %v2710_v32 = vadd.f32 0.81, %v2707_v55  ;;  %v2441_v62 = vmul.f32 %v3972_v8, %v6988_v35  ;;  %3991 = vrsqrt.f32 %v2653_v44  ;;  %v7091_v30 = vsub.f32 %v7052_v24, %v8244_v56 }
 0x237   : > { %v3974_v48 = vpop.eup %3973  ;;  %v2437_v14 = vadd.f32 0.81, %v2434_v53  ;;  %v2402_v19 = vsub.f32 %v7017_v3, %v2400_v49  ;;  %v2494_v22 = vadd.f32 0.81, %v2491_v0 }
 0x238   : > { %v3976_v33 = vpop.eup %3975  ;;  %v2498_v31 = vmul.f32 %v3974_v48, %v7003_v5  ;;  %3993 = vrsqrt.f32 %v2710_v32  ;;  %v2444_v26 = vsub.f32 %v7029_v15, %v2441_v62  ;;  %v2548_v35 = vmul.f32 %v7091_v30, %v7091_v30 }
 0x239   : > { %v3978_v55 = vpop.eup %3977  ;;  %v2555_v6 = vmul.f32 %v3976_v33, %v7009_v21  ;;  %3995 = vrsqrt.f32 %v2437_v14  ;;  %v7099_v53 = vmul.f32 %v2402_v19, %v2402_v19 }
 0x23a   : > { %v3980_v44 = vpop.eup %3979  ;;  %v2501_v56 = vsub.f32 %v2486_v1, %v2498_v31  ;;  %v2612_v8 = vmul.f32 %v3978_v55, %v7012_v41  ;;  %3997 = vrsqrt.f32 %v2494_v22  ;;  %v7102_v5 = vmul.f32 %v2444_v26, %v2444_v26 }
 0x23b   : > { %v3982_v49 = vpop.eup %3981  ;;  %v2558_v32 = vsub.f32 %v2543_v38, %v2555_v6  ;;  %v2669_v3 = vmul.f32 %v3980_v44, %v7026_v13  ;;  %v2551_v15 = vadd.f32 0.81, %v2548_v35  ;;  %v2406_v21 = vadd.f32 0.1, %v7099_v53 }
 0x23c   : > { %v7106_v0 = vmul.f32 %v2501_v56, %v2501_v56  ;;  %v2615_v48 = vsub.f32 %v2600_v34, %v2612_v8  ;;  %v2726_v62 = vmul.f32 %v3982_v49, %v7032_v2  ;;  %v3984_v14 = vpop.eup %3983  ;;  %v2450_v1 = vadd.f32 0.1, %v7102_v5 }
 0x23d   : > { %v7110_v33 = vmul.f32 %v2558_v32, %v2558_v32  ;;  %v2672_v41 = vsub.f32 %v2657_v39, %v2669_v3  ;;  %3999 = vrsqrt.f32 %v2551_v15  ;;  %v3986_v19 = vpop.eup %3985  ;;  %v2311_v34 = vadd.f32 %v6995_v52, %v6983_v11  ;;  %v8249_v32 = vld [vmem:[#allocation25_spill] sm:$0xff] }
 0x23e   : > { %4001 = vrcp.f32 %v2406_v21  ;;  %v2507_v38 = vadd.f32 0.1, %v7106_v0  ;;  %v7113_v13 = vmul.f32 %v2615_v48, %v2615_v48  ;;  %v2729_v31 = vsub.f32 %v2714_v27, %v2726_v62  ;;  %v3988_v22 = vpop.eup %3987  ;;  %v8251_v48 = vld [vmem:[#allocation28_spill] sm:$0xff] }
 0x23f   : > { %4003 = vrcp.f32 %v2450_v1  ;;  %v2564_v2 = vadd.f32 0.1, %v7110_v33  ;;  %v7118_v55 = vmul.f32 %v2672_v41, %v2672_v41  ;;  %v3990_v26 = vpop.eup %3989  ;;  %v2255_v39 = vadd.f32 %v6949_v25, %v6969_v17  ;;  %v7154_v1 = vpop.permute.xlu0 %2378 }
 0x240   : > { %v8245_v6 = vrot.slane %v6850_v36, 5  ;;  %v8246_v35 = vrot.slane %v6919_v18, 5  ;;  %4005 = vrcp.f32 %v2507_v38  ;;  %v2621_v27 = vadd.f32 0.1, %v7113_v13  ;;  %v3992_v56 = vpop.eup %3991 }
 0x241   : > { %v7130_v11 = vmul.f32 %v7014_v40, %v6871_v59  ;;  %v8247_v52 = vrot.slane %v6975_v54, 6  ;;  %v8248_v8 = vrot.slane %v6735_v7, 6  ;;  %4007 = vrcp.f32 %v2564_v2  ;;  %v8250_v7 = vld [vmem:[#allocation27_spill] sm:$0xff] }
 0x242   : > { %v2308_v44 = vsel %vm812_vm4, %v8246_v35, %v8245_v6  ;;  %v2678_v36 = vadd.f32 0.1, %v7118_v55  ;;  %v3994_v18 = vpop.eup %3993  ;;  %4009 = vrcp.f32 %v2621_v27  ;;  %v7138_v17 = vmul.f32 %v2729_v31, %v2729_v31  ;;  %v8253_v27 = vld [vmem:[#allocation30_spill] sm:$0xff] }
 0x243   : > { %v2363_v25 = vsel %vm747_vm3, %v8248_v8, %v8247_v52  ;;  %v2431_v49 = vmul.f32 %v3984_v14, %v7039_v10  ;;  %v7143_v3 = vsub.f32 %v7052_v24, %v8249_v32  ;;  %v3996_v59 = vpop.eup %3995  ;;  %v2488_v15 = vmul.f32 %v3986_v19, %v7042_v61 }
 0x244   : > { %v2368_v40 = vadd.f32 %v2363_v25, %v2311_v34  ;;  %v7148_v21 = vsub.f32 %v7052_v24, %v8250_v7  ;;  %v7152_v62 = vsub.f32 %v7052_v24, %v8251_v48  ;;  %v3998_v41 = vpop.eup %3997  ;;  %4011 = vrcp.f32 %v2678_v36 }
 0x245   : > { %v2545_v10 = vmul.f32 %v3988_v22, %v7046_v28  ;;  %v2443_v14 = vmul.f32 %v3996_v59, %v7070_v58  ;;  %v2605_v38 = vmul.f32 %v7143_v3, %v7143_v3  ;;  %v7161_v61 = vmul.f32 %v3990_v26, %v7058_v63  ;;  %v8252_v22 = vld [vmem:[#allocation45_spill] sm:$0xff] }
 0x246   : > { %v2500_v19 = vmul.f32 %v3998_v41, %v7077_v47  ;;  %v2662_v24 = vmul.f32 %v7148_v21, %v7148_v21  ;;  %v2719_v31 = vmul.f32 %v7152_v62, %v7152_v62  ;;  %v2735_v34 = vadd.f32 0.1, %v7138_v17 }
 0x247   : > { %v2446_v2 = vsub.f32 %v2431_v49, %v2443_v14  ;;  %v2608_v28 = vadd.f32 0.81, %v2605_v38  ;;  %v7171_v58 = vsub.f32 %v7154_v1, %v8252_v22  ;;  %v4000_v6 = vpop.eup %3999  ;;  %v7175_v47 = vsub.f32 %v7154_v1, %v8253_v27 }
 0x248   : > { %v2503_v35 = vsub.f32 %v2488_v15, %v2500_v19  ;;  %v2665_v63 = vadd.f32 0.81, %v2662_v24  ;;  %v2722_v26 = vadd.f32 0.81, %v2719_v31  ;;  %v4002_v52 = vpop.eup %4001  ;;  %v2557_v25 = vmul.f32 %v4000_v6, %v7091_v30 }
 0x249   : > { %v7177_v8 = vmul.f32 %v2446_v2, %v2446_v2  ;;  %4013 = vrsqrt.f32 %v2608_v28  ;;  %v2395_v36 = vmul.f32 %v7171_v58, %v7171_v58  ;;  %v4004_v49 = vpop.eup %4003  ;;  %v2312_v15 = vadd.f32 %v2308_v44, %v2255_v39 }
 0x24a   : > { %v7182_v59 = vmul.f32 %v2503_v35, %v2503_v35  ;;  %4015 = vrsqrt.f32 %v2665_v63  ;;  %v2433_v41 = vmul.f32 %v7175_v47, %v7175_v47  ;;  %v4006_v14 = vpop.eup %4005  ;;  %v7187_v38 = vmul.f32 %v4004_v49, %v7102_v5 }
 0x24b   : > { %v2452_v19 = vadd.f32 0.1, %v7177_v8  ;;  %v2560_v24 = vsub.f32 %v2545_v10, %v2557_v25  ;;  %4017 = vrsqrt.f32 %v2722_v26  ;;  %v4008_v30 = vpop.eup %4007  ;;  %v7191_v31 = vmul.f32 %v4006_v14, %v7106_v0 }
 0x24c   : > { %4019 = vrcp.f32 %v2735_v34  ;;  %v2659_v2 = vmul.f32 %v3992_v56, %v7061_v29  ;;  %v2397_v28 = vadd.f32 0.81, %v2395_v36  ;;  %v4010_v39 = vpop.eup %4009  ;;  %v2410_v44 = vmul.f32 %v4002_v52, %v7099_v53  ;;  %v8257_v52 = vld [vmem:[#allocation31_spill] sm:$0xff] }
 0x24d   : > { %v7196_v6 = vmul.f32 %v4008_v30, %v7110_v33  ;;  %v2509_v5 = vadd.f32 0.1, %v7182_v59  ;;  %v8255_v35 = vrot.slane %v6866_v23, 6  ;;  %v8256_v10 = vrot.slane %v6975_v54, 6  ;;  %v8258_v36 = vld [vmem:[#allocation35_spill] sm:$0xff] }
 0x24e   : > { %v2716_v0 = vmul.f32 %v3994_v18, %v7066_v16  ;;  %4021 = vrcp.f32 %v2452_v19  ;;  %v2436_v29 = vadd.f32 0.81, %v2433_v41  ;;  %v4012_v56 = vpop.eup %4011  ;;  %v7207_v26 = vadd.f32 %v2410_v44, %v2368_v40  ;;  %v7221_v40 = vld [vmem:[#allocation3 + $0x8] sm:$0xff]  ;;  %v8259_v41 = vld [vmem:[#allocation36_spill] sm:$0xff] }
 0x24f   : > { %8254 = vst [vmem:[#allocation44_spill] sm:$0xff] %v7196_v6  ;;  %v2365_v63 = vsel %vm747_vm3, %v8256_v10, %v8255_v35  ;;  %v7210_v33 = vmul.f32 %v2560_v24, %v2560_v24  ;;  %4023 = vrsqrt.f32 %v2397_v28  ;;  %v7214_v54 = vmul.f32 %v4010_v39, %v7113_v13  ;;  %v7244_v24 = vpop.permute.xlu1 %2758 }
 0x250   : > { %v7205_v34 = vadd.f32 %v2365_v63, %v2312_v15  ;;  %4025 = vrsqrt.f32 %v2436_v29  ;;  %v7218_v16 = vsub.f32 %v7154_v1, %v8257_v52  ;;  %v7225_v25 = vsub.f32 %v7154_v1, %v7221_v40 }
 0x251   : > { %4027 = vrcp.f32 %v2509_v5  ;;  %v7229_v49 = vsub.f32 %v7154_v1, %v8258_v36  ;;  %v7232_v13 = vmul.f32 %v4012_v56, %v7118_v55  ;;  %v7238_v14 = vsub.f32 %v7154_v1, %v8259_v41 }
 0x252   : > { %v2490_v15 = vmul.f32 %v7218_v16, %v7218_v16  ;;  %v7242_v19 = vsub.f32 %v7154_v1, %v8134_v51  ;;  %v2566_v28 = vadd.f32 0.1, %v7210_v33  ;;  %v2547_v55 = vmul.f32 %v7225_v25, %v7225_v25 }
 0x253   : > { %v4014_v30 = vpop.eup %4013  ;;  %v2604_v39 = vmul.f32 %v7229_v49, %v7229_v49  ;;  %v7253_v44 = vsub.f32 %v7244_v24, %v8213_v45  ;;  %v2661_v10 = vmul.f32 %v7238_v14, %v7238_v14  ;;  %v7263_v53 = vsub.f32 %v7244_v24, %v8214_v12 }
 0x254   : > { %v4016_v5 = vpop.eup %4015  ;;  %v2614_v35 = vmul.f32 %v4014_v30, %v7143_v3  ;;  %v2493_v1 = vadd.f32 0.81, %v2490_v15  ;;  %v2718_v63 = vmul.f32 %v7242_v19, %v7242_v19  ;;  %v2550_v18 = vadd.f32 0.81, %v2547_v55 }
 0x255   : > { %v4018_v29 = vpop.eup %4017  ;;  %v2671_v56 = vmul.f32 %v4016_v5, %v7148_v21  ;;  %v2607_v23 = vadd.f32 0.81, %v2604_v39  ;;  %v2664_v15 = vadd.f32 0.81, %v2661_v10  ;;  %v2773_v41 = vmul.f32 %v7253_v44, %v7253_v44 }
 0x256   : > { %v4020_v45 = vpop.eup %4019  ;;  %v2617_v6 = vsub.f32 %v7161_v61, %v2614_v35  ;;  %v2728_v3 = vmul.f32 %v4018_v29, %v7152_v62  ;;  %4029 = vrsqrt.f32 %v2493_v1  ;;  %v2721_v51 = vadd.f32 0.81, %v2718_v63 }
 0x257   : > { %v2674_v30 = vsub.f32 %v2659_v2, %v2671_v56  ;;  %4031 = vrsqrt.f32 %v2550_v18  ;;  %v7273_v61 = vmul.f32 %v4020_v45, %v7138_v17  ;;  %v2807_v2 = vmul.f32 %v7263_v53, %v7263_v53 }
 0x258   : > { %v4022_v21 = vpop.eup %4021  ;;  %v7270_v39 = vmul.f32 %v2617_v6, %v2617_v6  ;;  %v2731_v12 = vsub.f32 %v2716_v0, %v2728_v3  ;;  %4033 = vrsqrt.f32 %v2607_v23  ;;  %v2775_v10 = vadd.f32 0.81, %v2773_v41 }
 0x259   : > { %v4024_v5 = vpop.eup %4023  ;;  %8260 = vst [vmem:[#allocation48_spill] sm:$0xff] %v7273_v61  ;;  %v7275_v62 = vmul.f32 %v2674_v30, %v2674_v30  ;;  %4035 = vrsqrt.f32 %v2664_v15  ;;  %v2810_v45 = vadd.f32 0.81, %v2807_v2  ;;  %v7294_v3 = vmul.f32 %v4022_v21, %v7177_v8 }
 0x25a   : > { %v4026_v18 = vpop.eup %4025  ;;  %4037 = vrcp.f32 %v2566_v28  ;;  %v2623_v35 = vadd.f32 0.1, %v7270_v39  ;;  %v7280_v1 = vmul.f32 %v2731_v12, %v2731_v12  ;;  %v2401_v6 = vmul.f32 %v4024_v5, %v7171_v58 }
 0x25b   : > { %v4028_v0 = vpop.eup %4027  ;;  %v2680_v23 = vadd.f32 0.1, %v7275_v62  ;;  %v2442_v17 = vmul.f32 %v4026_v18, %v7175_v47  ;;  %4039 = vrsqrt.f32 %v2721_v51  ;;  %v7291_v58 = vsub.f32 %v7244_v24, %v8217_v9 }
 0x25c   : > { %4041 = vrcp.f32 %v2623_v35  ;;  %v2737_v29 = vadd.f32 0.1, %v7280_v1  ;;  %v2403_v28 = vsub.f32 %v6905_v4, %v2401_v6  ;;  %v7300_v47 = vsub.f32 %v7244_v24, %v6825_v57 }
 0x25d   : > { %4043 = vrcp.f32 %v2680_v23  ;;  %v2445_v56 = vsub.f32 %v6922_v46, %v2442_v17  ;;  %v2864_v4 = vmul.f32 %v7291_v58, %v7291_v58  ;;  %v7308_v9 = vsub.f32 %v7244_v24, %v8218_v20 }
 0x25e   : > { %4045 = vrcp.f32 %v2737_v29  ;;  %v7296_v51 = vmul.f32 %v2403_v28, %v2403_v28  ;;  %v2921_v15 = vmul.f32 %v7300_v47, %v7300_v47  ;;  %v7315_v57 = vsub.f32 %v7244_v24, %v8219_v42 }
 0x25f   : > { %v7302_v41 = vmul.f32 %v2445_v56, %v2445_v56  ;;  %4047 = vrsqrt.f32 %v2775_v10  ;;  %v2867_v5 = vadd.f32 0.81, %v2864_v4  ;;  %v2978_v20 = vmul.f32 %v7308_v9, %v7308_v9 }
 0x260   : > { %v4030_v46 = vpop.eup %4029  ;;  %v2407_v8 = vadd.f32 0.1, %v7296_v51  ;;  %4049 = vrsqrt.f32 %v2810_v45  ;;  %8261 = vst [vmem:[#allocation4_spill] sm:$0xff] %v7315_v57  ;;  %v2924_v35 = vadd.f32 0.81, %v2921_v15  ;;  %v3035_v6 = vmul.f32 %v7315_v57, %v7315_v57  ;;  %v8293_v57 = vld [vmem:[#allocation17_spill] sm:$0xff] }
 0x261   : > { %v4032_v30 = vpop.eup %4031  ;;  %v2451_v21 = vadd.f32 0.1, %v7302_v41  ;;  %v2499_v12 = vmul.f32 %v4030_v46, %v7218_v16  ;;  %v2981_v10 = vadd.f32 0.81, %v2978_v20 }
 0x262   : > { %v4034_v2 = vpop.eup %4033  ;;  %4051 = vrcp.f32 %v2407_v8  ;;  %v2556_v18 = vmul.f32 %v4032_v30, %v7225_v25  ;;  %v3038_v56 = vadd.f32 0.81, %v3035_v6  ;;  %v7329_v25 = vmul.f32 %v4028_v0, %v7182_v59  ;;  %v8262_v30 = vld [vmem:[#allocation43_spill] sm:$0xff] }
 0x263   : > { %v4036_v23 = vpop.eup %4035  ;;  %4053 = vrcp.f32 %v2451_v21  ;;  %v2502_v42 = vsub.f32 %v6934_v60, %v2499_v12  ;;  %v2613_v17 = vmul.f32 %v4034_v2, %v7229_v49 }
 0x264   : > { %v4038_v16 = vpop.eup %4037  ;;  %v2559_v29 = vsub.f32 %v6942_v37, %v2556_v18  ;;  %v2670_v28 = vmul.f32 %v4036_v23, %v7238_v14  ;;  %4055 = vrsqrt.f32 %v2867_v5  ;;  %v2522_v23 = vrot.slane %v7329_v25, 2 }
 0x265   : > { %v4040_v45 = vpop.eup %4039  ;;  %v7331_v4 = vmul.f32 %v2502_v42, %v2502_v42  ;;  %v2616_v46 = vsub.f32 %v6955_v43, %v2613_v17  ;;  %4057 = vrsqrt.f32 %v2924_v35  ;;  %v7339_v15 = vmul.f32 %v4038_v16, %v7210_v33  ;;  %v8265_v16 = vld [vmem:[#allocation41_spill] sm:$0xff] }
 0x266   : > { %v4042_v60 = vpop.eup %4041  ;;  %v7334_v8 = vmul.f32 %v2559_v29, %v2559_v29  ;;  %v2673_v49 = vsub.f32 %v6998_v50, %v2670_v28  ;;  %v2727_v37 = vmul.f32 %v4040_v45, %v7242_v19  ;;  %4059 = vrsqrt.f32 %v2981_v10 }
 0x267   : > { %v4044_v14 = vpop.eup %4043  ;;  %v2508_v59 = vadd.f32 0.1, %v7331_v4  ;;  %v7342_v0 = vmul.f32 %v2616_v46, %v2616_v46  ;;  %v7346_v43 = vsub.f32 %v7244_v24, %v8262_v30  ;;  %4061 = vrsqrt.f32 %v3038_v56  ;;  %v8266_v56 = vld [vmem:[#allocation7_spill] sm:$0xff]  ;;  %v8267_v46 = vld [vmem:[#allocation8_spill] sm:$0xff] }
 0x268   : > { %v4046_v21 = vpop.eup %4045  ;;  %v2565_v12 = vadd.f32 0.1, %v7334_v8  ;;  %v7349_v5 = vmul.f32 %v2673_v49, %v2673_v49  ;;  %v2730_v50 = vsub.f32 %v7130_v11, %v2727_v37  ;;  %v7354_v20 = vmul.f32 %v4042_v60, %v7270_v39  ;;  %v2757_v39 = vpop.permute.xlu0 %2756  ;;  %v8268_v49 = vld [vmem:[#allocation62_spill] sm:$0xff] }
 0x269   : > { %8263 = vst [vmem:[#allocation66_spill] sm:$0xff] %v7346_v43  ;;  %v4048_v19 = vpop.eup %4047  ;;  %4063 = vrcp.f32 %v2508_v59  ;;  %v2622_v2 = vadd.f32 0.1, %v7342_v0  ;;  %v7358_v24 = vmul.f32 %v4044_v14, %v7275_v62  ;;  %v2465_v11 = vrot.slane %v7294_v3, 1 }
 0x26a   : > { %v4050_v18 = vpop.eup %4049  ;;  %4065 = vrcp.f32 %v2565_v12  ;;  %v2679_v35 = vadd.f32 0.1, %v7349_v5  ;;  %v7361_v6 = vmul.f32 %v2730_v50, %v2730_v50  ;;  %v7367_v10 = vmul.f32 %v4046_v21, %v7280_v1 }
 0x26b   : > { %4067 = vrcp.f32 %v2622_v2  ;;  %v3092_v62 = vmul.f32 %v7346_v43, %v7346_v43  ;;  %v7372_v29 = vsub.f32 %v2757_v39, %v8265_v16  ;;  %v7376_v45 = vsub.f32 %v2757_v39, %v8266_v56 }
 0x26c   : > { %v4052_v17 = vpop.eup %4051  ;;  %8264 = vst [vmem:[#allocation67_spill] sm:$0xff] %v7367_v10  ;;  %4069 = vrcp.f32 %v2679_v35  ;;  %v2736_v3 = vadd.f32 0.1, %v7361_v6  ;;  %v7379_v60 = vsub.f32 %v2757_v39, %v8267_v46  ;;  %v7382_v37 = vsub.f32 %v2757_v39, %v8268_v49 }
 0x26d   : > { %v4054_v28 = vpop.eup %4053  ;;  %v2772_v21 = vmul.f32 %v7372_v29, %v7372_v29  ;;  %v2411_v50 = vmul.f32 %v4052_v17, %v7296_v51  ;;  %v3095_v2 = vadd.f32 0.81, %v3092_v62  ;;  %v2806_v35 = vmul.f32 %v7376_v45, %v7376_v45 }
 0x26e   : > { %v4056_v1 = vpop.eup %4055  ;;  %v2457_v30 = vmul.f32 %v4054_v28, %v7302_v41  ;;  %v2863_v16 = vmul.f32 %v7379_v60, %v7379_v60  ;;  %v7396_v33 = vmul.f32 %v4048_v19, %v7253_v44  ;;  %v7399_v41 = vmul.f32 %v4050_v18, %v7263_v53  ;;  %v8271_v19 = vld [vmem:[#allocation15_spill] sm:$0xff]  ;;  %v2763_v53 = vpop.permute.xlu1 %2762 }
 0x26f   : > { %v4058_v12 = vpop.eup %4057  ;;  %v2413_v28 = vadd.f32 %v2411_v50, %v7205_v34  ;;  %4071 = vrcp.f32 %v2736_v3  ;;  %v2774_v51 = vadd.f32 0.81, %v2772_v21  ;;  %v2920_v17 = vmul.f32 %v7382_v37, %v7382_v37 }
 0x270   : > { %v4060_v56 = vpop.eup %4059  ;;  %v2463_v49 = vrot.slane %v2457_v30, 1  ;;  %v7407_v59 = vmul.f32 %v4056_v1, %v7291_v58  ;;  %v7410_v30 = vmul.f32 %v4058_v12, %v7300_v47  ;;  %v2809_v44 = vadd.f32 0.81, %v2806_v35  ;;  %v8274_v35 = vld [vmem:[#allocation16_spill] sm:$0xff] }
 0x271   : > { %v7404_v62 = vpop.eup %4061  ;;  %v7413_v46 = vsub.f32 %v2757_v39, %v8271_v19  ;;  %v8272_v34 = vrot.slane %v7187_v38, 1  ;;  %v7419_v21 = vmul.f32 %v4060_v56, %v7308_v9  ;;  %4073 = vrsqrt.f32 %v3095_v2  ;;  %v8278_v2 = vld [vmem:[#allocation40_spill] sm:$0xff] }
 0x272   : > { %8269 = vst [vmem:[#allocation68_spill] sm:$0xff] %v7404_v62  ;;  %8270 = vst [vmem:[#allocation69_spill] sm:$0xff] %v7410_v30  ;;  %v2866_v50 = vadd.f32 0.81, %v2863_v16  ;;  %v2923_v47 = vadd.f32 0.81, %v2920_v17  ;;  %v7425_v19 = vsub.f32 %v2757_v39, %v8274_v35  ;;  %4075 = vrsqrt.f32 %v2774_v51 }
 0x273   : > { %v4064_v18 = vpop.eup %4063  ;;  %v2464_v3 = vsel %vm532_vm1, %v8272_v34, %v2463_v49  ;;  %8273 = vst [vmem:[#allocation70_spill] sm:$0xff] %v7419_v21  ;;  %v2977_v12 = vmul.f32 %v7413_v46, %v7413_v46  ;;  %v8276_v34 = vld [vmem:[#allocation39_spill] sm:$0xff]  ;;  %v7434_v16 = vsub.f32 %v2763_v53, %v8278_v2  ;;  %4077 = vrsqrt.f32 %v2809_v44  ;;  %v8283_v2 = vld [vmem:[#allocation26_spill] sm:$0xff]  ;;  %v8295_v21 = vld [vmem:[#allocation21_spill] sm:$0xff] }
 0x274   : > { %v4066_v58 = vpop.eup %4065  ;;  %v2514_v1 = vmul.f32 %v4064_v18, %v7331_v4  ;;  %8275 = vst [vmem:[#allocation71_spill] sm:$0xff] %v7425_v19  ;;  %v7431_v9 = vsub.f32 %v2757_v39, %v8276_v34  ;;  %v2466_v4 = vsel %vm532_vm1, %v2463_v49, %v2465_v11  ;;  %v7438_v17 = vadd.f32 %v2464_v3, %v7207_v26  ;;  %v8280_v3 = vld [vmem:[#allocation5_spill] sm:$0xff] }
 0x275   : > { %v4068_v63 = vpop.eup %4067  ;;  %v7428_v38 = vmul.f32 %v4066_v58, %v7334_v8  ;;  %4079 = vrsqrt.f32 %v2866_v50  ;;  %v3034_v8 = vmul.f32 %v7425_v19, %v7425_v19  ;;  %v2780_v39 = vmul.f32 %v7434_v16, %v7434_v16  ;;  %v8287_v58 = vld [vmem:[#allocation34_spill] sm:$0xff] }
 0x276   : > { %8277 = vst [vmem:[#allocation37_spill] sm:$0xff] %v7431_v9  ;;  %v4070_v56 = vpop.eup %4069  ;;  %v2520_v18 = vrot.slane %v2514_v1, 2  ;;  %v7441_v35 = vmul.f32 %v4068_v63, %v7342_v0  ;;  %v7447_v51 = vadd.f32 %v2466_v4, %v2413_v28  ;;  %4081 = vrsqrt.f32 %v2923_v47  ;;  %v8281_v1 = vld [vmem:[#allocation6_spill] sm:$0xff]  ;;  %v8282_v47 = vld [vmem:[#allocation52_spill] sm:$0xff] }
 0x277   : > { %v2980_v11 = vadd.f32 0.81, %v2977_v12  ;;  %v8279_v26 = vrot.slane %v7191_v31, 2  ;;  %v7461_v0 = vmul.f32 %v4070_v56, %v7349_v5  ;;  %v3091_v28 = vmul.f32 %v7431_v9, %v7431_v9  ;;  %v8284_v56 = vld [vmem:[#allocation32_spill] sm:$0xff]  ;;  %v8289_v9 = vld [vmem:[#allocation9_spill] sm:$0xff] }
 0x278   : > { %v7458_v63 = vsel %vm467_vm0, %v2520_v18, %v2522_v23  ;;  %v2782_v44 = vadd.f32 0.81, %v2780_v39  ;;  %v7466_v50 = vsub.f32 %v2763_v53, %v8280_v3  ;;  %v7469_v31 = vsub.f32 %v2763_v53, %v8281_v1 }
 0x279   : > { %v7453_v49 = vsel %vm467_vm0, %v8279_v26, %v2520_v18  ;;  %v7472_v12 = vsub.f32 %v2763_v53, %v8282_v47  ;;  %v4072_v25 = vpop.eup %4071  ;;  %v3037_v34 = vadd.f32 0.81, %v3034_v8  ;;  %v7476_v5 = vsub.f32 %v2763_v53, %v8283_v2 }
 0x27a   : > { %v7479_v4 = vsub.f32 %v2763_v53, %v8284_v56  ;;  %4083 = vrsqrt.f32 %v2980_v11  ;;  %v2818_v18 = vmul.f32 %v7466_v50, %v7466_v50  ;;  %v2875_v39 = vmul.f32 %v7469_v31, %v7469_v31 }
 0x27b   : > { %v2932_v26 = vmul.f32 %v7472_v12, %v7472_v12  ;;  %v7487_v3 = vpop.eup %4073  ;;  %4085 = vrsqrt.f32 %v2782_v44  ;;  %v2989_v1 = vmul.f32 %v7476_v5, %v7476_v5  ;;  %v7495_v47 = vmul.f32 %v4072_v25, %v7361_v6  ;;  %v2761_v44 = vpop.permute.xlu0 %2760 }
 0x27c   : > { %8285 = vst [vmem:[#allocation58_spill] sm:$0xff] %v7479_v4  ;;  %8286 = vst [vmem:[#allocation38_spill] sm:$0xff] %v7487_v3  ;;  %v3046_v11 = vmul.f32 %v7479_v4, %v7479_v4  ;;  %v3094_v2 = vadd.f32 0.81, %v3091_v28  ;;  %v2821_v56 = vadd.f32 0.81, %v2818_v18  ;;  %v4076_v55 = vpop.eup %4075  ;;  %4087 = vrsqrt.f32 %v3037_v34 }
 0x27d   : > { %v2878_v14 = vadd.f32 0.81, %v2875_v39  ;;  %v2935_v23 = vadd.f32 0.81, %v2932_v26  ;;  %v2992_v42 = vadd.f32 0.81, %v2989_v1  ;;  %v7498_v3 = vsub.f32 %v2763_v53, %v8287_v58  ;;  %v4078_v8 = vpop.eup %4077 }
 0x27e   : > { %4089 = vrsqrt.f32 %v2821_v56  ;;  %v3049_v43 = vadd.f32 0.81, %v3046_v11  ;;  %v7501_v62 = vsub.f32 %v2761_v44, %v8289_v9  ;;  %v8290_v4 = vld [vmem:[#allocation10_spill] sm:$0xff]  ;;  %v4199_v34 = vld [vmem:[#allocation2 + $0x10] sm:$0x3f]  ;;  %v8291_v53 = vld [vmem:[#allocation11_spill] sm:$0xff]  ;;  %v2778_v26 = vmul.f32 %v4076_v55, %v7372_v29 }
 0x27f   : > { %8288 = vst [vmem:[#allocation59_spill] sm:$0xff] %v7498_v3  ;;  %v7504_v6 = vsub.f32 %v2761_v44, %v8290_v4  ;;  %v4080_v28 = vpop.eup %4079  ;;  %4091 = vrsqrt.f32 %v2878_v14  ;;  %v3103_v25 = vmul.f32 %v7498_v3, %v7498_v3  ;;  %v7508_v18 = vsub.f32 %v2761_v44, %v4199_v34  ;;  %v8292_v11 = vld [vmem:[#allocation12_spill] sm:$0xff]  ;;  %v2767_v34 = vpop.permute.xlu1 %2766 }
 0x280   : > { %v7511_v58 = vsub.f32 %v2761_v44, %v8291_v53  ;;  %v7513_v39 = vpop.eup %4081  ;;  %4093 = vrsqrt.f32 %v3094_v2  ;;  %v2808_v9 = vmul.f32 %v7501_v62, %v7501_v62  ;;  %v2815_v4 = vmul.f32 %v4078_v8, %v7376_v45  ;;  %v8294_v8 = vld [vmem:[#allocation20_spill] sm:$0xff] }
 0x281   : > { %v2865_v14 = vmul.f32 %v7504_v6, %v7504_v6  ;;  %4095 = vrsqrt.f32 %v2935_v23  ;;  %v2922_v1 = vmul.f32 %v7508_v18, %v7508_v18  ;;  %v7524_v56 = vsub.f32 %v2761_v44, %v8292_v11 }
 0x282   : > { %4097 = vrsqrt.f32 %v2992_v42  ;;  %v2811_v53 = vadd.f32 0.81, %v2808_v9  ;;  %v2979_v29 = vmul.f32 %v7511_v58, %v7511_v58  ;;  %v3106_v2 = vadd.f32 0.81, %v3103_v25  ;;  %v4200_v25 = vld [vmem:[#allocation3 + $0x10] sm:$0x3f] }
 0x283   : > { %v2868_v55 = vadd.f32 0.81, %v2865_v14  ;;  %4099 = vrsqrt.f32 %v3049_v43  ;;  %v2925_v3 = vadd.f32 0.81, %v2922_v1  ;;  %v7529_v19 = vsub.f32 %v2761_v44, %v8293_v57 }
 0x284   : > { %v7531_v45 = vpop.eup %4083  ;;  %4101 = vrsqrt.f32 %v2811_v53  ;;  %v2982_v23 = vadd.f32 0.81, %v2979_v29  ;;  %v7534_v11 = vsub.f32 %v2767_v34, %v8294_v8  ;;  %v7537_v42 = vsub.f32 %v2767_v34, %v8295_v21 }
 0x285   : > { %v4086_v9 = vpop.eup %4085  ;;  %v2872_v14 = vmul.f32 %v4080_v28, %v7379_v60  ;;  %4103 = vrsqrt.f32 %v2868_v55  ;;  %v3036_v43 = vmul.f32 %v7524_v56, %v7524_v56  ;;  %v7542_v57 = vsub.f32 %v2767_v34, %v4200_v25 }
 0x286   : > { %v2786_v44 = vmul.f32 %v4086_v9, %v7434_v16  ;;  %4105 = vrsqrt.f32 %v2925_v3  ;;  %v2820_v1 = vmul.f32 %v7534_v11, %v7534_v11  ;;  %v2877_v21 = vmul.f32 %v7537_v42, %v7537_v42  ;;  %v7549_v53 = vpop.eup %4087 }
 0x287   : > { %8296 = vst [vmem:[#allocation47_spill] sm:$0xff] %v7549_v53  ;;  %4107 = vrsqrt.f32 %v2982_v23  ;;  %v3093_v60 = vmul.f32 %v7529_v19, %v7529_v19  ;;  %v2934_v28 = vmul.f32 %v7542_v57, %v7542_v57  ;;  %v7556_v55 = vsub.f32 %v2767_v34, %v8249_v32 }
 0x288   : > { %v4090_v16 = vpop.eup %4089  ;;  %v2788_v3 = vsub.f32 %v2778_v26, %v2786_v44  ;;  %4109 = vrsqrt.f32 %v3106_v2  ;;  %v2823_v29 = vadd.f32 0.81, %v2820_v1  ;;  %v2880_v8 = vadd.f32 0.81, %v2877_v21 }
 0x289   : > { %v4092_v9 = vpop.eup %4091  ;;  %v2827_v25 = vmul.f32 %v4090_v16, %v7466_v50  ;;  %v3039_v30 = vadd.f32 0.81, %v3036_v43  ;;  %v2937_v53 = vadd.f32 0.81, %v2934_v28  ;;  %v2991_v23 = vmul.f32 %v7556_v55, %v7556_v55  ;;  %v7571_v43 = vpop.permute.xlu0 %2764 }
 0x28a   : > { %v7561_v10 = vpop.eup %4093  ;;  %v7563_v61 = vmul.f32 %v2788_v3, %v2788_v3  ;;  %v2884_v32 = vmul.f32 %v4092_v9, %v7469_v31  ;;  %4111 = vrsqrt.f32 %v2823_v29  ;;  %v7567_v26 = vsub.f32 %v2767_v34, %v8250_v7 }
 0x28b   : > { %8297 = vst [vmem:[#allocation49_spill] sm:$0xff] %v7561_v10  ;;  %v7569_v2 = vpop.eup %4095  ;;  %v2830_v44 = vsub.f32 %v2815_v4, %v2827_v25  ;;  %v3096_v1 = vadd.f32 0.81, %v3093_v60  ;;  %4113 = vrsqrt.f32 %v2880_v8  ;;  %v2994_v50 = vadd.f32 0.81, %v2991_v23 }
 0x28c   : > { %v7573_v21 = vpop.eup %4097  ;;  %v2792_v16 = vadd.f32 0.1, %v7563_v61  ;;  %v2887_v3 = vsub.f32 %v2872_v14, %v2884_v32  ;;  %4115 = vrsqrt.f32 %v2937_v53  ;;  %v3048_v4 = vmul.f32 %v7567_v26, %v7567_v26 }
 0x28d   : > { %v7577_v31 = vpop.eup %4099  ;;  %v7579_v7 = vmul.f32 %v2830_v44, %v2830_v44  ;;  %4117 = vrsqrt.f32 %v2994_v50  ;;  %v7584_v60 = vsub.f32 %v2767_v34, %v8251_v48  ;;  %v7590_v9 = vsub.f32 %v7571_v43, %v8252_v22 }
 0x28e   : > { %8298 = vst [vmem:[#allocation33_spill] sm:$0xff] %v7577_v31  ;;  %v4102_v29 = vpop.eup %4101  ;;  %v7586_v8 = vmul.f32 %v2887_v3, %v2887_v3  ;;  %4119 = vrsqrt.f32 %v3039_v30  ;;  %v7594_v14 = vsub.f32 %v7571_v43, %v8253_v27  ;;  %v3051_v23 = vadd.f32 0.81, %v3048_v4  ;;  %v8302_v31 = vld [vmem:[#allocation46_spill] sm:$0xff] }
 0x28f   : > { %v4104_v53 = vpop.eup %4103  ;;  %v2836_v25 = vadd.f32 0.1, %v7579_v7  ;;  %4121 = vrsqrt.f32 %v3096_v1  ;;  %v3105_v48 = vmul.f32 %v7584_v60, %v7584_v60  ;;  %v7601_v30 = vmul.f32 %v7513_v39, %v7382_v37 }
 0x290   : > { %v4106_v34 = vpop.eup %4105  ;;  %4123 = vrcp.f32 %v2792_v16  ;;  %v2781_v22 = vmul.f32 %v7590_v9, %v7590_v9  ;;  %v2819_v27 = vmul.f32 %v7594_v14, %v7594_v14  ;;  %v2893_v44 = vadd.f32 0.1, %v7586_v8 }
 0x291   : > { %v4108_v32 = vpop.eup %4107  ;;  %v2817_v1 = vmul.f32 %v4102_v29, %v7501_v62  ;;  %v3108_v50 = vadd.f32 0.81, %v3105_v48  ;;  %v7611_v3 = vsub.f32 %v7571_v43, %v8257_v52  ;;  %4125 = vrcp.f32 %v2836_v25 }
 0x292   : > { %v7613_v4 = vpop.eup %4109  ;;  %v2874_v37 = vmul.f32 %v4104_v53, %v7504_v6  ;;  %v2783_v39 = vadd.f32 0.81, %v2781_v22  ;;  %v2822_v16 = vadd.f32 0.81, %v2819_v27  ;;  %v2931_v28 = vmul.f32 %v4106_v34, %v7508_v18  ;;  %v8300_v6 = vld [vmem:[#allocation36_spill] sm:$0xff] }
 0x293   : > { %8299 = vst [vmem:[#allocation53_spill] sm:$0xff] %v7613_v4  ;;  %4127 = vrsqrt.f32 %v3051_v23  ;;  %v2876_v10 = vmul.f32 %v7611_v3, %v7611_v3  ;;  %v7621_v62 = vsub.f32 %v7571_v43, %v7221_v40  ;;  %v2988_v52 = vmul.f32 %v4108_v32, %v7511_v58 }
 0x294   : > { %v4112_v29 = vpop.eup %4111  ;;  %4129 = vrsqrt.f32 %v3108_v50  ;;  %v7626_v25 = vsub.f32 %v7571_v43, %v8258_v36  ;;  %v7630_v53 = vsub.f32 %v7571_v43, %v8300_v6 }
 0x295   : > { %v4114_v18 = vpop.eup %4113  ;;  %v2829_v23 = vmul.f32 %v4112_v29, %v7534_v11  ;;  %4131 = vrsqrt.f32 %v2783_v39  ;;  %v2879_v48 = vadd.f32 0.81, %v2876_v10  ;;  %v2933_v40 = vmul.f32 %v7621_v62, %v7621_v62 }
 0x296   : > { %8301 = vst [vmem:[#allocation23_spill] sm:$0xff] %v7630_v53  ;;  %v4116_v34 = vpop.eup %4115  ;;  %v2886_v58 = vmul.f32 %v4114_v18, %v7537_v42  ;;  %4133 = vrsqrt.f32 %v2822_v16  ;;  %v2990_v36 = vmul.f32 %v7626_v25, %v7626_v25  ;;  %v3047_v22 = vmul.f32 %v7630_v53, %v7630_v53 }
 0x297   : > { %v4118_v27 = vpop.eup %4117  ;;  %v2832_v32 = vsub.f32 %v2817_v1, %v2829_v23  ;;  %v2943_v50 = vmul.f32 %v4116_v34, %v7542_v57  ;;  %4135 = vrsqrt.f32 %v2879_v48  ;;  %v2936_v11 = vadd.f32 0.81, %v2933_v40  ;;  %v8304_v34 = vld [vmem:[#allocation44_spill] sm:$0xff] }
 0x298   : > { %v4120_v10 = vpop.eup %4119  ;;  %4137 = vrcp.f32 %v2893_v44  ;;  %v2889_v39 = vsub.f32 %v2874_v37, %v2886_v58  ;;  %v3000_v29 = vmul.f32 %v4118_v27, %v7556_v55  ;;  %v2993_v6 = vadd.f32 0.81, %v2990_v36 }
 0x299   : > { %v4122_v42 = vpop.eup %4121  ;;  %v7642_v16 = vmul.f32 %v2832_v32, %v2832_v32  ;;  %v2946_v18 = vsub.f32 %v2931_v28, %v2943_v50  ;;  %v3050_v4 = vadd.f32 0.81, %v3047_v22  ;;  %v7646_v53 = vsub.f32 %v7571_v43, %v8302_v31 }
 0x29a   : > { %v7648_v1 = vpop.eup %4123  ;;  %v7650_v57 = vmul.f32 %v2889_v39, %v2889_v39  ;;  %v3003_v23 = vsub.f32 %v2988_v52, %v3000_v29  ;;  %4139 = vrsqrt.f32 %v2936_v11  ;;  %v2526_v44 = vadd.f32 %v7453_v49, %v7438_v17 }
 0x29b   : > { %v7656_v55 = vmul.f32 %v7531_v45, %v7413_v46  ;;  %v2838_v28 = vadd.f32 0.1, %v7642_v16  ;;  %v7659_v37 = vmul.f32 %v2946_v18, %v2946_v18  ;;  %4141 = vrsqrt.f32 %v2993_v6  ;;  %v7661_v43 = vpop.eup %4125 }
 0x29c   : > { %v3045_v31 = vmul.f32 %v4120_v10, %v7524_v56  ;;  %v2895_v48 = vadd.f32 0.1, %v7650_v57  ;;  %v3104_v52 = vmul.f32 %v7646_v53, %v7646_v53  ;;  %v2527_v17 = vadd.f32 %v7458_v63, %v7447_v51 }
 0x29d   : > { %v4128_v49 = vpop.eup %4127  ;;  %v7671_v46 = vmul.f32 %v7569_v2, %v7472_v12  ;;  %v7673_v45 = vmul.f32 %v3003_v23, %v3003_v23  ;;  %4143 = vrsqrt.f32 %v3050_v4  ;;  %v8303_v40 = vrot.slane %v7428_v38, 3 }
 0x29e   : > { %v8305_v56 = vrot.slane %v8304_v34, 3  ;;  %v4130_v36 = vpop.eup %4129  ;;  %4145 = vrcp.f32 %v2838_v28  ;;  %v3057_v22 = vmul.f32 %v4128_v49, %v7567_v26  ;;  %v8306_v51 = vrot.slane %v7339_v15, 3 }
 0x29f   : > { %v8307_v63 = vmov %v8303_v40  ;;  %v4132_v27 = vpop.eup %4131  ;;  %v2998_v4 = vmul.f32 %v7573_v21, %v7476_v5  ;;  %4147 = vrcp.f32 %v2895_v48  ;;  %v2952_v32 = vadd.f32 0.1, %v7659_v37 }
 0x2a0   : > { %v2578_v58 = vsel %vm417_vm5, %v8305_v56, %v8303_v40  ;;  %v2580_v12 = vsel %vm417_vm5, %v8307_v63, %v8306_v51  ;;  %v4134_v11 = vpop.eup %4133  ;;  %v3060_v10 = vsub.f32 %v3045_v31, %v3057_v22  ;;  %v2787_v39 = vmul.f32 %v4132_v27, %v7590_v9 }
 0x2a1   : > { %v2583_v2 = vadd.f32 %v2578_v58, %v2526_v44  ;;  %v2584_v50 = vadd.f32 %v2580_v12, %v2527_v17  ;;  %v3107_v26 = vadd.f32 0.81, %v3104_v52  ;;  %v8308_v15 = vrot.slane %v7441_v35, 4  ;;  %v4136_v6 = vpop.eup %4135 }
 0x2a2   : > { %v8309_v38 = vrot.slane %v7214_v54, 4  ;;  %v3009_v18 = vadd.f32 0.1, %v7673_v45  ;;  %v2828_v5 = vmul.f32 %v4134_v11, %v7594_v14  ;;  %v8310_v21 = vrot.slane %v7354_v20, 4  ;;  %v4138_v9 = vpop.eup %4137 }
 0x2a3   : > { %v8311_v23 = vmov %v8308_v15  ;;  %v7702_v31 = vmul.f32 %v3060_v10, %v3060_v10  ;;  %v2789_v48 = vsub.f32 %v7396_v33, %v2787_v39  ;;  %v2885_v54 = vmul.f32 %v4136_v6, %v7611_v3 }
 0x2a4   : > { %v2635_v29 = vsel %vm737_vm6, %v8309_v38, %v8308_v15  ;;  %v2637_v44 = vsel %vm737_vm6, %v8311_v23, %v8310_v21  ;;  %v3102_v17 = vmul.f32 %v4122_v42, %v7529_v19  ;;  %4149 = vrcp.f32 %v2952_v32  ;;  %v4140_v49 = vpop.eup %4139  ;;  %v8322_v23 = vld [vmem:[#allocation69_spill] sm:$0xff] }
 0x2a5   : > { %v2640_v28 = vadd.f32 %v2635_v29, %v2583_v2  ;;  %v2641_v52 = vadd.f32 %v2637_v44, %v2584_v50  ;;  %v3114_v14 = vmul.f32 %v4130_v36, %v7584_v60  ;;  %v2831_v20 = vsub.f32 %v7399_v41, %v2828_v5  ;;  %v4142_v58 = vpop.eup %4141 }
 0x2a6   : > { %v3066_v35 = vadd.f32 0.1, %v7702_v31  ;;  %v7710_v40 = vmul.f32 %v2789_v48, %v2789_v48  ;;  %v2888_v34 = vsub.f32 %v7407_v59, %v2885_v54  ;;  %v8312_v56 = vrot.slane %v7461_v0, 5  ;;  %v8323_v54 = vld [vmem:[#allocation70_spill] sm:$0xff] }
 0x2a7   : > { %v8313_v33 = vrot.slane %v7232_v13, 5  ;;  %v7718_v19 = vmul.f32 %v2831_v20, %v2831_v20  ;;  %4151 = vrsqrt.f32 %v3107_v26  ;;  %v8314_v60 = vrot.slane %v7358_v24, 5  ;;  %v4144_v13 = vpop.eup %4143  ;;  %v8317_v24 = vld [vmem:[#allocation48_spill] sm:$0xff]  ;;  %v8319_v26 = vld [vmem:[#allocation67_spill] sm:$0xff] }
 0x2a8   : > { %v8315_v41 = vmov %v8312_v56  ;;  %4153 = vrcp.f32 %v3009_v18  ;;  %v2793_v59 = vadd.f32 0.1, %v7710_v40  ;;  %v7726_v22 = vmul.f32 %v2888_v34, %v2888_v34  ;;  %v4146_v32 = vpop.eup %4145 }
 0x2a9   : > { %v2692_v3 = vsel %vm812_vm4, %v8313_v33, %v8312_v56  ;;  %v2694_v42 = vsel %vm812_vm4, %v8315_v41, %v8314_v60  ;;  %4155 = vrcp.f32 %v3066_v35  ;;  %v2837_v63 = vadd.f32 0.1, %v7718_v19  ;;  %v4148_v39 = vpop.eup %4147 }
 0x2aa   : > { %v2697_v36 = vadd.f32 %v2692_v3, %v2640_v28  ;;  %v2698_v51 = vadd.f32 %v2694_v42, %v2641_v52  ;;  %v2942_v12 = vmul.f32 %v4140_v49, %v7621_v62  ;;  %v8316_v2 = vrot.slane %v7495_v47, 6 }
 0x2ab   : > { %v8318_v27 = vrot.slane %v8317_v24, 6  ;;  %4157 = vrcp.f32 %v2793_v59  ;;  %v2894_v50 = vadd.f32 0.1, %v7726_v22  ;;  %v2999_v11 = vmul.f32 %v4142_v58, %v7626_v25  ;;  %v8330_v58 = vld [vmem:[#allocation23_spill] sm:$0xff]  ;;  %v8332_v59 = vld [vmem:[#allocation49_spill] sm:$0xff]  ;;  %v8334_v24 = vld [vmem:[#allocation38_spill] sm:$0xff] }
 0x2ac   : > { %4159 = vrcp.f32 %v2837_v63  ;;  %v8320_v15 = vrot.slane %v8319_v26, 6  ;;  %v8321_v38 = vmov %v8316_v2  ;;  %v3117_v29 = vsub.f32 %v3102_v17, %v3114_v14  ;;  %v8326_v14 = vld [vmem:[#allocation4_spill] sm:$0xff] }
 0x2ad   : > { %v2749_v0 = vsel %vm747_vm3, %v8318_v27, %v8316_v2  ;;  %4161 = vrcp.f32 %v2894_v50  ;;  %v2796_v18 = vmul.f32 %v7648_v1, %v7563_v61  ;;  %v7745_v5 = vmul.f32 %v4146_v32, %v7642_v16  ;;  %v8333_v2 = vld [vmem:[#allocation66_spill] sm:$0xff]  ;;  %v8336_v32 = vld [vmem:[#allocation53_spill] sm:$0xff] }
 0x2ae   : > { %v2754_v10 = vadd.f32 %v2749_v0, %v2697_v36  ;;  %v2751_v62 = vsel %vm747_vm3, %v8321_v38, %v8320_v15  ;;  %v7749_v25 = vmul.f32 %v7661_v43, %v7579_v7  ;;  %v2944_v21 = vsub.f32 %v7601_v30, %v7671_v46  ;;  %v4150_v1 = vpop.eup %4149  ;;  %v8324_v7 = vld [vmem:[#allocation71_spill] sm:$0xff]  ;;  %v8327_v30 = vld [vmem:[#allocation68_spill] sm:$0xff]  ;;  %v8331_v36 = vld [vmem:[#allocation37_spill] sm:$0xff] }
 0x2af   : > { %v2755_v6 = vadd.f32 %v2751_v62, %v2698_v51  ;;  %v2945_v47 = vsub.f32 %v8322_v23, %v2942_v12  ;;  %v7755_v44 = vmul.f32 %v4148_v39, %v7650_v57  ;;  %v3001_v48 = vsub.f32 %v7656_v55, %v2998_v4  ;;  %v8325_v43 = vld [vmem:[#allocation47_spill] sm:$0xff]  ;;  %v8328_v55 = vld [vmem:[#allocation58_spill] sm:$0xff]  ;;  %v8329_v4 = vld [vmem:[#allocation33_spill] sm:$0xff] }
 0x2b0   : > { %v2798_v28 = vadd.f32 %v2796_v18, %v2754_v10  ;;  %v3002_v61 = vsub.f32 %v8323_v54, %v2999_v11  ;;  %v7759_v16 = vmul.f32 %v2944_v21, %v2944_v21  ;;  %v3043_v17 = vmul.f32 %v8325_v43, %v8324_v7  ;;  %v8335_v0 = vld [vmem:[#allocation59_spill] sm:$0xff] }
 0x2b1   : > { %v7761_v52 = vmul.f32 %v2945_v47, %v2945_v47  ;;  %v3044_v46 = vmul.f32 %v8327_v30, %v8326_v14  ;;  %v7768_v20 = vmul.f32 %v4138_v9, %v7586_v8  ;;  %v7770_v57 = vmul.f32 %v3001_v48, %v3001_v48  ;;  %v4152_v34 = vpop.eup %4151 }
 0x2b2   : > { %v7772_v49 = vmul.f32 %v3002_v61, %v3002_v61  ;;  %v3055_v35 = vmul.f32 %v8329_v4, %v8328_v55  ;;  %v2851_v56 = vrot.slane %v7745_v5, 1  ;;  %v2950_v33 = vadd.f32 0.1, %v7759_v16  ;;  %v4154_v41 = vpop.eup %4153 }
 0x2b3   : > { %v2951_v3 = vadd.f32 0.1, %v7761_v52  ;;  %v3056_v60 = vmul.f32 %v4144_v13, %v8330_v58  ;;  %v3007_v8 = vadd.f32 0.1, %v7770_v57  ;;  %v3100_v51 = vmul.f32 %v8332_v59, %v8331_v36  ;;  %v4156_v63 = vpop.eup %4155 }
 0x2b4   : > { %v3008_v9 = vadd.f32 0.1, %v7772_v49  ;;  %v3058_v42 = vsub.f32 %v3043_v17, %v3055_v35  ;;  %4163 = vrcp.f32 %v2950_v33  ;;  %v3101_v27 = vmul.f32 %v8334_v24, %v8333_v2 }
 0x2b5   : > { %v3059_v12 = vsub.f32 %v3044_v46, %v3056_v60  ;;  %v3112_v50 = vmul.f32 %v8336_v32, %v8335_v0  ;;  %v4158_v11 = vpop.eup %4157  ;;  %4165 = vrcp.f32 %v2951_v3  ;;  %v3113_v10 = vmul.f32 %v4152_v34, %v7646_v53 }
 0x2b6   : > { %v7788_v13 = vmul.f32 %v3058_v42, %v3058_v42  ;;  %v7791_v39 = vmul.f32 %v3117_v29, %v3117_v29  ;;  %v4160_v26 = vpop.eup %4159  ;;  %v2797_v15 = vmul.f32 %v4158_v11, %v7710_v40  ;;  %v2848_v38 = vrot.slane %v7749_v25, 1 }
 0x2b7   : > { %4167 = vrcp.f32 %v3007_v8  ;;  %v3062_v62 = vmul.f32 %v3059_v12, %v3059_v12  ;;  %v4162_v18 = vpop.eup %4161  ;;  %v2843_v5 = vmul.f32 %v4160_v26, %v7718_v19  ;;  %v3115_v23 = vsub.f32 %v3100_v51, %v3112_v50 }
 0x2b8   : > { %4169 = vrcp.f32 %v3008_v9  ;;  %v3064_v21 = vadd.f32 0.1, %v7788_v13  ;;  %v2799_v47 = vadd.f32 %v2797_v15, %v2755_v6  ;;  %v2900_v48 = vmul.f32 %v4162_v18, %v7726_v22 }
 0x2b9   : > { %v3065_v53 = vadd.f32 0.1, %v3062_v62  ;;  %v3116_v29 = vsub.f32 %v3101_v27, %v3113_v10  ;;  %v2849_v54 = vrot.slane %v2843_v5, 1  ;;  %v3118_v61 = vmul.f32 %v3115_v23, %v3115_v23 }
 0x2ba   : > { %4171 = vrcp.f32 %v3064_v21  ;;  %v3123_v40 = vadd.f32 0.1, %v7791_v39  ;;  %v2958_v25 = vmul.f32 %v4150_v1, %v7659_v37  ;;  %v2908_v19 = vrot.slane %v7755_v44, 2 }
 0x2bb   : > { %4173 = vrcp.f32 %v3065_v53  ;;  %v7800_v7 = vmul.f32 %v3116_v29, %v3116_v29  ;;  %v2905_v43 = vrot.slane %v7768_v20, 2  ;;  %v3121_v17 = vadd.f32 0.1, %v3118_v61 }
 0x2bc   : > { %4175 = vrcp.f32 %v3123_v40  ;;  %v2850_v22 = vsel %vm532_vm1, %v2848_v38, %v2849_v54  ;;  %v2852_v6 = vsel %vm532_vm1, %v2849_v54, %v2851_v56  ;;  %v2906_v14 = vrot.slane %v2900_v48, 2 }
 0x2bd   : > { %v3142_v30 = vlaneseq  ;;  %v2855_v46 = vadd.f32 %v2850_v22, %v2798_v28  ;;  %v2856_v55 = vadd.f32 %v2852_v6, %v2799_v47  ;;  %v3122_v4 = vadd.f32 0.1, %v7800_v7 }
 0x2be   : > { %4177 = vrcp.f32 %v3121_v17  ;;  %v4164_v37 = vpop.eup %4163  ;;  %v3015_v1 = vmul.f32 %v4154_v41, %v7673_v45  ;;  %v2965_v44 = vrot.slane %v2958_v25, 3  ;;  %v3072_v34 = vmul.f32 %v4156_v63, %v7702_v31 }
 0x2bf   : > { %v4166_v35 = vpop.eup %4165  ;;  %v2956_v20 = vmul.f32 %v4164_v37, %v7759_v16  ;;  %4179 = vrcp.f32 %v3122_v4  ;;  %v2907_v56 = vsel %vm467_vm0, %v2905_v43, %v2906_v14  ;;  %v2909_v3 = vsel %vm467_vm0, %v2906_v14, %v2908_v19 }
 0x2c0   : > { %v2957_v28 = vmul.f32 %v4166_v35, %v7761_v52  ;;  %v3143_v58 = vshrl.u32 %v3142_v30, 7  ;;  %v2912_v8 = vadd.f32 %v2907_v56, %v2855_v46  ;;  %v2913_v9 = vadd.f32 %v2909_v3, %v2856_v55 }
 0x2c1   : > { %v4168_v33 = vpop.eup %4167  ;;  %v2962_v42 = vrot.slane %v2956_v20, 3  ;;  %v3022_v36 = vrot.slane %v3015_v1, 4  ;;  %v3079_v51 = vrot.slane %v3072_v34, 5  ;;  %v3146_v12 = vand.u32 127, %v3142_v30 }
 0x2c2   : > { %v4170_v60 = vpop.eup %4169  ;;  %v3013_v45 = vmul.f32 %v4168_v33, %v7770_v57  ;;  %v2963_v41 = vrot.slane %v2957_v28, 3  ;;  %v3144_v63 = vadd.s32 8, %v3143_v58  ;;  %vm3151_vm7 = vcmp.ge.s32.totalorder %v3143_v58, 3 }
 0x2c3   : > { %v3014_v16 = vmul.f32 %v4170_v60, %v7772_v49  ;;  %vm3157_vm8 = vcmp.ge.s32.totalorder %v3146_v12, 6  ;;  %vm3160_vm10 = vcmp.lt.s32.totalorder %v3146_v12, 16 }
 0x2c4   : > { %v4172_v31 = vpop.eup %4171  ;;  %v3019_v59 = vrot.slane %v3013_v45, 4  ;;  %v2964_v24 = vsel %vm417_vm5, %v2962_v42, %v2963_v41  ;;  %v2966_v52 = vsel %vm417_vm5, %v2963_v41, %v2965_v44  ;;  %vm3154_vm9 = vcmp.lt.s32.totalorder %v3144_v63, 13  ;;  %vm3158_vm11 = vmand %vm3151_vm7, %vm3157_vm8 }
 0x2c5   : > { %v4174_v2 = vpop.eup %4173  ;;  %v3020_v27 = vrot.slane %v3014_v16, 4  ;;  %v3070_v0 = vmul.f32 %v4172_v31, %v7788_v13  ;;  %v2969_v50 = vadd.f32 %v2964_v24, %v2912_v8  ;;  %v2970_v57 = vadd.f32 %v2966_v52, %v2913_v9  ;;  %vm3159_vm12 = vmand %vm3154_vm9, %vm3157_vm8 }
 0x2c6   : > { %v4176_v32 = vpop.eup %4175  ;;  %v3071_v11 = vmul.f32 %v4174_v2, %v3062_v62  ;;  %vm3161_vm13 = vmand %vm3158_vm11, %vm3160_vm10 }
 0x2c7   : > { %v3021_v49 = vsel %vm737_vm6, %v3019_v59, %v3020_v27  ;;  %v3023_v10 = vsel %vm737_vm6, %v3020_v27, %v3022_v36  ;;  %v3076_v26 = vrot.slane %v3070_v0, 5  ;;  %v3129_v15 = vmul.f32 %v4176_v32, %v7791_v39  ;;  %vm3162_vm14 = vmand %vm3159_vm12, %vm3160_vm10 }
 0x2c8   : > { %v4178_v38 = vpop.eup %4177  ;;  %v3026_v18 = vadd.f32 %v3021_v49, %v2969_v50  ;;  %v3027_v5 = vadd.f32 %v3023_v10, %v2970_v57  ;;  %v3077_v21 = vrot.slane %v3071_v11, 5 }
 0x2c9   : > { %v3127_v23 = vmul.f32 %v4178_v38, %v3118_v61  ;;  %v4180_v13 = vpop.eup %4179  ;;  %v3136_v47 = vrot.slane %v3129_v15, 6 }
 0x2ca   : > { %v3078_v62 = vsel %vm812_vm4, %v3076_v26, %v3077_v21  ;;  %v3080_v48 = vsel %vm812_vm4, %v3077_v21, %v3079_v51  ;;  %v3128_v53 = vmul.f32 %v4180_v13, %v7800_v7 }
 0x2cb   : > { %v3133_v29 = vrot.slane %v3127_v23, 6  ;;  %v3083_v39 = vadd.f32 %v3078_v62, %v3026_v18  ;;  %v3084_v54 = vadd.f32 %v3080_v48, %v3027_v5 }
 0x2cc   : > { %v3134_v40 = vrot.slane %v3128_v53, 6 }
 0x2ce   : > { %v3135_v61 = vsel %vm747_vm3, %v3133_v29, %v3134_v40  ;;  %v3137_v25 = vsel %vm747_vm3, %v3134_v40, %v3136_v47 }
 0x2cf   : > { %v3140_v19 = vadd.f32 %v3135_v61, %v3083_v39  ;;  %v3141_v43 = vadd.f32 %v3137_v25, %v3084_v54 }
 0x2d1   : > { %v3163_v17 = vsel %vm3161_vm13, %v3140_v19, 0.0  ;;  %v3164_v22 = vsel %vm3162_vm14, %v3141_v43, 0.0 }
 0x2d2   : > { %v3165_v6 = vadd.f32 %v3164_v22, %v3163_v17 }
 0x2d4   : > { %3166 = vadd.xlane.f32.xlu0 %v3165_v6 }
 0x361   : > { %v3167_v7 = vpop.xlane.xlu0 %3166 }
 0x362   : > { %v3168_v14 = vrot.slane %v3167_v7, 4 }
 0x364   : > { %v3169_v30 = vadd.f32 %v3168_v14, %v3167_v7 }
 0x366   : > { %v3170_v46 = vrot.slane %v3169_v30, 2 }
 0x368   : > { %v3171_v55 = vadd.f32 %v3170_v46, %v3169_v30 }
 0x36a   : > { %v3172_v4 = vrot.slane %v3171_v55, 1 }
 0x36c   : > { %v3173_v37 = vadd.f32 %v3172_v4, %v3171_v55 }
 0x36e   : > { %3327 = vpush %v3173_v37 }
 0x39f   : > { %s3328_s13 = spop %3327 }
 0x3a0   : > { %s3175_s21 = smul.f32 0.020408163, %s3328_s13 }
 0x3a2   : > { %v3176_v1 = vstv %s3175_s21 }
 0x3a3   : > { %3178 = vst.msk [vmem:[%s383_s20] sm:$0x1] %vm3177_vm15, %v3176_v1 }
 0x3a4 PF: > { %s14_s17 = sadd.s32 1, %s4223_s17   ;;  %s8337_s15 = smov %s4219_s16 }
 0x3a5   : > { %p11_p5 = scmp.ge.s32.totalorder %s14_s17, 4   ;;  %s8338_s16 = smov %s8340_s18 }
 0x3a7   :  { %13 = sbr.rel (!%p11_p5) target bundleno = 2 (0x2), region = 75 }

</bundles_post_ra>
